<compile_context>
chip_gen: v5e
topology: v5e:2x2
jax: 0.10.0
libtpu: 0.0.40
codegen_flags: <defaults>
</compile_context>

<pallas_src>
import functools

import jax
import jax.numpy as jnp
from jax import lax
from jax.experimental import pallas as pl
from jax.experimental.pallas import tpu as pltpu


CP = 128           # padded channel / lane width
BB_DEFAULT = 8     # images per grid step


# ------------------------------- fused kernel ------------------------------- #

def _convnet_kernel(p1_ref, w1_ref, b1_ref, w2_ref, b2_ref,
                    wf1_ref, bf1_ref, wf2_ref, bf2_ref,
                    out_ref, h1_ref, y2_ref, pooled_ref, *, bb: int):
    """Fused forward pass for a block of `bb` images.

    p1_ref : (bb, 144, 128) bf16  conv1 patches; row = ph*12+pw of the pooled
                                   12x12 grid, lanes = 4 pool positions x 32
                                   (25 patch features + 7 zero pad).
    w1_ref : (32, 128) bf16       conv1 weights (rows 25..31 and cols 10..127 zero).
    w2_ref : (9, 128, 128) bf16   conv2 weights per 3x3 tap, [cin, cout] padded.
    wf1_ref: (25, 128, 20) f32    fc1 weights per pooled position p = 5h+w.
    wf2_ref: (20, 128) f32        fc2 weights, output dim padded to 128 lanes.
    out_ref: (bb, 128) f32        log-softmax (lanes >= 10 are junk, host slices).
    h1_ref : (bb, 176, 128) f32   pooled conv1 raster per image + 32-row overhang.
    y2_ref : (144, 128) f32       conv2 output rows of the current image.
    pooled_ref: (bb*64, 128) f32  pool2 output, row b*64 + 8*h + w.
    """
    f32 = jnp.float32
    bf16 = jnp.bfloat16

    # Rows 144:176 of every h1 slot are the conv2 row-shift overhang; they only
    # ever feed invalid (oh>=10 / ow>=10) conv2 rows that pool2 never reads,
    # but zero them so every read is well defined.
    h1_ref[:, 144:176, :] = jnp.zeros((bb, 32, CP), f32)

    # ---- stage 1: conv1 + bias + ReLU + 2x2 max-pool, per image --------------
    # Bias/ReLU commute with max-pool, so pooling = running max over the four
    # 32-lane-group matmuls.  Live tile per image is ~36 vregs (no spills).
    def stage1_body(b, carry):
        acc = jnp.dot(p1_ref[b, :, pl.ds(0, 32)], w1_ref[...],
                      preferred_element_type=f32)
        for q in range(1, 4):
            acc = jnp.maximum(
                acc, jnp.dot(p1_ref[b, :, pl.ds(32 * q, 32)], w1_ref[...],
                             preferred_element_type=f32))
        h1_ref[b, 0:144, :] = jnp.maximum(acc + b1_ref[...], 0.0)
        return carry

    lax.fori_loop(0, bb, stage1_body, 0)

    # ---- stage 2: conv2 (3x3) + ReLU + 2x2 max-pool, per image ---------------
    # conv2 = 9 row-shifted (144,128)x(128,128) bf16 matmuls (K-tiled im2col on
    # the VMEM-resident 12x12 raster).  Rows contaminated by the shift map only
    # to invalid output rows which pool2 never touches.
    def stage2_body(b, carry):
        acc = jnp.dot(h1_ref[b, 0:144, :].astype(bf16), w2_ref[0],
                      preferred_element_type=f32)
        for t in range(1, 9):
            s = 12 * (t // 3) + (t % 3)
            acc = acc + jnp.dot(h1_ref[b, s:s + 144, :].astype(bf16), w2_ref[t],
                                preferred_element_type=f32)
        y2_ref[...] = jnp.maximum(acc + b2_ref[...], 0.0)      # (144, 128)

        # 2x2 max-pool on the valid 10x10 region: window corners of pooled row
        # ph sit at rows 24*ph + {0,2,4,6,8}; the other window elements at
        # +1, +12, +13.  Four stride-2 slab reads per pooled row replace the
        # former 100 single-row loads per image.
        for ph in range(5):
            r = 24 * ph
            v = jnp.maximum(
                jnp.maximum(y2_ref[pl.ds(r, 5, stride=2), :],
                            y2_ref[pl.ds(r + 1, 5, stride=2), :]),
                jnp.maximum(y2_ref[pl.ds(r + 12, 5, stride=2), :],
                            y2_ref[pl.ds(r + 13, 5, stride=2), :]))
            row0 = pl.multiple_of(b * 64 + 8 * ph, 8)
            pooled_ref[pl.ds(row0, 5), :] = v                  # rows 8*ph..8*ph+4
        return carry

    lax.fori_loop(0, bb, stage2_body, 0)

    # ---- fc1 (K-tiled over the 25 pooled positions) + ReLU + fc2 + log_softmax
    # pooled_ref row b*64 + 8*h + w holds pooled position (h, w) of image b, so
    # tap p gathers one stride-64 slab across the batch block — no (bb, 3200)
    # flatten buffer and no mostly-zero K=3200 matmul.
    hacc = None
    for p in range(25):
        row = 8 * (p // 5) + (p % 5)
        contrib = jnp.dot(pooled_ref[pl.ds(row, bb, stride=64), :], wf1_ref[p],
                          preferred_element_type=jnp.float32)
        hacc = contrib if hacc is None else hacc + contrib
    h = jnp.maximum(hacc + bf1_ref[...], 0.0)                  # (bb, 20)

    logits = jnp.dot(h, wf2_ref[...], preferred_element_type=jnp.float32)
    logits = logits + bf2_ref[...]                             # (bb, 128), 10 real
    lane = lax.broadcasted_iota(jnp.int32, logits.shape, 1)
    masked = jnp.where(lane < 10, logits, -jnp.inf)
    mx = jnp.max(masked, axis=-1, keepdims=True)
    lse = mx + jnp.log(jnp.sum(jnp.exp(masked - mx), axis=-1, keepdims=True))
    out_ref[...] = logits - lse        # lanes >= 10 are junk; host slices [:10]


# ------------------------------ host-side glue ------------------------------ #

def _stage1_patches(x):
    """Lane-dense conv1 im2col.

    Output[b, ph*12 + pw, 32*q + (5*di + dj)] = x[b, 0, 2*ph+qi+di, 2*pw+qj+dj]
    with q = 2*qi + qj the position inside the 2x2 pool window.
    """
    B = x.shape[0]
    img = x[:, 0]                                            # (B, 28, 28)
    cols = [img[:, di:di + 24, dj:dj + 24]
            for di in range(5) for dj in range(5)]
    p = jnp.stack(cols, axis=-1)                             # (B, 24, 24, 25)
    p = p.reshape(B, 12, 2, 12, 2, 25)                       # (b, ph, qi, pw, qj, k)
    p = p.transpose(0, 1, 3, 2, 4, 5)                        # (b, ph, pw, qi, qj, k)
    p = p.reshape(B, 144, 4, 25)
    p = jnp.pad(p, ((0, 0), (0, 0), (0, 0), (0, 7)))         # 25 -> 32 features
    return p.reshape(B, 144, 4 * 32).astype(jnp.bfloat16)


@functools.partial(jax.jit, static_argnames=("batch_block",))
def convnet_forward(x, params, *, batch_block=BB_DEFAULT):
    B = x.shape[0]
    bb = batch_block
    Bp = ((B + bb - 1) // bb) * bb
    if Bp != B:                                    # pad batch to a block multiple
        x = jnp.pad(x, ((0, Bp - B), (0, 0), (0, 0), (0, 0)))
    p1 = _stage1_patches(x)                        # (Bp, 144, 128) bf16

    out = pl.pallas_call(
        functools.partial(_convnet_kernel, bb=bb),
        out_shape=jax.ShapeDtypeStruct((Bp, CP), jnp.float32),
        grid=(Bp // bb,),
        in_specs=[
            pl.BlockSpec((bb, 144, CP), lambda i: (i, 0, 0)),   # conv1 patches
            pl.BlockSpec((32, CP), lambda i: (0, 0)),           # conv1 weight
            pl.BlockSpec((1, CP), lambda i: (0, 0)),            # conv1 bias
            pl.BlockSpec((9, CP, CP), lambda i: (0, 0, 0)),     # conv2 weight taps
            pl.BlockSpec((1, CP), lambda i: (0, 0)),            # conv2 bias
            pl.BlockSpec((25, CP, 20), lambda i: (0, 0, 0)),    # fc1 weight taps
            pl.BlockSpec((1, 20), lambda i: (0, 0)),            # fc1 bias
            pl.BlockSpec((20, CP), lambda i: (0, 0)),           # fc2 weight (padded N)
            pl.BlockSpec((1, CP), lambda i: (0, 0)),            # fc2 bias (padded)
        ],
        out_specs=pl.BlockSpec((bb, CP), lambda i: (i, 0)),
        scratch_shapes=[
            pltpu.VMEM((bb, 176, CP), jnp.float32),    # h1 raster + shift overhang
            pltpu.VMEM((144, CP), jnp.float32),        # conv2 rows of one image
            pltpu.VMEM((bb * 64, CP), jnp.float32),    # pool2 output (8-row groups)
        ],
        compiler_params=pltpu.CompilerParams(dimension_semantics=("parallel",)),
    )(p1, params["w1"], params["b1"], params["w2"], params["b2"],
      params["wf1"], params["bf1"], params["wf2"], params["bf2"])
    return out[:B, :10]


# ------------------------------ parameters ---------------------------------- #

def prepare_kernel_params(tp):
    """PyTorch-shaped params -> lane-dense kernel params (channels padded to 128)."""
    # conv1: (10,1,5,5) -> (32, 128) bf16; row k = 5*di + dj, col = cout.
    w1 = tp["conv1_w"].transpose(2, 3, 1, 0).reshape(25, 10)
    w1p = jnp.zeros((32, CP), jnp.float32).at[:25, :10].set(w1).astype(jnp.bfloat16)
    b1p = jnp.zeros((1, CP), jnp.float32).at[0, :10].set(tp["conv1_b"])
    # conv2: (12,10,3,3) -> (9, 128, 128) bf16; tap t = 3*di + dj, block [cin, cout].
    w2 = tp["conv2_w"].transpose(2, 3, 1, 0).reshape(9, 10, 12)
    w2p = jnp.zeros((9, CP, CP), jnp.float32).at[:, :10, :12].set(w2).astype(jnp.bfloat16)
    b2p = jnp.zeros((1, CP), jnp.float32).at[0, :12].set(tp["conv2_b"])
    # fc1: torch flatten of (12,5,5) is c*25 + h*5 + w; kernel tap p = 5*h + w.
    wf1 = tp["fc1_w"].reshape(20, 12, 5, 5).transpose(2, 3, 1, 0)   # (h, w, c, o)
    wf1p = jnp.zeros((25, CP, 20), jnp.float32).at[:, :12, :].set(
        wf1.reshape(25, 12, 20))
    # fc2: pad the output dim to 128 lanes (log_softmax masks lanes >= 10).
    wf2p = jnp.zeros((20, CP), jnp.float32).at[:, :10].set(tp["fc2_w"].T)
    bf2p = jnp.zeros((1, CP), jnp.float32).at[0, :10].set(tp["fc2_b"])
    return dict(w1=w1p, b1=b1p, w2=w2p, b2=b2p,
                wf1=wf1p, bf1=tp["fc1_b"].reshape(1, 20),
                wf2=wf2p, bf2=bf2p)


def init_params(key):
    ks = jax.random.split(key, 8)

    def u(k, shape, fan_in):
        bound = 1.0 / jnp.sqrt(fan_in)
        return jax.random.uniform(k, shape, jnp.float32, -bound, bound)

    torch_params = dict(
        conv1_w=u(ks[0], (10, 1, 5, 5), 25.0), conv1_b=u(ks[1], (10,), 25.0),
        conv2_w=u(ks[2], (12, 10, 3, 3), 90.0), conv2_b=u(ks[3], (12,), 90.0),
        fc1_w=u(ks[4], (20, 300), 300.0), fc1_b=u(ks[5], (20,), 300.0),
        fc2_w=u(ks[6], (10, 20), 20.0), fc2_b=u(ks[7], (10,), 20.0),
    )
    return torch_params, prepare_kernel_params(torch_params)


# ------------------------- reference (plain JAX/XLA) ------------------------- #

def reference_forward(x, tp):
    out = lax.conv_general_dilated(x, tp["conv1_w"], (1, 1), "VALID",
                                   dimension_numbers=("NCHW", "OIHW", "NCHW"))
    out = jnp.maximum(out + tp["conv1_b"][None, :, None, None], 0.0)
    out = lax.reduce_window(out, -jnp.inf, lax.max, (1, 1, 2, 2), (1, 1, 2, 2), "VALID")
    out = lax.conv_general_dilated(out, tp["conv2_w"], (1, 1), "VALID",
                                   dimension_numbers=("NCHW", "OIHW", "NCHW"))
    out = jnp.maximum(out + tp["conv2_b"][None, :, None, None], 0.0)
    out = lax.reduce_window(out, -jnp.inf, lax.max, (1, 1, 2, 2), (1, 1, 2, 2), "VALID")
    out = out.reshape(x.shape[0], -1)
    out = jnp.maximum(out @ tp["fc1_w"].T + tp["fc1_b"], 0.0)
    out = out @ tp["fc2_w"].T + tp["fc2_b"]
    return jax.nn.log_softmax(out, axis=1)


if __name__ == "__main__":
    key = jax.random.PRNGKey(0)
    pkey, xkey = jax.random.split(key)
    torch_params, kernel_params = init_params(pkey)

    # MNIST-style NCHW input; B=16 -> two grid steps of 8 images each.
    x = jax.random.normal(xkey, (16, 1, 28, 28), jnp.float32)

    out = jax.block_until_ready(convnet_forward(x, kernel_params))
    assert out.shape == (16, 10), out.shape

    ref = jax.block_until_ready(reference_forward(x, torch_params))
    # conv matmul operands are bf16 (f32 accumulate) -> compare with a loosened
    # tolerance; observed logit deviations are ~1e-3, margin is ~10x.
    max_diff = float(jnp.max(jnp.abs(out - ref)))
    assert jnp.allclose(out, ref, atol=3e-2, rtol=3e-2), f"max abs diff {max_diff}"
    # log_softmax rows must exponentiate-sum to 1
    assert jnp.allclose(jnp.sum(jnp.exp(out), axis=1), 1.0, atol=1e-3)

    print("KERNEL_OK")
</pallas_src>

<mosaic_0001>
module attributes {stable_mosaic.version = 11 : i64} {
  func.func @_convnet_kernel(%arg0: i32, %arg1: memref<8x144x128xbf16, #tpu.memory_space<vmem>>, %arg2: memref<32x128xbf16, #tpu.memory_space<vmem>>, %arg3: memref<1x128xf32, #tpu.memory_space<vmem>>, %arg4: memref<9x128x128xbf16, #tpu.memory_space<vmem>>, %arg5: memref<1x128xf32, #tpu.memory_space<vmem>>, %arg6: memref<25x128x20xf32, #tpu.memory_space<vmem>>, %arg7: memref<1x20xf32, #tpu.memory_space<vmem>>, %arg8: memref<20x128xf32, #tpu.memory_space<vmem>>, %arg9: memref<1x128xf32, #tpu.memory_space<vmem>>, %arg10: memref<8x128xf32, #tpu.memory_space<vmem>>, %arg11: memref<8x176x128xf32, #tpu.memory_space<vmem>>, %arg12: memref<144x128xf32, #tpu.memory_space<vmem>>, %arg13: memref<512x128xf32, #tpu.memory_space<vmem>>) attributes {dimension_semantics = [#tpu.dimension_semantics<parallel>], iteration_bounds = array<i64: 2>, scalar_prefetch = 0 : i64, scratch_operands = 3 : i64, tpu.core_type = #tpu.core_type<tc>, window_params = [{transform_indices = @transform_0, window_bounds = array<i64: 8, 144, 128>}, {pipeline_mode = #tpu.pipeline_mode<synchronous>, transform_indices = @transform_1, window_bounds = array<i64: 32, 128>}, {pipeline_mode = #tpu.pipeline_mode<synchronous>, transform_indices = @transform_2, window_bounds = array<i64: 1, 128>}, {pipeline_mode = #tpu.pipeline_mode<synchronous>, transform_indices = @transform_3, window_bounds = array<i64: 9, 128, 128>}, {pipeline_mode = #tpu.pipeline_mode<synchronous>, transform_indices = @transform_4, window_bounds = array<i64: 1, 128>}, {pipeline_mode = #tpu.pipeline_mode<synchronous>, transform_indices = @transform_5, window_bounds = array<i64: 25, 128, 20>}, {pipeline_mode = #tpu.pipeline_mode<synchronous>, transform_indices = @transform_6, window_bounds = array<i64: 1, 20>}, {pipeline_mode = #tpu.pipeline_mode<synchronous>, transform_indices = @transform_7, window_bounds = array<i64: 20, 128>}, {pipeline_mode = #tpu.pipeline_mode<synchronous>, transform_indices = @transform_8, window_bounds = array<i64: 1, 128>}, {transform_indices = @transform_9, window_bounds = array<i64: 8, 128>}]} {
    %cst = arith.constant 0.000000e+00 : f32
    %0 = vector.broadcast %cst : f32 to vector<8x32x128xf32>
    %c0 = arith.constant 0 : index
    %c144 = arith.constant 144 : index
    %c0_0 = arith.constant 0 : index
    %1 = vector.load %arg11[%c0, %c144, %c0_0] : memref<8x176x128xf32, #tpu.memory_space<vmem>>, vector<8x32x128xf32>
    tpu.vector_store %arg11[%c0, %c144, %c0_0], %0 {strides = array<i32>} : memref<8x176x128xf32, #tpu.memory_space<vmem>>, vector<8x32x128xf32>,
    %c0_i32 = arith.constant 0 : i32
    %c8_i32 = arith.constant 8 : i32
    %2 = arith.addi %c0_i32, %c8_i32 : i32
    %c1_i32 = arith.constant 1 : i32
    scf.for %arg14 = %c0_i32 to %2 step %c1_i32  : i32 {
      %155 = arith.index_cast %arg14 : i32 to index
      %c0_136 = arith.constant 0 : index
      %c0_137 = arith.constant 0 : index
      %156 = vector.load %arg1[%155, %c0_136, %c0_137] : memref<8x144x128xbf16, #tpu.memory_space<vmem>>, vector<1x144x32xbf16>
      %157 = vector.shape_cast %156 : vector<1x144x32xbf16> to vector<144x32xbf16>
      %c0_138 = arith.constant 0 : index
      %c0_139 = arith.constant 0 : index
      %158 = vector.load %arg2[%c0_138, %c0_139] : memref<32x128xbf16, #tpu.memory_space<vmem>>, vector<32x128xbf16>
      %cst_140 = arith.constant dense<0.000000e+00> : vector<144x128xf32>
      %159 = tpu.matmul %157, %158, %cst_140 {dimension_numbers = #tpu.dot_dimension_numbers<[1], [0], [0], [1], [0, 0, 1, 1], [], []>} : vector<144x32xbf16>, vector<32x128xbf16>, vector<144x128xf32> -> vector<144x128xf32>
      %160 = arith.index_cast %arg14 : i32 to index
      %c0_141 = arith.constant 0 : index
      %c32_142 = arith.constant 32 : index
      %161 = vector.load %arg1[%160, %c0_141, %c32_142] : memref<8x144x128xbf16, #tpu.memory_space<vmem>>, vector<1x144x32xbf16>
      %162 = vector.shape_cast %161 : vector<1x144x32xbf16> to vector<144x32xbf16>
      %c0_143 = arith.constant 0 : index
      %c0_144 = arith.constant 0 : index
      %163 = vector.load %arg2[%c0_143, %c0_144] : memref<32x128xbf16, #tpu.memory_space<vmem>>, vector<32x128xbf16>
      %cst_145 = arith.constant dense<0.000000e+00> : vector<144x128xf32>
      %164 = tpu.matmul %162, %163, %cst_145 {dimension_numbers = #tpu.dot_dimension_numbers<[1], [0], [0], [1], [0, 0, 1, 1], [], []>} : vector<144x32xbf16>, vector<32x128xbf16>, vector<144x128xf32> -> vector<144x128xf32>
      %165 = arith.maximumf %159, %164 : vector<144x128xf32>
      %166 = arith.index_cast %arg14 : i32 to index
      %c0_146 = arith.constant 0 : index
      %c64 = arith.constant 64 : index
      %167 = vector.load %arg1[%166, %c0_146, %c64] : memref<8x144x128xbf16, #tpu.memory_space<vmem>>, vector<1x144x32xbf16>
      %168 = vector.shape_cast %167 : vector<1x144x32xbf16> to vector<144x32xbf16>
      %c0_147 = arith.constant 0 : index
      %c0_148 = arith.constant 0 : index
      %169 = vector.load %arg2[%c0_147, %c0_148] : memref<32x128xbf16, #tpu.memory_space<vmem>>, vector<32x128xbf16>
      %cst_149 = arith.constant dense<0.000000e+00> : vector<144x128xf32>
      %170 = tpu.matmul %168, %169, %cst_149 {dimension_numbers = #tpu.dot_dimension_numbers<[1], [0], [0], [1], [0, 0, 1, 1], [], []>} : vector<144x32xbf16>, vector<32x128xbf16>, vector<144x128xf32> -> vector<144x128xf32>
      %171 = arith.maximumf %165, %170 : vector<144x128xf32>
      %172 = arith.index_cast %arg14 : i32 to index
      %c0_150 = arith.constant 0 : index
      %c96 = arith.constant 96 : index
      %173 = vector.load %arg1[%172, %c0_150, %c96] : memref<8x144x128xbf16, #tpu.memory_space<vmem>>, vector<1x144x32xbf16>
      %174 = vector.shape_cast %173 : vector<1x144x32xbf16> to vector<144x32xbf16>
      %c0_151 = arith.constant 0 : index
      %c0_152 = arith.constant 0 : index
      %175 = vector.load %arg2[%c0_151, %c0_152] : memref<32x128xbf16, #tpu.memory_space<vmem>>, vector<32x128xbf16>
      %cst_153 = arith.constant dense<0.000000e+00> : vector<144x128xf32>
      %176 = tpu.matmul %174, %175, %cst_153 {dimension_numbers = #tpu.dot_dimension_numbers<[1], [0], [0], [1], [0, 0, 1, 1], [], []>} : vector<144x32xbf16>, vector<32x128xbf16>, vector<144x128xf32> -> vector<144x128xf32>
      %177 = arith.maximumf %171, %176 : vector<144x128xf32>
      %c0_154 = arith.constant 0 : index
      %c0_155 = arith.constant 0 : index
      %178 = vector.load %arg3[%c0_154, %c0_155] : memref<1x128xf32, #tpu.memory_space<vmem>>, vector<1x128xf32>
      %179 = vector.broadcast %178 : vector<1x128xf32> to vector<144x128xf32>
      %180 = arith.addf %177, %179 : vector<144x128xf32>
      %cst_156 = arith.constant 0.000000e+00 : f32
      %181 = vector.broadcast %cst_156 : f32 to vector<144x128xf32>
      %182 = arith.maximumf %180, %181 : vector<144x128xf32>
      %183 = arith.index_cast %arg14 : i32 to index
      %c0_157 = arith.constant 0 : index
      %c0_158 = arith.constant 0 : index
      %184 = vector.load %arg11[%183, %c0_157, %c0_158] : memref<8x176x128xf32, #tpu.memory_space<vmem>>, vector<1x144x128xf32>
      %185 = vector.shape_cast %184 : vector<1x144x128xf32> to vector<144x128xf32>
      %186 = vector.shape_cast %182 : vector<144x128xf32> to vector<1x144x128xf32>
      tpu.vector_store %arg11[%183, %c0_157, %c0_158], %186 {strides = array<i32>} : memref<8x176x128xf32, #tpu.memory_space<vmem>>, vector<1x144x128xf32>,
    }
    %c8_i32_1 = arith.constant 8 : i32
    %c0_i32_2 = arith.constant 0 : i32
    %c8_i32_3 = arith.constant 8 : i32
    %3 = arith.addi %c0_i32_2, %c8_i32_3 : i32
    %c1_i32_4 = arith.constant 1 : i32
    scf.for %arg14 = %c0_i32_2 to %3 step %c1_i32_4  : i32 {
      %155 = arith.index_cast %arg14 : i32 to index
      %c0_136 = arith.constant 0 : index
      %c0_137 = arith.constant 0 : index
      %156 = vector.load %arg11[%155, %c0_136, %c0_137] : memref<8x176x128xf32, #tpu.memory_space<vmem>>, vector<1x144x128xf32>
      %157 = vector.shape_cast %156 : vector<1x144x128xf32> to vector<144x128xf32>
      %158 = arith.truncf %157 : vector<144x128xf32> to vector<144x128xbf16>
      %c0_138 = arith.constant 0 : index
      %c0_139 = arith.constant 0 : index
      %c0_140 = arith.constant 0 : index
      %159 = vector.load %arg4[%c0_138, %c0_139, %c0_140] : memref<9x128x128xbf16, #tpu.memory_space<vmem>>, vector<1x128x128xbf16>
      %160 = vector.shape_cast %159 : vector<1x128x128xbf16> to vector<128x128xbf16>
      %cst_141 = arith.constant dense<0.000000e+00> : vector<144x128xf32>
      %161 = tpu.matmul %158, %160, %cst_141 {dimension_numbers = #tpu.dot_dimension_numbers<[1], [0], [0], [1], [0, 0, 1, 1], [], []>} : vector<144x128xbf16>, vector<128x128xbf16>, vector<144x128xf32> -> vector<144x128xf32>
      %162 = arith.index_cast %arg14 : i32 to index
      %c1_142 = arith.constant 1 : index
      %c0_143 = arith.constant 0 : index
      %163 = vector.load %arg11[%162, %c1_142, %c0_143] : memref<8x176x128xf32, #tpu.memory_space<vmem>>, vector<1x144x128xf32>
      %164 = vector.shape_cast %163 : vector<1x144x128xf32> to vector<144x128xf32>
      %165 = arith.truncf %164 : vector<144x128xf32> to vector<144x128xbf16>
      %c1_144 = arith.constant 1 : index
      %c0_145 = arith.constant 0 : index
      %c0_146 = arith.constant 0 : index
      %166 = vector.load %arg4[%c1_144, %c0_145, %c0_146] : memref<9x128x128xbf16, #tpu.memory_space<vmem>>, vector<1x128x128xbf16>
      %167 = vector.shape_cast %166 : vector<1x128x128xbf16> to vector<128x128xbf16>
      %cst_147 = arith.constant dense<0.000000e+00> : vector<144x128xf32>
      %168 = tpu.matmul %165, %167, %cst_147 {dimension_numbers = #tpu.dot_dimension_numbers<[1], [0], [0], [1], [0, 0, 1, 1], [], []>} : vector<144x128xbf16>, vector<128x128xbf16>, vector<144x128xf32> -> vector<144x128xf32>
      %169 = arith.addf %161, %168 : vector<144x128xf32>
      %170 = arith.index_cast %arg14 : i32 to index
      %c2_148 = arith.constant 2 : index
      %c0_149 = arith.constant 0 : index
      %171 = vector.load %arg11[%170, %c2_148, %c0_149] : memref<8x176x128xf32, #tpu.memory_space<vmem>>, vector<1x144x128xf32>
      %172 = vector.shape_cast %171 : vector<1x144x128xf32> to vector<144x128xf32>
      %173 = arith.truncf %172 : vector<144x128xf32> to vector<144x128xbf16>
      %c2_150 = arith.constant 2 : index
      %c0_151 = arith.constant 0 : index
      %c0_152 = arith.constant 0 : index
      %174 = vector.load %arg4[%c2_150, %c0_151, %c0_152] : memref<9x128x128xbf16, #tpu.memory_space<vmem>>, vector<1x128x128xbf16>
      %175 = vector.shape_cast %174 : vector<1x128x128xbf16> to vector<128x128xbf16>
      %cst_153 = arith.constant dense<0.000000e+00> : vector<144x128xf32>
      %176 = tpu.matmul %173, %175, %cst_153 {dimension_numbers = #tpu.dot_dimension_numbers<[1], [0], [0], [1], [0, 0, 1, 1], [], []>} : vector<144x128xbf16>, vector<128x128xbf16>, vector<144x128xf32> -> vector<144x128xf32>
      %177 = arith.addf %169, %176 : vector<144x128xf32>
      %178 = arith.index_cast %arg14 : i32 to index
      %c12_154 = arith.constant 12 : index
      %c0_155 = arith.constant 0 : index
      %179 = vector.load %arg11[%178, %c12_154, %c0_155] : memref<8x176x128xf32, #tpu.memory_space<vmem>>, vector<1x144x128xf32>
      %180 = vector.shape_cast %179 : vector<1x144x128xf32> to vector<144x128xf32>
      %181 = arith.truncf %180 : vector<144x128xf32> to vector<144x128xbf16>
      %c3_156 = arith.constant 3 : index
      %c0_157 = arith.constant 0 : index
      %c0_158 = arith.constant 0 : index
      %182 = vector.load %arg4[%c3_156, %c0_157, %c0_158] : memref<9x128x128xbf16, #tpu.memory_space<vmem>>, vector<1x128x128xbf16>
      %183 = vector.shape_cast %182 : vector<1x128x128xbf16> to vector<128x128xbf16>
      %cst_159 = arith.constant dense<0.000000e+00> : vector<144x128xf32>
      %184 = tpu.matmul %181, %183, %cst_159 {dimension_numbers = #tpu.dot_dimension_numbers<[1], [0], [0], [1], [0, 0, 1, 1], [], []>} : vector<144x128xbf16>, vector<128x128xbf16>, vector<144x128xf32> -> vector<144x128xf32>
      %185 = arith.addf %177, %184 : vector<144x128xf32>
      %186 = arith.index_cast %arg14 : i32 to index
      %c13_160 = arith.constant 13 : index
      %c0_161 = arith.constant 0 : index
      %187 = vector.load %arg11[%186, %c13_160, %c0_161] : memref<8x176x128xf32, #tpu.memory_space<vmem>>, vector<1x144x128xf32>
      %188 = vector.shape_cast %187 : vector<1x144x128xf32> to vector<144x128xf32>
      %189 = arith.truncf %188 : vector<144x128xf32> to vector<144x128xbf16>
      %c4_162 = arith.constant 4 : index
      %c0_163 = arith.constant 0 : index
      %c0_164 = arith.constant 0 : index
      %190 = vector.load %arg4[%c4_162, %c0_163, %c0_164] : memref<9x128x128xbf16, #tpu.memory_space<vmem>>, vector<1x128x128xbf16>
      %191 = vector.shape_cast %190 : vector<1x128x128xbf16> to vector<128x128xbf16>
      %cst_165 = arith.constant dense<0.000000e+00> : vector<144x128xf32>
      %192 = tpu.matmul %189, %191, %cst_165 {dimension_numbers = #tpu.dot_dimension_numbers<[1], [0], [0], [1], [0, 0, 1, 1], [], []>} : vector<144x128xbf16>, vector<128x128xbf16>, vector<144x128xf32> -> vector<144x128xf32>
      %193 = arith.addf %185, %192 : vector<144x128xf32>
      %194 = arith.index_cast %arg14 : i32 to index
      %c14_166 = arith.constant 14 : index
      %c0_167 = arith.constant 0 : index
      %195 = vector.load %arg11[%194, %c14_166, %c0_167] : memref<8x176x128xf32, #tpu.memory_space<vmem>>, vector<1x144x128xf32>
      %196 = vector.shape_cast %195 : vector<1x144x128xf32> to vector<144x128xf32>
      %197 = arith.truncf %196 : vector<144x128xf32> to vector<144x128xbf16>
      %c5_168 = arith.constant 5 : index
      %c0_169 = arith.constant 0 : index
      %c0_170 = arith.constant 0 : index
      %198 = vector.load %arg4[%c5_168, %c0_169, %c0_170] : memref<9x128x128xbf16, #tpu.memory_space<vmem>>, vector<1x128x128xbf16>
      %199 = vector.shape_cast %198 : vector<1x128x128xbf16> to vector<128x128xbf16>
      %cst_171 = arith.constant dense<0.000000e+00> : vector<144x128xf32>
      %200 = tpu.matmul %197, %199, %cst_171 {dimension_numbers = #tpu.dot_dimension_numbers<[1], [0], [0], [1], [0, 0, 1, 1], [], []>} : vector<144x128xbf16>, vector<128x128xbf16>, vector<144x128xf32> -> vector<144x128xf32>
      %201 = arith.addf %193, %200 : vector<144x128xf32>
      %202 = arith.index_cast %arg14 : i32 to index
      %c24_172 = arith.constant 24 : index
      %c0_173 = arith.constant 0 : index
      %203 = vector.load %arg11[%202, %c24_172, %c0_173] : memref<8x176x128xf32, #tpu.memory_space<vmem>>, vector<1x144x128xf32>
      %204 = vector.shape_cast %203 : vector<1x144x128xf32> to vector<144x128xf32>
      %205 = arith.truncf %204 : vector<144x128xf32> to vector<144x128xbf16>
      %c6_174 = arith.constant 6 : index
      %c0_175 = arith.constant 0 : index
      %c0_176 = arith.constant 0 : index
      %206 = vector.load %arg4[%c6_174, %c0_175, %c0_176] : memref<9x128x128xbf16, #tpu.memory_space<vmem>>, vector<1x128x128xbf16>
      %207 = vector.shape_cast %206 : vector<1x128x128xbf16> to vector<128x128xbf16>
      %cst_177 = arith.constant dense<0.000000e+00> : vector<144x128xf32>
      %208 = tpu.matmul %205, %207, %cst_177 {dimension_numbers = #tpu.dot_dimension_numbers<[1], [0], [0], [1], [0, 0, 1, 1], [], []>} : vector<144x128xbf16>, vector<128x128xbf16>, vector<144x128xf32> -> vector<144x128xf32>
      %209 = arith.addf %201, %208 : vector<144x128xf32>
      %210 = arith.index_cast %arg14 : i32 to index
      %c25_178 = arith.constant 25 : index
      %c0_179 = arith.constant 0 : index
      %211 = vector.load %arg11[%210, %c25_178, %c0_179] : memref<8x176x128xf32, #tpu.memory_space<vmem>>, vector<1x144x128xf32>
      %212 = vector.shape_cast %211 : vector<1x144x128xf32> to vector<144x128xf32>
      %213 = arith.truncf %212 : vector<144x128xf32> to vector<144x128xbf16>
      %c7_180 = arith.constant 7 : index
      %c0_181 = arith.constant 0 : index
      %c0_182 = arith.constant 0 : index
      %214 = vector.load %arg4[%c7_180, %c0_181, %c0_182] : memref<9x128x128xbf16, #tpu.memory_space<vmem>>, vector<1x128x128xbf16>
      %215 = vector.shape_cast %214 : vector<1x128x128xbf16> to vector<128x128xbf16>
      %cst_183 = arith.constant dense<0.000000e+00> : vector<144x128xf32>
      %216 = tpu.matmul %213, %215, %cst_183 {dimension_numbers = #tpu.dot_dimension_numbers<[1], [0], [0], [1], [0, 0, 1, 1], [], []>} : vector<144x128xbf16>, vector<128x128xbf16>, vector<144x128xf32> -> vector<144x128xf32>
      %217 = arith.addf %209, %216 : vector<144x128xf32>
      %218 = arith.index_cast %arg14 : i32 to index
      %c26_184 = arith.constant 26 : index
      %c0_185 = arith.constant 0 : index
      %219 = vector.load %arg11[%218, %c26_184, %c0_185] : memref<8x176x128xf32, #tpu.memory_space<vmem>>, vector<1x144x128xf32>
      %220 = vector.shape_cast %219 : vector<1x144x128xf32> to vector<144x128xf32>
      %221 = arith.truncf %220 : vector<144x128xf32> to vector<144x128xbf16>
      %c8_186 = arith.constant 8 : index
      %c0_187 = arith.constant 0 : index
      %c0_188 = arith.constant 0 : index
      %222 = vector.load %arg4[%c8_186, %c0_187, %c0_188] : memref<9x128x128xbf16, #tpu.memory_space<vmem>>, vector<1x128x128xbf16>
      %223 = vector.shape_cast %222 : vector<1x128x128xbf16> to vector<128x128xbf16>
      %cst_189 = arith.constant dense<0.000000e+00> : vector<144x128xf32>
      %224 = tpu.matmul %221, %223, %cst_189 {dimension_numbers = #tpu.dot_dimension_numbers<[1], [0], [0], [1], [0, 0, 1, 1], [], []>} : vector<144x128xbf16>, vector<128x128xbf16>, vector<144x128xf32> -> vector<144x128xf32>
      %225 = arith.addf %217, %224 : vector<144x128xf32>
      %c0_190 = arith.constant 0 : index
      %c0_191 = arith.constant 0 : index
      %226 = vector.load %arg5[%c0_190, %c0_191] : memref<1x128xf32, #tpu.memory_space<vmem>>, vector<1x128xf32>
      %227 = vector.broadcast %226 : vector<1x128xf32> to vector<144x128xf32>
      %228 = arith.addf %225, %227 : vector<144x128xf32>
      %cst_192 = arith.constant 0.000000e+00 : f32
      %229 = vector.broadcast %cst_192 : f32 to vector<144x128xf32>
      %230 = arith.maximumf %228, %229 : vector<144x128xf32>
      %c0_193 = arith.constant 0 : index
      %c0_194 = arith.constant 0 : index
      %231 = vector.load %arg12[%c0_193, %c0_194] : memref<144x128xf32, #tpu.memory_space<vmem>>, vector<144x128xf32>
      tpu.vector_store %arg12[%c0_193, %c0_194], %230 {strides = array<i32>} : memref<144x128xf32, #tpu.memory_space<vmem>>, vector<144x128xf32>,
      %c0_195 = arith.constant 0 : index
      %c0_196 = arith.constant 0 : index
      %232 = tpu.strided_load %arg12[%c0_195, %c0_196] {strides = array<i32: 2, 1>} : memref<144x128xf32, #tpu.memory_space<vmem>>, vector<5x128xf32>
      %c1_197 = arith.constant 1 : index
      %c0_198 = arith.constant 0 : index
      %233 = tpu.strided_load %arg12[%c1_197, %c0_198] {strides = array<i32: 2, 1>} : memref<144x128xf32, #tpu.memory_space<vmem>>, vector<5x128xf32>
      %234 = arith.maximumf %232, %233 : vector<5x128xf32>
      %c12_199 = arith.constant 12 : index
      %c0_200 = arith.constant 0 : index
      %235 = tpu.strided_load %arg12[%c12_199, %c0_200] {strides = array<i32: 2, 1>} : memref<144x128xf32, #tpu.memory_space<vmem>>, vector<5x128xf32>
      %c13_201 = arith.constant 13 : index
      %c0_202 = arith.constant 0 : index
      %236 = tpu.strided_load %arg12[%c13_201, %c0_202] {strides = array<i32: 2, 1>} : memref<144x128xf32, #tpu.memory_space<vmem>>, vector<5x128xf32>
      %237 = arith.maximumf %235, %236 : vector<5x128xf32>
      %238 = arith.maximumf %234, %237 : vector<5x128xf32>
      %c64_i32 = arith.constant 64 : i32
      %239 = arith.muli %arg14, %c64_i32 : i32
      %c0_i32_203 = arith.constant 0 : i32
      %240 = arith.addi %239, %c0_i32_203 : i32
      %241 = tpu.assume_multiple %240, 8 : i32
      %242 = arith.index_cast %241 : i32 to index
      %c0_204 = arith.constant 0 : index
      %243 = vector.load %arg13[%242, %c0_204] : memref<512x128xf32, #tpu.memory_space<vmem>>, vector<5x128xf32>
      tpu.vector_store %arg13[%242, %c0_204], %238 {strides = array<i32>} : memref<512x128xf32, #tpu.memory_space<vmem>>, vector<5x128xf32>,
      %c24_205 = arith.constant 24 : index
      %c0_206 = arith.constant 0 : index
      %244 = tpu.strided_load %arg12[%c24_205, %c0_206] {strides = array<i32: 2, 1>} : memref<144x128xf32, #tpu.memory_space<vmem>>, vector<5x128xf32>
      %c25_207 = arith.constant 25 : index
      %c0_208 = arith.constant 0 : index
      %245 = tpu.strided_load %arg12[%c25_207, %c0_208] {strides = array<i32: 2, 1>} : memref<144x128xf32, #tpu.memory_space<vmem>>, vector<5x128xf32>
      %246 = arith.maximumf %244, %245 : vector<5x128xf32>
      %c36_209 = arith.constant 36 : index
      %c0_210 = arith.constant 0 : index
      %247 = tpu.strided_load %arg12[%c36_209, %c0_210] {strides = array<i32: 2, 1>} : memref<144x128xf32, #tpu.memory_space<vmem>>, vector<5x128xf32>
      %c37 = arith.constant 37 : index
      %c0_211 = arith.constant 0 : index
      %248 = tpu.strided_load %arg12[%c37, %c0_211] {strides = array<i32: 2, 1>} : memref<144x128xf32, #tpu.memory_space<vmem>>, vector<5x128xf32>
      %249 = arith.maximumf %247, %248 : vector<5x128xf32>
      %250 = arith.maximumf %246, %249 : vector<5x128xf32>
      %c64_i32_212 = arith.constant 64 : i32
      %251 = arith.muli %arg14, %c64_i32_212 : i32
      %c8_i32_213 = arith.constant 8 : i32
      %252 = arith.addi %251, %c8_i32_213 : i32
      %253 = tpu.assume_multiple %252, 8 : i32
      %254 = arith.index_cast %253 : i32 to index
      %c0_214 = arith.constant 0 : index
      %255 = vector.load %arg13[%254, %c0_214] : memref<512x128xf32, #tpu.memory_space<vmem>>, vector<5x128xf32>
      tpu.vector_store %arg13[%254, %c0_214], %250 {strides = array<i32>} : memref<512x128xf32, #tpu.memory_space<vmem>>, vector<5x128xf32>,
      %c48 = arith.constant 48 : index
      %c0_215 = arith.constant 0 : index
      %256 = tpu.strided_load %arg12[%c48, %c0_215] {strides = array<i32: 2, 1>} : memref<144x128xf32, #tpu.memory_space<vmem>>, vector<5x128xf32>
      %c49 = arith.constant 49 : index
      %c0_216 = arith.constant 0 : index
      %257 = tpu.strided_load %arg12[%c49, %c0_216] {strides = array<i32: 2, 1>} : memref<144x128xf32, #tpu.memory_space<vmem>>, vector<5x128xf32>
      %258 = arith.maximumf %256, %257 : vector<5x128xf32>
      %c60 = arith.constant 60 : index
      %c0_217 = arith.constant 0 : index
      %259 = tpu.strided_load %arg12[%c60, %c0_217] {strides = array<i32: 2, 1>} : memref<144x128xf32, #tpu.memory_space<vmem>>, vector<5x128xf32>
      %c61 = arith.constant 61 : index
      %c0_218 = arith.constant 0 : index
      %260 = tpu.strided_load %arg12[%c61, %c0_218] {strides = array<i32: 2, 1>} : memref<144x128xf32, #tpu.memory_space<vmem>>, vector<5x128xf32>
      %261 = arith.maximumf %259, %260 : vector<5x128xf32>
      %262 = arith.maximumf %258, %261 : vector<5x128xf32>
      %c64_i32_219 = arith.constant 64 : i32
      %263 = arith.muli %arg14, %c64_i32_219 : i32
      %c16_i32 = arith.constant 16 : i32
      %264 = arith.addi %263, %c16_i32 : i32
      %265 = tpu.assume_multiple %264, 8 : i32
      %266 = arith.index_cast %265 : i32 to index
      %c0_220 = arith.constant 0 : index
      %267 = vector.load %arg13[%266, %c0_220] : memref<512x128xf32, #tpu.memory_space<vmem>>, vector<5x128xf32>
      tpu.vector_store %arg13[%266, %c0_220], %262 {strides = array<i32>} : memref<512x128xf32, #tpu.memory_space<vmem>>, vector<5x128xf32>,
      %c72 = arith.constant 72 : index
      %c0_221 = arith.constant 0 : index
      %268 = tpu.strided_load %arg12[%c72, %c0_221] {strides = array<i32: 2, 1>} : memref<144x128xf32, #tpu.memory_space<vmem>>, vector<5x128xf32>
      %c73 = arith.constant 73 : index
      %c0_222 = arith.constant 0 : index
      %269 = tpu.strided_load %arg12[%c73, %c0_222] {strides = array<i32: 2, 1>} : memref<144x128xf32, #tpu.memory_space<vmem>>, vector<5x128xf32>
      %270 = arith.maximumf %268, %269 : vector<5x128xf32>
      %c84 = arith.constant 84 : index
      %c0_223 = arith.constant 0 : index
      %271 = tpu.strided_load %arg12[%c84, %c0_223] {strides = array<i32: 2, 1>} : memref<144x128xf32, #tpu.memory_space<vmem>>, vector<5x128xf32>
      %c85 = arith.constant 85 : index
      %c0_224 = arith.constant 0 : index
      %272 = tpu.strided_load %arg12[%c85, %c0_224] {strides = array<i32: 2, 1>} : memref<144x128xf32, #tpu.memory_space<vmem>>, vector<5x128xf32>
      %273 = arith.maximumf %271, %272 : vector<5x128xf32>
      %274 = arith.maximumf %270, %273 : vector<5x128xf32>
      %c64_i32_225 = arith.constant 64 : i32
      %275 = arith.muli %arg14, %c64_i32_225 : i32
      %c24_i32 = arith.constant 24 : i32
      %276 = arith.addi %275, %c24_i32 : i32
      %277 = tpu.assume_multiple %276, 8 : i32
      %278 = arith.index_cast %277 : i32 to index
      %c0_226 = arith.constant 0 : index
      %279 = vector.load %arg13[%278, %c0_226] : memref<512x128xf32, #tpu.memory_space<vmem>>, vector<5x128xf32>
      tpu.vector_store %arg13[%278, %c0_226], %274 {strides = array<i32>} : memref<512x128xf32, #tpu.memory_space<vmem>>, vector<5x128xf32>,
      %c96 = arith.constant 96 : index
      %c0_227 = arith.constant 0 : index
      %280 = tpu.strided_load %arg12[%c96, %c0_227] {strides = array<i32: 2, 1>} : memref<144x128xf32, #tpu.memory_space<vmem>>, vector<5x128xf32>
      %c97 = arith.constant 97 : index
      %c0_228 = arith.constant 0 : index
      %281 = tpu.strided_load %arg12[%c97, %c0_228] {strides = array<i32: 2, 1>} : memref<144x128xf32, #tpu.memory_space<vmem>>, vector<5x128xf32>
      %282 = arith.maximumf %280, %281 : vector<5x128xf32>
      %c108 = arith.constant 108 : index
      %c0_229 = arith.constant 0 : index
      %283 = tpu.strided_load %arg12[%c108, %c0_229] {strides = array<i32: 2, 1>} : memref<144x128xf32, #tpu.memory_space<vmem>>, vector<5x128xf32>
      %c109 = arith.constant 109 : index
      %c0_230 = arith.constant 0 : index
      %284 = tpu.strided_load %arg12[%c109, %c0_230] {strides = array<i32: 2, 1>} : memref<144x128xf32, #tpu.memory_space<vmem>>, vector<5x128xf32>
      %285 = arith.maximumf %283, %284 : vector<5x128xf32>
      %286 = arith.maximumf %282, %285 : vector<5x128xf32>
      %c64_i32_231 = arith.constant 64 : i32
      %287 = arith.muli %arg14, %c64_i32_231 : i32
      %c32_i32 = arith.constant 32 : i32
      %288 = arith.addi %287, %c32_i32 : i32
      %289 = tpu.assume_multiple %288, 8 : i32
      %290 = arith.index_cast %289 : i32 to index
      %c0_232 = arith.constant 0 : index
      %291 = vector.load %arg13[%290, %c0_232] : memref<512x128xf32, #tpu.memory_space<vmem>>, vector<5x128xf32>
      tpu.vector_store %arg13[%290, %c0_232], %286 {strides = array<i32>} : memref<512x128xf32, #tpu.memory_space<vmem>>, vector<5x128xf32>,
    }
    %c8_i32_5 = arith.constant 8 : i32
    %c0_6 = arith.constant 0 : index
    %c0_7 = arith.constant 0 : index
    %4 = tpu.strided_load %arg13[%c0_6, %c0_7] {strides = array<i32: 64, 1>} : memref<512x128xf32, #tpu.memory_space<vmem>>, vector<8x128xf32>
    %c0_8 = arith.constant 0 : index
    %c0_9 = arith.constant 0 : index
    %c0_10 = arith.constant 0 : index
    %5 = vector.load %arg6[%c0_8, %c0_9, %c0_10] : memref<25x128x20xf32, #tpu.memory_space<vmem>>, vector<1x128x20xf32>
    %6 = vector.shape_cast %5 : vector<1x128x20xf32> to vector<128x20xf32>
    %cst_11 = arith.constant dense<0.000000e+00> : vector<8x20xf32>
    %7 = tpu.matmul %4, %6, %cst_11 {dimension_numbers = #tpu.dot_dimension_numbers<[1], [0], [0], [1], [0, 0, 1, 1], [], []>} : vector<8x128xf32>, vector<128x20xf32>, vector<8x20xf32> -> vector<8x20xf32>
    %c1 = arith.constant 1 : index
    %c0_12 = arith.constant 0 : index
    %8 = tpu.strided_load %arg13[%c1, %c0_12] {strides = array<i32: 64, 1>} : memref<512x128xf32, #tpu.memory_space<vmem>>, vector<8x128xf32>
    %c1_13 = arith.constant 1 : index
    %c0_14 = arith.constant 0 : index
    %c0_15 = arith.constant 0 : index
    %9 = vector.load %arg6[%c1_13, %c0_14, %c0_15] : memref<25x128x20xf32, #tpu.memory_space<vmem>>, vector<1x128x20xf32>
    %10 = vector.shape_cast %9 : vector<1x128x20xf32> to vector<128x20xf32>
    %cst_16 = arith.constant dense<0.000000e+00> : vector<8x20xf32>
    %11 = tpu.matmul %8, %10, %cst_16 {dimension_numbers = #tpu.dot_dimension_numbers<[1], [0], [0], [1], [0, 0, 1, 1], [], []>} : vector<8x128xf32>, vector<128x20xf32>, vector<8x20xf32> -> vector<8x20xf32>
    %12 = arith.addf %7, %11 : vector<8x20xf32>
    %c2 = arith.constant 2 : index
    %c0_17 = arith.constant 0 : index
    %13 = tpu.strided_load %arg13[%c2, %c0_17] {strides = array<i32: 64, 1>} : memref<512x128xf32, #tpu.memory_space<vmem>>, vector<8x128xf32>
    %c2_18 = arith.constant 2 : index
    %c0_19 = arith.constant 0 : index
    %c0_20 = arith.constant 0 : index
    %14 = vector.load %arg6[%c2_18, %c0_19, %c0_20] : memref<25x128x20xf32, #tpu.memory_space<vmem>>, vector<1x128x20xf32>
    %15 = vector.shape_cast %14 : vector<1x128x20xf32> to vector<128x20xf32>
    %cst_21 = arith.constant dense<0.000000e+00> : vector<8x20xf32>
    %16 = tpu.matmul %13, %15, %cst_21 {dimension_numbers = #tpu.dot_dimension_numbers<[1], [0], [0], [1], [0, 0, 1, 1], [], []>} : vector<8x128xf32>, vector<128x20xf32>, vector<8x20xf32> -> vector<8x20xf32>
    %17 = arith.addf %12, %16 : vector<8x20xf32>
    %c3 = arith.constant 3 : index
    %c0_22 = arith.constant 0 : index
    %18 = tpu.strided_load %arg13[%c3, %c0_22] {strides = array<i32: 64, 1>} : memref<512x128xf32, #tpu.memory_space<vmem>>, vector<8x128xf32>
    %c3_23 = arith.constant 3 : index
    %c0_24 = arith.constant 0 : index
    %c0_25 = arith.constant 0 : index
    %19 = vector.load %arg6[%c3_23, %c0_24, %c0_25] : memref<25x128x20xf32, #tpu.memory_space<vmem>>, vector<1x128x20xf32>
    %20 = vector.shape_cast %19 : vector<1x128x20xf32> to vector<128x20xf32>
    %cst_26 = arith.constant dense<0.000000e+00> : vector<8x20xf32>
    %21 = tpu.matmul %18, %20, %cst_26 {dimension_numbers = #tpu.dot_dimension_numbers<[1], [0], [0], [1], [0, 0, 1, 1], [], []>} : vector<8x128xf32>, vector<128x20xf32>, vector<8x20xf32> -> vector<8x20xf32>
    %22 = arith.addf %17, %21 : vector<8x20xf32>
    %c4 = arith.constant 4 : index
    %c0_27 = arith.constant 0 : index
    %23 = tpu.strided_load %arg13[%c4, %c0_27] {strides = array<i32: 64, 1>} : memref<512x128xf32, #tpu.memory_space<vmem>>, vector<8x128xf32>
    %c4_28 = arith.constant 4 : index
    %c0_29 = arith.constant 0 : index
    %c0_30 = arith.constant 0 : index
    %24 = vector.load %arg6[%c4_28, %c0_29, %c0_30] : memref<25x128x20xf32, #tpu.memory_space<vmem>>, vector<1x128x20xf32>
    %25 = vector.shape_cast %24 : vector<1x128x20xf32> to vector<128x20xf32>
    %cst_31 = arith.constant dense<0.000000e+00> : vector<8x20xf32>
    %26 = tpu.matmul %23, %25, %cst_31 {dimension_numbers = #tpu.dot_dimension_numbers<[1], [0], [0], [1], [0, 0, 1, 1], [], []>} : vector<8x128xf32>, vector<128x20xf32>, vector<8x20xf32> -> vector<8x20xf32>
    %27 = arith.addf %22, %26 : vector<8x20xf32>
    %c8 = arith.constant 8 : index
    %c0_32 = arith.constant 0 : index
    %28 = tpu.strided_load %arg13[%c8, %c0_32] {strides = array<i32: 64, 1>} : memref<512x128xf32, #tpu.memory_space<vmem>>, vector<8x128xf32>
    %c5 = arith.constant 5 : index
    %c0_33 = arith.constant 0 : index
    %c0_34 = arith.constant 0 : index
    %29 = vector.load %arg6[%c5, %c0_33, %c0_34] : memref<25x128x20xf32, #tpu.memory_space<vmem>>, vector<1x128x20xf32>
    %30 = vector.shape_cast %29 : vector<1x128x20xf32> to vector<128x20xf32>
    %cst_35 = arith.constant dense<0.000000e+00> : vector<8x20xf32>
    %31 = tpu.matmul %28, %30, %cst_35 {dimension_numbers = #tpu.dot_dimension_numbers<[1], [0], [0], [1], [0, 0, 1, 1], [], []>} : vector<8x128xf32>, vector<128x20xf32>, vector<8x20xf32> -> vector<8x20xf32>
    %32 = arith.addf %27, %31 : vector<8x20xf32>
    %c9 = arith.constant 9 : index
    %c0_36 = arith.constant 0 : index
    %33 = tpu.strided_load %arg13[%c9, %c0_36] {strides = array<i32: 64, 1>} : memref<512x128xf32, #tpu.memory_space<vmem>>, vector<8x128xf32>
    %c6 = arith.constant 6 : index
    %c0_37 = arith.constant 0 : index
    %c0_38 = arith.constant 0 : index
    %34 = vector.load %arg6[%c6, %c0_37, %c0_38] : memref<25x128x20xf32, #tpu.memory_space<vmem>>, vector<1x128x20xf32>
    %35 = vector.shape_cast %34 : vector<1x128x20xf32> to vector<128x20xf32>
    %cst_39 = arith.constant dense<0.000000e+00> : vector<8x20xf32>
    %36 = tpu.matmul %33, %35, %cst_39 {dimension_numbers = #tpu.dot_dimension_numbers<[1], [0], [0], [1], [0, 0, 1, 1], [], []>} : vector<8x128xf32>, vector<128x20xf32>, vector<8x20xf32> -> vector<8x20xf32>
    %37 = arith.addf %32, %36 : vector<8x20xf32>
    %c10 = arith.constant 10 : index
    %c0_40 = arith.constant 0 : index
    %38 = tpu.strided_load %arg13[%c10, %c0_40] {strides = array<i32: 64, 1>} : memref<512x128xf32, #tpu.memory_space<vmem>>, vector<8x128xf32>
    %c7 = arith.constant 7 : index
    %c0_41 = arith.constant 0 : index
    %c0_42 = arith.constant 0 : index
    %39 = vector.load %arg6[%c7, %c0_41, %c0_42] : memref<25x128x20xf32, #tpu.memory_space<vmem>>, vector<1x128x20xf32>
    %40 = vector.shape_cast %39 : vector<1x128x20xf32> to vector<128x20xf32>
    %cst_43 = arith.constant dense<0.000000e+00> : vector<8x20xf32>
    %41 = tpu.matmul %38, %40, %cst_43 {dimension_numbers = #tpu.dot_dimension_numbers<[1], [0], [0], [1], [0, 0, 1, 1], [], []>} : vector<8x128xf32>, vector<128x20xf32>, vector<8x20xf32> -> vector<8x20xf32>
    %42 = arith.addf %37, %41 : vector<8x20xf32>
    %c11 = arith.constant 11 : index
    %c0_44 = arith.constant 0 : index
    %43 = tpu.strided_load %arg13[%c11, %c0_44] {strides = array<i32: 64, 1>} : memref<512x128xf32, #tpu.memory_space<vmem>>, vector<8x128xf32>
    %c8_45 = arith.constant 8 : index
    %c0_46 = arith.constant 0 : index
    %c0_47 = arith.constant 0 : index
    %44 = vector.load %arg6[%c8_45, %c0_46, %c0_47] : memref<25x128x20xf32, #tpu.memory_space<vmem>>, vector<1x128x20xf32>
    %45 = vector.shape_cast %44 : vector<1x128x20xf32> to vector<128x20xf32>
    %cst_48 = arith.constant dense<0.000000e+00> : vector<8x20xf32>
    %46 = tpu.matmul %43, %45, %cst_48 {dimension_numbers = #tpu.dot_dimension_numbers<[1], [0], [0], [1], [0, 0, 1, 1], [], []>} : vector<8x128xf32>, vector<128x20xf32>, vector<8x20xf32> -> vector<8x20xf32>
    %47 = arith.addf %42, %46 : vector<8x20xf32>
    %c12 = arith.constant 12 : index
    %c0_49 = arith.constant 0 : index
    %48 = tpu.strided_load %arg13[%c12, %c0_49] {strides = array<i32: 64, 1>} : memref<512x128xf32, #tpu.memory_space<vmem>>, vector<8x128xf32>
    %c9_50 = arith.constant 9 : index
    %c0_51 = arith.constant 0 : index
    %c0_52 = arith.constant 0 : index
    %49 = vector.load %arg6[%c9_50, %c0_51, %c0_52] : memref<25x128x20xf32, #tpu.memory_space<vmem>>, vector<1x128x20xf32>
    %50 = vector.shape_cast %49 : vector<1x128x20xf32> to vector<128x20xf32>
    %cst_53 = arith.constant dense<0.000000e+00> : vector<8x20xf32>
    %51 = tpu.matmul %48, %50, %cst_53 {dimension_numbers = #tpu.dot_dimension_numbers<[1], [0], [0], [1], [0, 0, 1, 1], [], []>} : vector<8x128xf32>, vector<128x20xf32>, vector<8x20xf32> -> vector<8x20xf32>
    %52 = arith.addf %47, %51 : vector<8x20xf32>
    %c16 = arith.constant 16 : index
    %c0_54 = arith.constant 0 : index
    %53 = tpu.strided_load %arg13[%c16, %c0_54] {strides = array<i32: 64, 1>} : memref<512x128xf32, #tpu.memory_space<vmem>>, vector<8x128xf32>
    %c10_55 = arith.constant 10 : index
    %c0_56 = arith.constant 0 : index
    %c0_57 = arith.constant 0 : index
    %54 = vector.load %arg6[%c10_55, %c0_56, %c0_57] : memref<25x128x20xf32, #tpu.memory_space<vmem>>, vector<1x128x20xf32>
    %55 = vector.shape_cast %54 : vector<1x128x20xf32> to vector<128x20xf32>
    %cst_58 = arith.constant dense<0.000000e+00> : vector<8x20xf32>
    %56 = tpu.matmul %53, %55, %cst_58 {dimension_numbers = #tpu.dot_dimension_numbers<[1], [0], [0], [1], [0, 0, 1, 1], [], []>} : vector<8x128xf32>, vector<128x20xf32>, vector<8x20xf32> -> vector<8x20xf32>
    %57 = arith.addf %52, %56 : vector<8x20xf32>
    %c17 = arith.constant 17 : index
    %c0_59 = arith.constant 0 : index
    %58 = tpu.strided_load %arg13[%c17, %c0_59] {strides = array<i32: 64, 1>} : memref<512x128xf32, #tpu.memory_space<vmem>>, vector<8x128xf32>
    %c11_60 = arith.constant 11 : index
    %c0_61 = arith.constant 0 : index
    %c0_62 = arith.constant 0 : index
    %59 = vector.load %arg6[%c11_60, %c0_61, %c0_62] : memref<25x128x20xf32, #tpu.memory_space<vmem>>, vector<1x128x20xf32>
    %60 = vector.shape_cast %59 : vector<1x128x20xf32> to vector<128x20xf32>
    %cst_63 = arith.constant dense<0.000000e+00> : vector<8x20xf32>
    %61 = tpu.matmul %58, %60, %cst_63 {dimension_numbers = #tpu.dot_dimension_numbers<[1], [0], [0], [1], [0, 0, 1, 1], [], []>} : vector<8x128xf32>, vector<128x20xf32>, vector<8x20xf32> -> vector<8x20xf32>
    %62 = arith.addf %57, %61 : vector<8x20xf32>
    %c18 = arith.constant 18 : index
    %c0_64 = arith.constant 0 : index
    %63 = tpu.strided_load %arg13[%c18, %c0_64] {strides = array<i32: 64, 1>} : memref<512x128xf32, #tpu.memory_space<vmem>>, vector<8x128xf32>
    %c12_65 = arith.constant 12 : index
    %c0_66 = arith.constant 0 : index
    %c0_67 = arith.constant 0 : index
    %64 = vector.load %arg6[%c12_65, %c0_66, %c0_67] : memref<25x128x20xf32, #tpu.memory_space<vmem>>, vector<1x128x20xf32>
    %65 = vector.shape_cast %64 : vector<1x128x20xf32> to vector<128x20xf32>
    %cst_68 = arith.constant dense<0.000000e+00> : vector<8x20xf32>
    %66 = tpu.matmul %63, %65, %cst_68 {dimension_numbers = #tpu.dot_dimension_numbers<[1], [0], [0], [1], [0, 0, 1, 1], [], []>} : vector<8x128xf32>, vector<128x20xf32>, vector<8x20xf32> -> vector<8x20xf32>
    %67 = arith.addf %62, %66 : vector<8x20xf32>
    %c19 = arith.constant 19 : index
    %c0_69 = arith.constant 0 : index
    %68 = tpu.strided_load %arg13[%c19, %c0_69] {strides = array<i32: 64, 1>} : memref<512x128xf32, #tpu.memory_space<vmem>>, vector<8x128xf32>
    %c13 = arith.constant 13 : index
    %c0_70 = arith.constant 0 : index
    %c0_71 = arith.constant 0 : index
    %69 = vector.load %arg6[%c13, %c0_70, %c0_71] : memref<25x128x20xf32, #tpu.memory_space<vmem>>, vector<1x128x20xf32>
    %70 = vector.shape_cast %69 : vector<1x128x20xf32> to vector<128x20xf32>
    %cst_72 = arith.constant dense<0.000000e+00> : vector<8x20xf32>
    %71 = tpu.matmul %68, %70, %cst_72 {dimension_numbers = #tpu.dot_dimension_numbers<[1], [0], [0], [1], [0, 0, 1, 1], [], []>} : vector<8x128xf32>, vector<128x20xf32>, vector<8x20xf32> -> vector<8x20xf32>
    %72 = arith.addf %67, %71 : vector<8x20xf32>
    %c20 = arith.constant 20 : index
    %c0_73 = arith.constant 0 : index
    %73 = tpu.strided_load %arg13[%c20, %c0_73] {strides = array<i32: 64, 1>} : memref<512x128xf32, #tpu.memory_space<vmem>>, vector<8x128xf32>
    %c14 = arith.constant 14 : index
    %c0_74 = arith.constant 0 : index
    %c0_75 = arith.constant 0 : index
    %74 = vector.load %arg6[%c14, %c0_74, %c0_75] : memref<25x128x20xf32, #tpu.memory_space<vmem>>, vector<1x128x20xf32>
    %75 = vector.shape_cast %74 : vector<1x128x20xf32> to vector<128x20xf32>
    %cst_76 = arith.constant dense<0.000000e+00> : vector<8x20xf32>
    %76 = tpu.matmul %73, %75, %cst_76 {dimension_numbers = #tpu.dot_dimension_numbers<[1], [0], [0], [1], [0, 0, 1, 1], [], []>} : vector<8x128xf32>, vector<128x20xf32>, vector<8x20xf32> -> vector<8x20xf32>
    %77 = arith.addf %72, %76 : vector<8x20xf32>
    %c24 = arith.constant 24 : index
    %c0_77 = arith.constant 0 : index
    %78 = tpu.strided_load %arg13[%c24, %c0_77] {strides = array<i32: 64, 1>} : memref<512x128xf32, #tpu.memory_space<vmem>>, vector<8x128xf32>
    %c15 = arith.constant 15 : index
    %c0_78 = arith.constant 0 : index
    %c0_79 = arith.constant 0 : index
    %79 = vector.load %arg6[%c15, %c0_78, %c0_79] : memref<25x128x20xf32, #tpu.memory_space<vmem>>, vector<1x128x20xf32>
    %80 = vector.shape_cast %79 : vector<1x128x20xf32> to vector<128x20xf32>
    %cst_80 = arith.constant dense<0.000000e+00> : vector<8x20xf32>
    %81 = tpu.matmul %78, %80, %cst_80 {dimension_numbers = #tpu.dot_dimension_numbers<[1], [0], [0], [1], [0, 0, 1, 1], [], []>} : vector<8x128xf32>, vector<128x20xf32>, vector<8x20xf32> -> vector<8x20xf32>
    %82 = arith.addf %77, %81 : vector<8x20xf32>
    %c25 = arith.constant 25 : index
    %c0_81 = arith.constant 0 : index
    %83 = tpu.strided_load %arg13[%c25, %c0_81] {strides = array<i32: 64, 1>} : memref<512x128xf32, #tpu.memory_space<vmem>>, vector<8x128xf32>
    %c16_82 = arith.constant 16 : index
    %c0_83 = arith.constant 0 : index
    %c0_84 = arith.constant 0 : index
    %84 = vector.load %arg6[%c16_82, %c0_83, %c0_84] : memref<25x128x20xf32, #tpu.memory_space<vmem>>, vector<1x128x20xf32>
    %85 = vector.shape_cast %84 : vector<1x128x20xf32> to vector<128x20xf32>
    %cst_85 = arith.constant dense<0.000000e+00> : vector<8x20xf32>
    %86 = tpu.matmul %83, %85, %cst_85 {dimension_numbers = #tpu.dot_dimension_numbers<[1], [0], [0], [1], [0, 0, 1, 1], [], []>} : vector<8x128xf32>, vector<128x20xf32>, vector<8x20xf32> -> vector<8x20xf32>
    %87 = arith.addf %82, %86 : vector<8x20xf32>
    %c26 = arith.constant 26 : index
    %c0_86 = arith.constant 0 : index
    %88 = tpu.strided_load %arg13[%c26, %c0_86] {strides = array<i32: 64, 1>} : memref<512x128xf32, #tpu.memory_space<vmem>>, vector<8x128xf32>
    %c17_87 = arith.constant 17 : index
    %c0_88 = arith.constant 0 : index
    %c0_89 = arith.constant 0 : index
    %89 = vector.load %arg6[%c17_87, %c0_88, %c0_89] : memref<25x128x20xf32, #tpu.memory_space<vmem>>, vector<1x128x20xf32>
    %90 = vector.shape_cast %89 : vector<1x128x20xf32> to vector<128x20xf32>
    %cst_90 = arith.constant dense<0.000000e+00> : vector<8x20xf32>
    %91 = tpu.matmul %88, %90, %cst_90 {dimension_numbers = #tpu.dot_dimension_numbers<[1], [0], [0], [1], [0, 0, 1, 1], [], []>} : vector<8x128xf32>, vector<128x20xf32>, vector<8x20xf32> -> vector<8x20xf32>
    %92 = arith.addf %87, %91 : vector<8x20xf32>
    %c27 = arith.constant 27 : index
    %c0_91 = arith.constant 0 : index
    %93 = tpu.strided_load %arg13[%c27, %c0_91] {strides = array<i32: 64, 1>} : memref<512x128xf32, #tpu.memory_space<vmem>>, vector<8x128xf32>
    %c18_92 = arith.constant 18 : index
    %c0_93 = arith.constant 0 : index
    %c0_94 = arith.constant 0 : index
    %94 = vector.load %arg6[%c18_92, %c0_93, %c0_94] : memref<25x128x20xf32, #tpu.memory_space<vmem>>, vector<1x128x20xf32>
    %95 = vector.shape_cast %94 : vector<1x128x20xf32> to vector<128x20xf32>
    %cst_95 = arith.constant dense<0.000000e+00> : vector<8x20xf32>
    %96 = tpu.matmul %93, %95, %cst_95 {dimension_numbers = #tpu.dot_dimension_numbers<[1], [0], [0], [1], [0, 0, 1, 1], [], []>} : vector<8x128xf32>, vector<128x20xf32>, vector<8x20xf32> -> vector<8x20xf32>
    %97 = arith.addf %92, %96 : vector<8x20xf32>
    %c28 = arith.constant 28 : index
    %c0_96 = arith.constant 0 : index
    %98 = tpu.strided_load %arg13[%c28, %c0_96] {strides = array<i32: 64, 1>} : memref<512x128xf32, #tpu.memory_space<vmem>>, vector<8x128xf32>
    %c19_97 = arith.constant 19 : index
    %c0_98 = arith.constant 0 : index
    %c0_99 = arith.constant 0 : index
    %99 = vector.load %arg6[%c19_97, %c0_98, %c0_99] : memref<25x128x20xf32, #tpu.memory_space<vmem>>, vector<1x128x20xf32>
    %100 = vector.shape_cast %99 : vector<1x128x20xf32> to vector<128x20xf32>
    %cst_100 = arith.constant dense<0.000000e+00> : vector<8x20xf32>
    %101 = tpu.matmul %98, %100, %cst_100 {dimension_numbers = #tpu.dot_dimension_numbers<[1], [0], [0], [1], [0, 0, 1, 1], [], []>} : vector<8x128xf32>, vector<128x20xf32>, vector<8x20xf32> -> vector<8x20xf32>
    %102 = arith.addf %97, %101 : vector<8x20xf32>
    %c32 = arith.constant 32 : index
    %c0_101 = arith.constant 0 : index
    %103 = tpu.strided_load %arg13[%c32, %c0_101] {strides = array<i32: 64, 1>} : memref<512x128xf32, #tpu.memory_space<vmem>>, vector<8x128xf32>
    %c20_102 = arith.constant 20 : index
    %c0_103 = arith.constant 0 : index
    %c0_104 = arith.constant 0 : index
    %104 = vector.load %arg6[%c20_102, %c0_103, %c0_104] : memref<25x128x20xf32, #tpu.memory_space<vmem>>, vector<1x128x20xf32>
    %105 = vector.shape_cast %104 : vector<1x128x20xf32> to vector<128x20xf32>
    %cst_105 = arith.constant dense<0.000000e+00> : vector<8x20xf32>
    %106 = tpu.matmul %103, %105, %cst_105 {dimension_numbers = #tpu.dot_dimension_numbers<[1], [0], [0], [1], [0, 0, 1, 1], [], []>} : vector<8x128xf32>, vector<128x20xf32>, vector<8x20xf32> -> vector<8x20xf32>
    %107 = arith.addf %102, %106 : vector<8x20xf32>
    %c33 = arith.constant 33 : index
    %c0_106 = arith.constant 0 : index
    %108 = tpu.strided_load %arg13[%c33, %c0_106] {strides = array<i32: 64, 1>} : memref<512x128xf32, #tpu.memory_space<vmem>>, vector<8x128xf32>
    %c21 = arith.constant 21 : index
    %c0_107 = arith.constant 0 : index
    %c0_108 = arith.constant 0 : index
    %109 = vector.load %arg6[%c21, %c0_107, %c0_108] : memref<25x128x20xf32, #tpu.memory_space<vmem>>, vector<1x128x20xf32>
    %110 = vector.shape_cast %109 : vector<1x128x20xf32> to vector<128x20xf32>
    %cst_109 = arith.constant dense<0.000000e+00> : vector<8x20xf32>
    %111 = tpu.matmul %108, %110, %cst_109 {dimension_numbers = #tpu.dot_dimension_numbers<[1], [0], [0], [1], [0, 0, 1, 1], [], []>} : vector<8x128xf32>, vector<128x20xf32>, vector<8x20xf32> -> vector<8x20xf32>
    %112 = arith.addf %107, %111 : vector<8x20xf32>
    %c34 = arith.constant 34 : index
    %c0_110 = arith.constant 0 : index
    %113 = tpu.strided_load %arg13[%c34, %c0_110] {strides = array<i32: 64, 1>} : memref<512x128xf32, #tpu.memory_space<vmem>>, vector<8x128xf32>
    %c22 = arith.constant 22 : index
    %c0_111 = arith.constant 0 : index
    %c0_112 = arith.constant 0 : index
    %114 = vector.load %arg6[%c22, %c0_111, %c0_112] : memref<25x128x20xf32, #tpu.memory_space<vmem>>, vector<1x128x20xf32>
    %115 = vector.shape_cast %114 : vector<1x128x20xf32> to vector<128x20xf32>
    %cst_113 = arith.constant dense<0.000000e+00> : vector<8x20xf32>
    %116 = tpu.matmul %113, %115, %cst_113 {dimension_numbers = #tpu.dot_dimension_numbers<[1], [0], [0], [1], [0, 0, 1, 1], [], []>} : vector<8x128xf32>, vector<128x20xf32>, vector<8x20xf32> -> vector<8x20xf32>
    %117 = arith.addf %112, %116 : vector<8x20xf32>
    %c35 = arith.constant 35 : index
    %c0_114 = arith.constant 0 : index
    %118 = tpu.strided_load %arg13[%c35, %c0_114] {strides = array<i32: 64, 1>} : memref<512x128xf32, #tpu.memory_space<vmem>>, vector<8x128xf32>
    %c23 = arith.constant 23 : index
    %c0_115 = arith.constant 0 : index
    %c0_116 = arith.constant 0 : index
    %119 = vector.load %arg6[%c23, %c0_115, %c0_116] : memref<25x128x20xf32, #tpu.memory_space<vmem>>, vector<1x128x20xf32>
    %120 = vector.shape_cast %119 : vector<1x128x20xf32> to vector<128x20xf32>
    %cst_117 = arith.constant dense<0.000000e+00> : vector<8x20xf32>
    %121 = tpu.matmul %118, %120, %cst_117 {dimension_numbers = #tpu.dot_dimension_numbers<[1], [0], [0], [1], [0, 0, 1, 1], [], []>} : vector<8x128xf32>, vector<128x20xf32>, vector<8x20xf32> -> vector<8x20xf32>
    %122 = arith.addf %117, %121 : vector<8x20xf32>
    %c36 = arith.constant 36 : index
    %c0_118 = arith.constant 0 : index
    %123 = tpu.strided_load %arg13[%c36, %c0_118] {strides = array<i32: 64, 1>} : memref<512x128xf32, #tpu.memory_space<vmem>>, vector<8x128xf32>
    %c24_119 = arith.constant 24 : index
    %c0_120 = arith.constant 0 : index
    %c0_121 = arith.constant 0 : index
    %124 = vector.load %arg6[%c24_119, %c0_120, %c0_121] : memref<25x128x20xf32, #tpu.memory_space<vmem>>, vector<1x128x20xf32>
    %125 = vector.shape_cast %124 : vector<1x128x20xf32> to vector<128x20xf32>
    %cst_122 = arith.constant dense<0.000000e+00> : vector<8x20xf32>
    %126 = tpu.matmul %123, %125, %cst_122 {dimension_numbers = #tpu.dot_dimension_numbers<[1], [0], [0], [1], [0, 0, 1, 1], [], []>} : vector<8x128xf32>, vector<128x20xf32>, vector<8x20xf32> -> vector<8x20xf32>
    %127 = arith.addf %122, %126 : vector<8x20xf32>
    %c0_123 = arith.constant 0 : index
    %c0_124 = arith.constant 0 : index
    %128 = vector.load %arg7[%c0_123, %c0_124] : memref<1x20xf32, #tpu.memory_space<vmem>>, vector<1x20xf32>
    %129 = vector.broadcast %128 : vector<1x20xf32> to vector<8x20xf32>
    %130 = arith.addf %127, %129 : vector<8x20xf32>
    %cst_125 = arith.constant 0.000000e+00 : f32
    %131 = vector.broadcast %cst_125 : f32 to vector<8x20xf32>
    %132 = arith.maximumf %130, %131 : vector<8x20xf32>
    %c0_126 = arith.constant 0 : index
    %c0_127 = arith.constant 0 : index
    %133 = vector.load %arg8[%c0_126, %c0_127] : memref<20x128xf32, #tpu.memory_space<vmem>>, vector<20x128xf32>
    %cst_128 = arith.constant dense<0.000000e+00> : vector<8x128xf32>
    %134 = tpu.matmul %132, %133, %cst_128 {dimension_numbers = #tpu.dot_dimension_numbers<[1], [0], [0], [1], [0, 0, 1, 1], [], []>} : vector<8x20xf32>, vector<20x128xf32>, vector<8x128xf32> -> vector<8x128xf32>
    %c0_129 = arith.constant 0 : index
    %c0_130 = arith.constant 0 : index
    %135 = vector.load %arg9[%c0_129, %c0_130] : memref<1x128xf32, #tpu.memory_space<vmem>>, vector<1x128xf32>
    %136 = vector.broadcast %135 : vector<1x128xf32> to vector<8x128xf32>
    %137 = arith.addf %134, %136 : vector<8x128xf32>
    %138 = tpu.iota {dimensions = array<i32: 1>} : vector<8x128xi32>
    %c10_i32 = arith.constant 10 : i32
    %139 = vector.broadcast %c10_i32 : i32 to vector<8x128xi32>
    %140 = arith.cmpi slt, %138, %139 : vector<8x128xi32>
    %cst_131 = arith.constant 0xFF800000 : f32
    %141 = vector.broadcast %cst_131 : f32 to vector<8x128xf32>
    %142 = arith.select %140, %137, %141 : vector<8x128xi1>, vector<8x128xf32>
    %cst_132 = arith.constant dense<0xFF800000> : vector<8xf32>
    %143 = vector.multi_reduction <maximumf>, %142, %cst_132 [1] : vector<8x128xf32> to vector<8xf32>
    %144 = vector.shape_cast %143 : vector<8xf32> to vector<8x1xf32>
    %145 = vector.broadcast %144 : vector<8x1xf32> to vector<8x128xf32>
    %146 = arith.subf %142, %145 : vector<8x128xf32>
    %147 = math.exp %146 : vector<8x128xf32>
    %cst_133 = arith.constant dense<0.000000e+00> : vector<8xf32>
    %148 = vector.multi_reduction <add>, %147, %cst_133 [1] : vector<8x128xf32> to vector<8xf32>
    %149 = vector.shape_cast %148 : vector<8xf32> to vector<8x1xf32>
    %150 = math.log %149 : vector<8x1xf32>
    %151 = arith.addf %144, %150 : vector<8x1xf32>
    %152 = vector.broadcast %151 : vector<8x1xf32> to vector<8x128xf32>
    %153 = arith.subf %137, %152 : vector<8x128xf32>
    %c0_134 = arith.constant 0 : index
    %c0_135 = arith.constant 0 : index
    %154 = vector.load %arg10[%c0_134, %c0_135] : memref<8x128xf32, #tpu.memory_space<vmem>>, vector<8x128xf32>
    tpu.vector_store %arg10[%c0_134, %c0_135], %153 {strides = array<i32>} : memref<8x128xf32, #tpu.memory_space<vmem>>, vector<8x128xf32>,
    return
  }
  func.func @transform_0(%arg0: i32) -> (i32, i32, i32) {
    %c0_i32 = arith.constant 0 : i32
    %c0_i32_0 = arith.constant 0 : i32
    %c0_i32_1 = arith.constant 0 : i32
    return %arg0, %c0_i32, %c0_i32_0 : i32, i32, i32
  }
  func.func @transform_1(%arg0: i32) -> (i32, i32) {
    %c0_i32 = arith.constant 0 : i32
    %c0_i32_0 = arith.constant 0 : i32
    %c0_i32_1 = arith.constant 0 : i32
    return %c0_i32, %c0_i32_0 : i32, i32
  }
  func.func @transform_2(%arg0: i32) -> (i32, i32) {
    %c0_i32 = arith.constant 0 : i32
    %c0_i32_0 = arith.constant 0 : i32
    %c0_i32_1 = arith.constant 0 : i32
    return %c0_i32, %c0_i32_0 : i32, i32
  }
  func.func @transform_3(%arg0: i32) -> (i32, i32, i32) {
    %c0_i32 = arith.constant 0 : i32
    %c0_i32_0 = arith.constant 0 : i32
    %c0_i32_1 = arith.constant 0 : i32
    %c0_i32_2 = arith.constant 0 : i32
    return %c0_i32, %c0_i32_0, %c0_i32_1 : i32, i32, i32
  }
  func.func @transform_4(%arg0: i32) -> (i32, i32) {
    %c0_i32 = arith.constant 0 : i32
    %c0_i32_0 = arith.constant 0 : i32
    %c0_i32_1 = arith.constant 0 : i32
    return %c0_i32, %c0_i32_0 : i32, i32
  }
  func.func @transform_5(%arg0: i32) -> (i32, i32, i32) {
    %c0_i32 = arith.constant 0 : i32
    %c0_i32_0 = arith.constant 0 : i32
    %c0_i32_1 = arith.constant 0 : i32
    %c0_i32_2 = arith.constant 0 : i32
    return %c0_i32, %c0_i32_0, %c0_i32_1 : i32, i32, i32
  }
  func.func @transform_6(%arg0: i32) -> (i32, i32) {
    %c0_i32 = arith.constant 0 : i32
    %c0_i32_0 = arith.constant 0 : i32
    %c0_i32_1 = arith.constant 0 : i32
    return %c0_i32, %c0_i32_0 : i32, i32
  }
  func.func @transform_7(%arg0: i32) -> (i32, i32) {
    %c0_i32 = arith.constant 0 : i32
    %c0_i32_0 = arith.constant 0 : i32
    %c0_i32_1 = arith.constant 0 : i32
    return %c0_i32, %c0_i32_0 : i32, i32
  }
  func.func @transform_8(%arg0: i32) -> (i32, i32) {
    %c0_i32 = arith.constant 0 : i32
    %c0_i32_0 = arith.constant 0 : i32
    %c0_i32_1 = arith.constant 0 : i32
    return %c0_i32, %c0_i32_0 : i32, i32
  }
  func.func @transform_9(%arg0: i32) -> (i32, i32) {
    %c0_i32 = arith.constant 0 : i32
    %c0_i32_0 = arith.constant 0 : i32
    return %arg0, %c0_i32 : i32, i32
  }
}

</mosaic_0001>

<bundles_post_ra>
// kernel: convnet_forward.1
= control target key start
LH: loop header
LB: loop body
LE: loop exit
PB: predicated region body
PF: predicated region fallthrough
CT: control target
= control target key end

     0   :  { %14 = vsyncpa [#allocation6], 0  ;;  %s7312_s0 = inlined_call_operand.vmem [shape: bf16[16,144,128], index: 0, kind: input, shape index: {}]   ;;  %s7313_s1 = inlined_call_operand.vmem [shape: bf16[32,128], index: 1, kind: input, shape index: {}]   ;;  %s7314_s2 = inlined_call_operand.vmem [shape: f32[1,128], index: 2, kind: input, shape index: {}]   ;;  %s7315_s3 = inlined_call_operand.vmem [shape: bf16[9,128,128], index: 3, kind: input, shape index: {}]   ;;  %s7316_s4 = inlined_call_operand.vmem [shape: f32[1,128], index: 4, kind: input, shape index: {}]   ;;  %s7317_s5 = inlined_call_operand.vmem [shape: f32[25,128,20], index: 5, kind: input, shape index: {}]   ;;  %s7318_s6 = inlined_call_operand.vmem [shape: f32[1,20], index: 6, kind: input, shape index: {}]   ;;  %s7319_s7 = inlined_call_operand.vmem [shape: f32[20,128], index: 7, kind: input, shape index: {}]   ;;  %s7320_s8 = inlined_call_operand.vmem [shape: f32[1,128], index: 8, kind: input, shape index: {}]   ;;  %s7321_s9 = inlined_call_operand.hbm [shape: f32[16,128], index: 9, kind: output, shape index: {}]  }
   0x1   :  { %16 = vsyncpa [#allocation6 + $0x1], 0  ;;  %s5245_s30 = smov 0   ;;  %s5247_s10 = smov 0  }
   0x2   :  { %s5249_s11 = smov 0   ;;  %s5251_s12 = smov 0  }
   0x3 LB: > { %s4031_s13 = sadd.s32 4294967295, %s5181_s12   ;;  %s4032_s14 = sadd.s32 4294967294, %s5181_s12   ;;  %s5181_s12 = sphi %s5251_s12, %s7352_s12   ;;  %s5177_s11 = sphi %s5249_s11, %s7351_s11   ;;  %s5173_s10 = sphi %s5247_s10, %s7350_s10   ;;  %s5169_s30 = sphi %s5245_s30, %s7349_s30  }
   0x4   : > { %s5268_s15 = sadd.s32 1, %s5181_s12   ;;  %s223_s16 = sadd.s32 1, %s5177_s11 }
   0x5   : > { %s220_s17 = ssub.s32 %s5181_s12, %s5268_s15  ;;  %p233_p0 = scmp.ne.s32.totalorder %s5177_s11, %s5173_s10 }
   0x6   : > { %p221_p1 = scmp.eq.s32.totalorder %s220_s17, 0  ;;  %p234_p2 = scmp.eq.s32.totalorder %s4031_s13, 1 }
   0x7   : > { %p239_p3 = scmp.ne.s32.totalorder %s5173_s10, %s5169_s30  ;;  %p240_p4 = scmp.eq.s32.totalorder %s4032_s14, 1 }
   0x8   : > { %s5278_s18 = scalar_select %p221_p1, %s5177_s11, %s223_s16  }
   0x9   : > { %p5280_p5 = por %p234_p2, %p233_p0  ;;  %p5284_p6 = por %p240_p4, %p239_p3 }
   0xa   : > { %p4035_p7 = scmp.ge.s32.totalorder %s5181_s12, 1  ;;  %p292_p8 = scmp.lt.s32.totalorder %s5181_s12, 3 }
   0xc   : > { %p293_p9 = pnand %p4035_p7, %p292_p8 }
   0xd   : > { %s7322_s21 = sand.u32 (!%p293_p9), 1, %s5173_s10   ;;  %s5291_s22 = sshll.u32 (!%p293_p9), %s4031_s13, 3 }
   0xe   : > { %296 = sbr.rel (%p293_p9) target bundleno = 1680 (0x690), region = 56  ;;  %s5295_s23 = sshll.u32 (!%p293_p9), %s7322_s21, 3 }
   0xf   : > { %p330_p10 = scmp.lt.s32.totalorder (!%p293_p9), %s5291_s22, 15  ;;  %s5305_s13 = smov (!%p293_p9), 0  }
  0x13   : > { %v5191_v0 = vmov 0.0   ;;  %s331_s24 = scalar_select %p330_p10, %s5291_s22, 15 }
  0x14   : > { %337 = vst [vmem:[#allocation2 + $0x90] sm:$0xff] %v5191_v0 }
  0x15   : > { %338 = vst [vmem:[#allocation2 + $0x98] sm:$0xff] %v5191_v0  ;;  %s5043_s25 = smul.u32 72, %s331_s24 }
  0x16   : > { %339 = vst [vmem:[#allocation2 + $0xa0] sm:$0xff] %v5191_v0 }
  0x17   : > { %340 = vst [vmem:[#allocation2 + $0xa8] sm:$0xff] %v5191_v0  ;;  %s5302_s28 = scalar_lea.vmem %s7312_s0, %s5043_s25 }
  0x18   : > { %341 = vst [vmem:[#allocation2 + $0x140] sm:$0xff] %v5191_v0 }
  0x19   : > { %342 = vst [vmem:[#allocation2 + $0x148] sm:$0xff] %v5191_v0 }
  0x1a   : > { %343 = vst [vmem:[#allocation2 + $0x150] sm:$0xff] %v5191_v0 }
  0x1b   : > { %344 = vst [vmem:[#allocation2 + $0x158] sm:$0xff] %v5191_v0 }
  0x1c   : > { %345 = vst [vmem:[#allocation2 + $0x1f0] sm:$0xff] %v5191_v0 }
  0x1d   : > { %346 = vst [vmem:[#allocation2 + $0x1f8] sm:$0xff] %v5191_v0 }
  0x1e   : > { %347 = vst [vmem:[#allocation2 + $0x200] sm:$0xff] %v5191_v0 }
  0x1f   : > { %348 = vst [vmem:[#allocation2 + $0x208] sm:$0xff] %v5191_v0 }
  0x20   : > { %349 = vst [vmem:[#allocation2 + $0x2a0] sm:$0xff] %v5191_v0 }
  0x21   : > { %350 = vst [vmem:[#allocation2 + $0x2a8] sm:$0xff] %v5191_v0 }
  0x22   : > { %351 = vst [vmem:[#allocation2 + $0x2b0] sm:$0xff] %v5191_v0 }
  0x23   : > { %352 = vst [vmem:[#allocation2 + $0x2b8] sm:$0xff] %v5191_v0 }
  0x24   : > { %353 = vst [vmem:[#allocation2 + $0x350] sm:$0xff] %v5191_v0 }
  0x25   : > { %354 = vst [vmem:[#allocation2 + $0x358] sm:$0xff] %v5191_v0 }
  0x26   : > { %355 = vst [vmem:[#allocation2 + $0x360] sm:$0xff] %v5191_v0 }
  0x27   : > { %356 = vst [vmem:[#allocation2 + $0x368] sm:$0xff] %v5191_v0 }
  0x28   : > { %357 = vst [vmem:[#allocation2 + $0x400] sm:$0xff] %v5191_v0 }
  0x29   : > { %358 = vst [vmem:[#allocation2 + $0x408] sm:$0xff] %v5191_v0 }
  0x2a   : > { %359 = vst [vmem:[#allocation2 + $0x410] sm:$0xff] %v5191_v0 }
  0x2b   : > { %360 = vst [vmem:[#allocation2 + $0x418] sm:$0xff] %v5191_v0 }
  0x2c   : > { %361 = vst [vmem:[#allocation2 + $0x4b0] sm:$0xff] %v5191_v0 }
  0x2d   : > { %362 = vst [vmem:[#allocation2 + $0x4b8] sm:$0xff] %v5191_v0 }
  0x2e   : > { %363 = vst [vmem:[#allocation2 + $0x4c0] sm:$0xff] %v5191_v0 }
  0x2f   : > { %364 = vst [vmem:[#allocation2 + $0x4c8] sm:$0xff] %v5191_v0 }
  0x30   : > { %365 = vst [vmem:[#allocation2 + $0x560] sm:$0xff] %v5191_v0 }
  0x31   : > { %366 = vst [vmem:[#allocation2 + $0x568] sm:$0xff] %v5191_v0 }
  0x32   : > { %367 = vst [vmem:[#allocation2 + $0x570] sm:$0xff] %v5191_v0 }
  0x33   : > { %368 = vst [vmem:[#allocation2 + $0x578] sm:$0xff] %v5191_v0 }
  0x34 LB: >> { %s4935_s14 = smul.u32 72, %s5185_s13  ;;  %s5192_s17 = smov 64   ;;  %v4946_v4 = vld [vmem:[%s7313_s1 + $0x8] sm:$0xff]  ;;  %v4945_v5 = vld [vmem:[%s7313_s1] sm:$0xff]  ;;  %vm457_vm0 = vcmask 261120   ;;  %s5185_s13 = sphi %s5305_s13, %s374_s13  }
  0x35   : >> { %s5193_s24 = smov 96   ;;  %s5194_s25 = smov 32   ;;  %707 = vmatpush.bf16.msra.mxu2 %v4946_v4  ;;  %491 = vmatpush.bf16.msra.mxu0 %v4946_v4  ;;  %v5395_v48 = vld [vmem:[%s7314_s2] ss:$0 sm:$0xff] }
  0x36   : >> { %s5312_s16 = scalar_lea.vmem %s5302_s28, %s4935_s14  ;;  %590 = vmatpush.bf16.msra.mxu1 %v4946_v4  ;;  %824 = vmatpush.bf16.msra.mxu3 %v4946_v4 }
  0x37   : >> { %v4936_v1 = vld [vmem:[%s5312_s16] sm:$0xff]  ;;  %v4937_v2 = vld [vmem:[%s5312_s16 + $0x8] sm:$0xff]  ;;  %v4938_v3 = vld [vmem:[%s5312_s16 + $0x10] sm:$0xff] }
  0x38   : >> { %656 = vrot.lane.b32.xlu0 %v4936_v1, %s5192_s17  ;;  %539 = vrot.lane.b32.xlu1 %v4936_v1, %s5193_s24  ;;  %v4939_v6 = vld [vmem:[%s5312_s16 + $0x18] sm:$0xff]  ;;  %v4940_v7 = vld [vmem:[%s5312_s16 + $0x20] sm:$0xff] }
  0x39   : >> { %775 = vrot.lane.b32.xlu2 %v4937_v2, %s5194_s25  ;;  %708 = vmatpush.bf16.msra.mxu2 %v4945_v5  ;;  %v4941_v8 = vld [vmem:[%s5312_s16 + $0x28] sm:$0xff]  ;;  %v4942_v9 = vld [vmem:[%s5312_s16 + $0x30] sm:$0xff]  ;;  %v4943_v10 = vld [vmem:[%s5312_s16 + $0x38] sm:$0xff] }
  0x3a   : >> { %492 = vmatpush.bf16.msra.mxu0 %v4945_v5  ;;  %591 = vmatpush.bf16.msra.mxu1 %v4945_v5  ;;  %v4944_v11 = vld [vmem:[%s5312_s16 + $0x40] sm:$0xff] }
  0x3b   : >> { %825 = vmatpush.bf16.msra.mxu3 %v4945_v5 }
  0x3d   : >> { %4084 = vmatmul.msk.bf16.vlgmr.msra.gmra.mxu0 %vm457_vm0, %v4936_v1 }
  0x40   : >> { %773 = vrot.lane.b32.xlu0 %v4936_v1, %s5194_s25  ;;  %658 = vrot.lane.b32.xlu1 %v4937_v2, %s5192_s17 }
  0x41   : >> { %541 = vrot.lane.b32.xlu2 %v4937_v2, %s5193_s24 }
  0x48   : >> { %660 = vrot.lane.b32.xlu0 %v4938_v3, %s5192_s17  ;;  %777 = vrot.lane.b32.xlu1 %v4938_v3, %s5194_s25 }
  0x49   : >> { %543 = vrot.lane.b32.xlu2 %v4938_v3, %s5193_s24 }
  0x4d   : >> { %4085 = vmatmul.msk.bf16.gmra.mxu0 %vm457_vm0, %v4937_v2 }
  0x50   : >> { %662 = vrot.lane.b32.xlu0 %v4939_v6, %s5192_s17  ;;  %779 = vrot.lane.b32.xlu1 %v4939_v6, %s5194_s25 }
  0x51   : >> { %545 = vrot.lane.b32.xlu2 %v4939_v6, %s5193_s24 }
  0x58   : >> { %664 = vrot.lane.b32.xlu0 %v4940_v7, %s5192_s17  ;;  %781 = vrot.lane.b32.xlu1 %v4940_v7, %s5194_s25 }
  0x59   : >> { %547 = vrot.lane.b32.xlu2 %v4940_v7, %s5193_s24 }
  0x5d   : >> { %4086 = vmatmul.msk.bf16.gmra.mxu0 %vm457_vm0, %v4938_v3 }
  0x60   : >> { %666 = vrot.lane.b32.xlu0 %v4941_v8, %s5192_s17  ;;  %783 = vrot.lane.b32.xlu1 %v4941_v8, %s5194_s25 }
  0x61   : >> { %549 = vrot.lane.b32.xlu2 %v4941_v8, %s5193_s24 }
  0x68   : >> { %668 = vrot.lane.b32.xlu0 %v4942_v9, %s5192_s17  ;;  %785 = vrot.lane.b32.xlu1 %v4942_v9, %s5194_s25 }
  0x69   : >> { %551 = vrot.lane.b32.xlu2 %v4942_v9, %s5193_s24 }
  0x6d   : >> { %4087 = vmatmul.msk.bf16.gmra.mxu0 %vm457_vm0, %v4939_v6 }
  0x70   : >> { %670 = vrot.lane.b32.xlu0 %v4943_v10, %s5192_s17  ;;  %787 = vrot.lane.b32.xlu1 %v4943_v10, %s5194_s25 }
  0x71   : >> { %553 = vrot.lane.b32.xlu2 %v4943_v10, %s5193_s24 }
  0x78   : >> { %672 = vrot.lane.b32.xlu0 %v4944_v11, %s5192_s17  ;;  %789 = vrot.lane.b32.xlu1 %v4944_v11, %s5194_s25  ;;  %s930_s17 = smul.u32 176, %s5185_s13  ;;  %s374_s13 = sadd.s32 1, %s5185_s13  }
  0x79   : >> { %555 = vrot.lane.b32.xlu2 %v4944_v11, %s5193_s24  ;;  %p371_p11 = scmp.ge.s32.totalorder %s374_s13, 8  }
  0x7a   : >> { %s5399_s24 = scalar_lea.vmem [#allocation2], %s930_s17  ;;  %s5439_s25 = smov (%p371_p11), 0  }
  0x7d   : >> { %4088 = vmatmul.msk.bf16.gmra.mxu0 %vm457_vm0, %v4940_v7 }
  0x8d   : >> { %4089 = vmatmul.msk.bf16.gmra.mxu0 %vm457_vm0, %v4941_v8 }
  0x93   : >> { %v776_v14 = vpop.permute.xlu2 %775 }
  0x9b   : >> { %v542_v17 = vpop.permute.xlu2 %541 }
  0x9d   : >> { %4090 = vmatmul.msk.bf16.gmra.mxu0 %vm457_vm0, %v4942_v9 }
  0xa3   : >> { %v544_v19 = vpop.permute.xlu2 %543 }
  0xaa   : >> { %v657_v12 = vpop.permute.xlu0 %656  ;;  %v540_v13 = vpop.permute.xlu1 %539 }
  0xab   : >> { %4102 = vmatmul.msk.bf16.vlgmr.msra.gmra.mxu2 %vm457_vm0, %v657_v12  ;;  %4093 = vmatmul.msk.bf16.vlgmr.msra.gmra.mxu1 %vm457_vm0, %v540_v13  ;;  %v546_v22 = vpop.permute.xlu2 %545 }
  0xad   : >> { %4091 = vmatmul.msk.bf16.gmra.mxu0 %vm457_vm0, %v4943_v10 }
  0xb2   : >> { %v774_v15 = vpop.permute.xlu0 %773  ;;  %v659_v16 = vpop.permute.xlu1 %658 }
  0xb3   : >> { %4111 = vmatmul.msk.bf16.vlgmr.msra.gmra.mxu3 %vm457_vm0, %v774_v15  ;;  %v548_v25 = vpop.permute.xlu2 %547 }
  0xba   : >> { %v661_v18 = vpop.permute.xlu0 %660  ;;  %v778_v20 = vpop.permute.xlu1 %777 }
  0xbb   : >> { %4103 = vmatmul.msk.bf16.gmra.mxu2 %vm457_vm0, %v659_v16  ;;  %4094 = vmatmul.msk.bf16.gmra.mxu1 %vm457_vm0, %v542_v17  ;;  %v550_v28 = vpop.permute.xlu2 %549  ;;  %v494_v32 = vpop.f32.mrf.mxu0 }
  0xbd   : >> { %4092 = vmatmul.msk.bf16.gmra.mxu0 %vm457_vm0, %v4944_v11 }
  0xc2   : >> { %v663_v21 = vpop.permute.xlu0 %662  ;;  %v780_v23 = vpop.permute.xlu1 %779 }
  0xc3   : >> { %4112 = vmatmul.msk.bf16.gmra.mxu3 %vm457_vm0, %v776_v14  ;;  %v552_v31 = vpop.permute.xlu2 %551  ;;  %v496_v34 = vpop.f32.mrf.mxu0 }
  0xca   : >> { %v665_v24 = vpop.permute.xlu0 %664  ;;  %v782_v26 = vpop.permute.xlu1 %781 }
  0xcb   : >> { %4104 = vmatmul.msk.bf16.gmra.mxu2 %vm457_vm0, %v661_v18  ;;  %4095 = vmatmul.msk.bf16.gmra.mxu1 %vm457_vm0, %v544_v19  ;;  %v554_v36 = vpop.permute.xlu2 %553  ;;  %v499_v38 = vpop.f32.mrf.mxu0 }
  0xd2   : >> { %v667_v27 = vpop.permute.xlu0 %666  ;;  %v784_v29 = vpop.permute.xlu1 %783 }
  0xd3   : >> { %4113 = vmatmul.msk.bf16.gmra.mxu3 %vm457_vm0, %v778_v20  ;;  %v556_v41 = vpop.permute.xlu2 %555  ;;  %v501_v42 = vpop.f32.mrf.mxu0 }
  0xda   : >> { %v669_v30 = vpop.permute.xlu0 %668  ;;  %v786_v33 = vpop.permute.xlu1 %785 }
  0xdb   : >> { %4105 = vmatmul.msk.bf16.gmra.mxu2 %vm457_vm0, %v663_v21  ;;  %4096 = vmatmul.msk.bf16.gmra.mxu1 %vm457_vm0, %v546_v22  ;;  %v504_v49 = vpop.f32.mrf.mxu0 }
  0xe2   : >> { %v671_v35 = vpop.permute.xlu0 %670  ;;  %v788_v37 = vpop.permute.xlu1 %787 }
  0xe3   : >> { %4114 = vmatmul.msk.bf16.gmra.mxu3 %vm457_vm0, %v780_v23  ;;  %v506_v62 = vpop.f32.mrf.mxu0 }
  0xea   : >> { %v673_v39 = vpop.permute.xlu0 %672  ;;  %v790_v45 = vpop.permute.xlu1 %789 }
  0xeb   : >> { %4106 = vmatmul.msk.bf16.gmra.mxu2 %vm457_vm0, %v665_v24  ;;  %4097 = vmatmul.msk.bf16.gmra.mxu1 %vm457_vm0, %v548_v25  ;;  %v509_v8 = vpop.f32.mrf.mxu0 }
  0xf3   : >> { %4115 = vmatmul.msk.bf16.gmra.mxu3 %vm457_vm0, %v782_v26  ;;  %v511_v20 = vpop.f32.mrf.mxu0 }
  0xfb   : >> { %4107 = vmatmul.msk.bf16.gmra.mxu2 %vm457_vm0, %v667_v27  ;;  %4098 = vmatmul.msk.bf16.gmra.mxu1 %vm457_vm0, %v550_v28 }
 0x103   : >> { %4116 = vmatmul.msk.bf16.gmra.mxu3 %vm457_vm0, %v784_v29  ;;  %v514_v29 = vpop.f32.mrf.mxu0 }
 0x10b   : >> { %4108 = vmatmul.msk.bf16.gmra.mxu2 %vm457_vm0, %v669_v30  ;;  %4099 = vmatmul.msk.bf16.gmra.mxu1 %vm457_vm0, %v552_v31 }
 0x113   : >> { %4117 = vmatmul.msk.bf16.gmra.mxu3 %vm457_vm0, %v786_v33 }
 0x11b   : >> { %4109 = vmatmul.msk.bf16.gmra.mxu2 %vm457_vm0, %v671_v35  ;;  %4100 = vmatmul.msk.bf16.gmra.mxu1 %vm457_vm0, %v554_v36 }
 0x123   : >> { %4118 = vmatmul.msk.bf16.gmra.mxu3 %vm457_vm0, %v788_v37 }
 0x128   : >> { %v593_v40 = vpop.f32.mrf.mxu1 }
 0x129   : >> { %v638_v46 = vmax.f32 %v494_v32, %v593_v40 }
 0x12b   : >> { %4110 = vmatmul.msk.bf16.gmra.mxu2 %vm457_vm0, %v673_v39  ;;  %4101 = vmatmul.msk.bf16.gmra.mxu1 %vm457_vm0, %v556_v41  ;;  %v516_v41 = vpop.f32.mrf.mxu0 }
 0x12e   : >> { %v710_v43 = vpop.f32.mrf.mxu2 }
 0x12f   : >> { %v755_v47 = vmax.f32 %v638_v46, %v710_v43 }
 0x130   : >> { %v595_v44 = vpop.f32.mrf.mxu1 }
 0x131   : >> { %v639_v55 = vmax.f32 %v496_v34, %v595_v44 }
 0x133   : >> { %4119 = vmatmul.msk.bf16.gmra.mxu3 %vm457_vm0, %v790_v45 }
 0x136   : >> { %v712_v50 = vpop.f32.mrf.mxu2  ;;  %v827_v51 = vpop.f32.mrf.mxu3 }
 0x137   : >> { %v872_v52 = vmax.f32 %v755_v47, %v827_v51  ;;  %v756_v57 = vmax.f32 %v639_v55, %v712_v50 }
 0x138   : >> { %v598_v53 = vpop.f32.mrf.mxu1 }
 0x139   : >> { %v894_v54 = vadd.f32 %v5395_v48, %v872_v52  ;;  %v640_v60 = vmax.f32 %v499_v38, %v598_v53 }
 0x13b   : >> { %v912_v56 = vmax.f32 %v894_v54, 0.0  ;;  %v519_v54 = vpop.f32.mrf.mxu0 }
 0x13d   : >> { %932 = vst [vmem:[%s5399_s24] sm:$0xff] %v912_v56 }
 0x13e   : >> { %v715_v58 = vpop.f32.mrf.mxu2  ;;  %v829_v59 = vpop.f32.mrf.mxu3 }
 0x13f   : >> { %v873_v61 = vmax.f32 %v756_v57, %v829_v59  ;;  %v757_v1 = vmax.f32 %v640_v60, %v715_v58 }
 0x140   : >> { %v600_v63 = vpop.f32.mrf.mxu1 }
 0x141   : >> { %v895_v0 = vadd.f32 %v5395_v48, %v873_v61  ;;  %v641_v9 = vmax.f32 %v501_v42, %v600_v63 }
 0x143   : >> { %v913_v2 = vmax.f32 %v895_v0, 0.0  ;;  %v521_v0 = vpop.f32.mrf.mxu0 }
 0x145   : >> { %933 = vst [vmem:[%s5399_s24 + $0x8] sm:$0xff] %v913_v2 }
 0x146   : >> { %v717_v3 = vpop.f32.mrf.mxu2  ;;  %v832_v4 = vpop.f32.mrf.mxu3 }
 0x147   : >> { %v874_v5 = vmax.f32 %v757_v1, %v832_v4  ;;  %v758_v11 = vmax.f32 %v641_v9, %v717_v3 }
 0x148   : >> { %v603_v6 = vpop.f32.mrf.mxu1 }
 0x149   : >> { %v896_v7 = vadd.f32 %v5395_v48, %v874_v5  ;;  %v642_v14 = vmax.f32 %v504_v49, %v603_v6 }
 0x14b   : >> { %v914_v10 = vmax.f32 %v896_v7, 0.0 }
 0x14d   : >> { %934 = vst [vmem:[%s5399_s24 + $0x10] sm:$0xff] %v914_v10  ;;  %v524_v10 = vpop.f32.mrf.mxu0 }
 0x14e   : >> { %v720_v12 = vpop.f32.mrf.mxu2  ;;  %v834_v13 = vpop.f32.mrf.mxu3 }
 0x14f   : >> { %v875_v15 = vmax.f32 %v758_v11, %v834_v13  ;;  %v759_v18 = vmax.f32 %v642_v14, %v720_v12 }
 0x150   : >> { %v605_v16 = vpop.f32.mrf.mxu1 }
 0x151   : >> { %v897_v17 = vadd.f32 %v5395_v48, %v875_v15  ;;  %v643_v26 = vmax.f32 %v506_v62, %v605_v16 }
 0x153   : >> { %v915_v19 = vmax.f32 %v897_v17, 0.0 }
 0x155   : >> { %935 = vst [vmem:[%s5399_s24 + $0x18] sm:$0xff] %v915_v19 }
 0x156   : >> { %v722_v21 = vpop.f32.mrf.mxu2  ;;  %v837_v22 = vpop.f32.mrf.mxu3 }
 0x157   : >> { %v876_v23 = vmax.f32 %v759_v18, %v837_v22  ;;  %v760_v28 = vmax.f32 %v643_v26, %v722_v21 }
 0x158   : >> { %v608_v24 = vpop.f32.mrf.mxu1 }
 0x159   : >> { %v898_v25 = vadd.f32 %v5395_v48, %v876_v23  ;;  %v644_v32 = vmax.f32 %v509_v8, %v608_v24  ;;  %v526_v23 = vpop.f32.mrf.mxu0 }
 0x15b   : >> { %v916_v27 = vmax.f32 %v898_v25, 0.0 }
 0x15d   : >> { %936 = vst [vmem:[%s5399_s24 + $0x20] sm:$0xff] %v916_v27 }
 0x15e   : >> { %v725_v30 = vpop.f32.mrf.mxu2  ;;  %v839_v31 = vpop.f32.mrf.mxu3 }
 0x15f   : >> { %v877_v33 = vmax.f32 %v760_v28, %v839_v31  ;;  %v761_v36 = vmax.f32 %v644_v32, %v725_v30 }
 0x160   : >> { %v610_v34 = vpop.f32.mrf.mxu1 }
 0x161   : >> { %v899_v35 = vadd.f32 %v5395_v48, %v877_v33  ;;  %v645_v44 = vmax.f32 %v511_v20, %v610_v34  ;;  %v529_v32 = vpop.f32.mrf.mxu0 }
 0x163   : >> { %v917_v37 = vmax.f32 %v899_v35, 0.0 }
 0x165   : >> { %937 = vst [vmem:[%s5399_s24 + $0x28] sm:$0xff] %v917_v37 }
 0x166   : >> { %v727_v38 = vpop.f32.mrf.mxu2  ;;  %v842_v39 = vpop.f32.mrf.mxu3 }
 0x167   : >> { %v878_v40 = vmax.f32 %v761_v36, %v842_v39  ;;  %v762_v46 = vmax.f32 %v645_v44, %v727_v38 }
 0x168   : >> { %v613_v42 = vpop.f32.mrf.mxu1 }
 0x169   : >> { %v900_v43 = vadd.f32 %v5395_v48, %v878_v40  ;;  %v646_v50 = vmax.f32 %v514_v29, %v613_v42  ;;  %v531_v44 = vpop.f32.mrf.mxu0 }
 0x16b   : >> { %v918_v45 = vmax.f32 %v900_v43, 0.0 }
 0x16d   : >> { %938 = vst [vmem:[%s5399_s24 + $0x30] sm:$0xff] %v918_v45 }
 0x16e   : >> { %v730_v47 = vpop.f32.mrf.mxu2  ;;  %v844_v49 = vpop.f32.mrf.mxu3 }
 0x16f   : >> { %v879_v51 = vmax.f32 %v762_v46, %v844_v49  ;;  %v763_v55 = vmax.f32 %v646_v50, %v730_v47 }
 0x170   : >> { %v615_v52 = vpop.f32.mrf.mxu1 }
 0x171   : >> { %v901_v53 = vadd.f32 %v5395_v48, %v879_v51  ;;  %v647_v62 = vmax.f32 %v516_v41, %v615_v52 }
 0x173   : >> { %v919_v56 = vmax.f32 %v901_v53, 0.0 }
 0x175   : >> { %939 = vst [vmem:[%s5399_s24 + $0x38] sm:$0xff] %v919_v56 }
 0x176   : >> { %v732_v57 = vpop.f32.mrf.mxu2  ;;  %v847_v58 = vpop.f32.mrf.mxu3 }
 0x177   : >> { %v880_v59 = vmax.f32 %v763_v55, %v847_v58  ;;  %v764_v1 = vmax.f32 %v647_v62, %v732_v57 }
 0x178   : >> { %v618_v60 = vpop.f32.mrf.mxu1 }
 0x179   : >> { %v902_v61 = vadd.f32 %v5395_v48, %v880_v59  ;;  %v648_v4 = vmax.f32 %v519_v54, %v618_v60  ;;  %v534_v54 = vpop.f32.mrf.mxu0 }
 0x17b   : >> { %v920_v63 = vmax.f32 %v902_v61, 0.0 }
 0x17d   : >> { %940 = vst [vmem:[%s5399_s24 + $0x40] sm:$0xff] %v920_v63 }
 0x17e   : >> { %v735_v2 = vpop.f32.mrf.mxu2  ;;  %v849_v3 = vpop.f32.mrf.mxu3 }
 0x17f   : >> { %v881_v5 = vmax.f32 %v764_v1, %v849_v3  ;;  %v765_v8 = vmax.f32 %v648_v4, %v735_v2 }
 0x180   : >> { %v620_v6 = vpop.f32.mrf.mxu1 }
 0x181   : >> { %v903_v7 = vadd.f32 %v5395_v48, %v881_v5  ;;  %v649_v16 = vmax.f32 %v521_v0, %v620_v6  ;;  %v536_v1 = vpop.f32.mrf.mxu0 }
 0x183   : >> { %v921_v9 = vmax.f32 %v903_v7, 0.0 }
 0x185   : >> { %941 = vst [vmem:[%s5399_s24 + $0x48] sm:$0xff] %v921_v9 }
 0x186   : >> { %v737_v11 = vpop.f32.mrf.mxu2  ;;  %v852_v12 = vpop.f32.mrf.mxu3 }
 0x187   : >> { %v882_v13 = vmax.f32 %v765_v8, %v852_v12  ;;  %v766_v18 = vmax.f32 %v649_v16, %v737_v11 }
 0x188   : >> { %v623_v14 = vpop.f32.mrf.mxu1 }
 0x189   : >> { %v904_v15 = vadd.f32 %v5395_v48, %v882_v13  ;;  %v650_v21 = vmax.f32 %v524_v10, %v623_v14 }
 0x18b   : >> { %v922_v17 = vmax.f32 %v904_v15, 0.0 }
 0x18d   : >> { %942 = vst [vmem:[%s5399_s24 + $0x50] sm:$0xff] %v922_v17 }
 0x18e   : >> { %v740_v19 = vpop.f32.mrf.mxu2  ;;  %v854_v20 = vpop.f32.mrf.mxu3 }
 0x18f   : >> { %v883_v22 = vmax.f32 %v766_v18, %v854_v20  ;;  %v767_v26 = vmax.f32 %v650_v21, %v740_v19 }
 0x190   : >> { %v625_v24 = vpop.f32.mrf.mxu1 }
 0x191   : >> { %v905_v25 = vadd.f32 %v5395_v48, %v883_v22  ;;  %v651_v34 = vmax.f32 %v526_v23, %v625_v24 }
 0x193   : >> { %v923_v27 = vmax.f32 %v905_v25, 0.0 }
 0x195   : >> { %943 = vst [vmem:[%s5399_s24 + $0x58] sm:$0xff] %v923_v27 }
 0x196   : >> { %v742_v28 = vpop.f32.mrf.mxu2  ;;  %v857_v29 = vpop.f32.mrf.mxu3 }
 0x197   : >> { %v884_v30 = vmax.f32 %v767_v26, %v857_v29  ;;  %v768_v36 = vmax.f32 %v651_v34, %v742_v28 }
 0x198   : >> { %v628_v33 = vpop.f32.mrf.mxu1 }
 0x199   : >> { %v906_v31 = vadd.f32 %v5395_v48, %v884_v30  ;;  %v652_v39 = vmax.f32 %v529_v32, %v628_v33 }
 0x19b   : >> { %v924_v35 = vmax.f32 %v906_v31, 0.0 }
 0x19d   : >> { %944 = vst [vmem:[%s5399_s24 + $0x60] sm:$0xff] %v924_v35 }
 0x19e   : >> { %v745_v37 = vpop.f32.mrf.mxu2  ;;  %v859_v38 = vpop.f32.mrf.mxu3 }
 0x19f   : >> { %v885_v40 = vmax.f32 %v768_v36, %v859_v38  ;;  %v769_v42 = vmax.f32 %v652_v39, %v745_v37 }
 0x1a0   : >> { %v630_v45 = vpop.f32.mrf.mxu1 }
 0x1a1   : >> { %v907_v41 = vadd.f32 %v5395_v48, %v885_v40  ;;  %v653_v51 = vmax.f32 %v531_v44, %v630_v45 }
 0x1a3   : >> { %v925_v43 = vmax.f32 %v907_v41, 0.0 }
 0x1a5   : >> { %945 = vst [vmem:[%s5399_s24 + $0x68] sm:$0xff] %v925_v43 }
 0x1a6   : >> { %v747_v46 = vpop.f32.mrf.mxu2  ;;  %v862_v47 = vpop.f32.mrf.mxu3 }
 0x1a7   : >> { %v886_v49 = vmax.f32 %v769_v42, %v862_v47  ;;  %v770_v53 = vmax.f32 %v653_v51, %v747_v46 }
 0x1a8   : >> { %v633_v55 = vpop.f32.mrf.mxu1 }
 0x1a9   : >> { %v908_v50 = vadd.f32 %v5395_v48, %v886_v49  ;;  %v654_v57 = vmax.f32 %v534_v54, %v633_v55 }
 0x1ab   : >> { %v926_v52 = vmax.f32 %v908_v50, 0.0 }
 0x1ad   : >> { %946 = vst [vmem:[%s5399_s24 + $0x70] sm:$0xff] %v926_v52 }
 0x1ae   : >> { %v864_v56 = vpop.f32.mrf.mxu3  ;;  %v750_v59 = vpop.f32.mrf.mxu2 }
 0x1af   : >> { %v887_v58 = vmax.f32 %v770_v53, %v864_v56  ;;  %v771_v61 = vmax.f32 %v654_v57, %v750_v59 }
 0x1b0   : >> { %v635_v2 = vpop.f32.mrf.mxu1 }
 0x1b1   : >> { %v909_v60 = vadd.f32 %v5395_v48, %v887_v58  ;;  %v655_v5 = vmax.f32 %v536_v1, %v635_v2 }
 0x1b3   : >> { %v927_v62 = vmax.f32 %v909_v60, 0.0 }
 0x1b5   : >> { %947 = vst [vmem:[%s5399_s24 + $0x78] sm:$0xff] %v927_v62 }
 0x1b6   : >> { %v867_v63 = vpop.f32.mrf.mxu3  ;;  %v752_v4 = vpop.f32.mrf.mxu2 }
 0x1b7   : >> { %v888_v0 = vmax.f32 %v771_v61, %v867_v63  ;;  %v772_v7 = vmax.f32 %v655_v5, %v752_v4 }
 0x1b9   : >> { %v910_v3 = vadd.f32 %v5395_v48, %v888_v0 }
 0x1bb   : >> { %v928_v6 = vmax.f32 %v910_v3, 0.0 }
 0x1bd   : >> { %948 = vst [vmem:[%s5399_s24 + $0x80] sm:$0xff] %v928_v6 }
 0x1be   : >> { %v869_v8 = vpop.f32.mrf.mxu3 }
 0x1bf   : >> { %v889_v9 = vmax.f32 %v772_v7, %v869_v8 }
 0x1c1   : >> { %v911_v10 = vadd.f32 %v5395_v48, %v889_v9  ;;  %373 = sbr.rel (!%p371_p11) target bundleno = 52 (0x34), region = 188 }
 0x1c3   : >> { %v929_v11 = vmax.f32 %v911_v10, 0.0 }
 0x1c5   : >> { %949 = vst [vmem:[%s5399_s24 + $0x88] sm:$0xff] %v929_v11 }
 0x1c6 LB: >> { %v4962_v12 = vld [vmem:[%s7315_s3 + $0x78] sm:$0xff]  ;;  %v4961_v48 = vld [vmem:[%s7315_s3 + $0x70] sm:$0xff]  ;;  %v4960_v13 = vld [vmem:[%s7315_s3 + $0x68] sm:$0xff]  ;;  %s956_s21 = smul.u32 176, %s5189_s25  ;;  %s5189_s25 = sphi %s5439_s25, %s955_s25  }
 0x1c7   : >> { %5019 = vmatpush.bf16.msra.mxu1 %v4962_v12  ;;  %5020 = vmatpush.bf16.msra.mxu2 %v4962_v12  ;;  %v4959_v14 = vld [vmem:[%s7315_s3 + $0x60] sm:$0xff]  ;;  %v4958_v15 = vld [vmem:[%s7315_s3 + $0x58] sm:$0xff]  ;;  %v4957_v16 = vld [vmem:[%s7315_s3 + $0x50] sm:$0xff] }
 0x1c8   : >> { %5021 = vmatpush.bf16.msra.mxu3 %v4962_v12  ;;  %1093 = vmatpush.bf16.msra.mxu0 %v4962_v12  ;;  %v4956_v17 = vld [vmem:[%s7315_s3 + $0x48] sm:$0xff]  ;;  %v4955_v18 = vld [vmem:[%s7315_s3 + $0x40] sm:$0xff]  ;;  %s5469_s24 = scalar_lea.vmem [#allocation2], %s956_s21  ;;  %v4970_v23 = vld [vmem:[%s7315_s3 + $0xb8] sm:$0xff] }
 0x1c9   : >> { %v4954_v24 = vld [vmem:[%s7315_s3 + $0x38] sm:$0xff]  ;;  %v4969_v33 = vld [vmem:[%s7315_s3 + $0xb0] sm:$0xff]  ;;  %v4968_v39 = vld [vmem:[%s7315_s3 + $0xa8] sm:$0xff] }
 0x1ca   : >> { %v4978_v31 = vld [vmem:[%s7315_s3 + $0xf8] sm:$0xff]  ;;  %v4953_v34 = vld [vmem:[%s7315_s3 + $0x30] sm:$0xff]  ;;  %v4952_v40 = vld [vmem:[%s7315_s3 + $0x28] sm:$0xff] }
 0x1cb   : >> { %5022 = vmatpush.bf16.msra.mxu1 %v4961_v48  ;;  %5023 = vmatpush.bf16.msra.mxu2 %v4961_v48  ;;  %v4986_v32 = vld [vmem:[%s7315_s3 + $0x138] sm:$0xff]  ;;  %v4977_v37 = vld [vmem:[%s7315_s3 + $0xf0] sm:$0xff]  ;;  %v4976_v41 = vld [vmem:[%s7315_s3 + $0xe8] sm:$0xff] }
 0x1cc   : >> { %5024 = vmatpush.bf16.msra.mxu3 %v4961_v48  ;;  %1094 = vmatpush.bf16.msra.mxu0 %v4961_v48  ;;  %v5472_v19 = vld [vmem:[%s5469_s24 + $0x21] sm:$0xff]  ;;  %v5475_v20 = vld [vmem:[%s5469_s24 + $0x29] sm:$0xff]  ;;  %v1011_v21 = vld [vmem:[%s5469_s24 + $0x51] sm:$0xff] }
 0x1cd   : >> { %v1012_v22 = vld [vmem:[%s5469_s24 + $0x59] sm:$0xff]  ;;  %v1001_v25 = vld [vmem:[%s5469_s24 + $0x1] sm:$0xff]  ;;  %v1021_v26 = vpack.c.bf16 %v5475_v20, %v5472_v19  ;;  %v1002_v28 = vld [vmem:[%s5469_s24 + $0x9] sm:$0xff] }
 0x1ce   : >> { %v1024_v27 = vpack.c.bf16 %v1012_v22, %v1011_v21  ;;  %v1017_v29 = vld [vmem:[%s5469_s24 + $0x81] sm:$0xff]  ;;  %v1018_v30 = vld [vmem:[%s5469_s24 + $0x89] sm:$0xff]  ;;  %v1019_v35 = vpack.c.bf16 %v1002_v28, %v1001_v25  ;;  %v5528_v45 = vld [vmem:[%s5469_s24 + $0x31] sm:$0xff] }
 0x1cf   : >> { %5025 = vmatpush.bf16.msra.mxu1 %v4960_v13  ;;  %5026 = vmatpush.bf16.msra.mxu2 %v4960_v13  ;;  %v1027_v36 = vpack.c.bf16 %v1018_v30, %v1017_v29  ;;  %v4985_v38 = vld [vmem:[%s7315_s3 + $0x130] sm:$0xff]  ;;  %v4984_v42 = vld [vmem:[%s7315_s3 + $0x128] sm:$0xff]  ;;  %v4967_v43 = vld [vmem:[%s7315_s3 + $0xa0] sm:$0xff] }
 0x1d0   : >> { %5027 = vmatpush.bf16.msra.mxu3 %v4960_v13  ;;  %1095 = vmatpush.bf16.msra.mxu0 %v4960_v13  ;;  %v4951_v44 = vld [vmem:[%s7315_s3 + $0x20] sm:$0xff]  ;;  %v1014_v49 = vld [vmem:[%s5469_s24 + $0x69] sm:$0xff]  ;;  %v4966_v52 = vld [vmem:[%s7315_s3 + $0x98] sm:$0xff] }
 0x1d1   : >> { %v5531_v46 = vld [vmem:[%s5469_s24 + $0x39] sm:$0xff]  ;;  %v1013_v47 = vld [vmem:[%s5469_s24 + $0x61] sm:$0xff]  ;;  %v1003_v56 = vld [vmem:[%s5469_s24 + $0x11] sm:$0xff] }
 0x1d2   : >> { %v4975_v50 = vld [vmem:[%s7315_s3 + $0xe0] sm:$0xff]  ;;  %v4950_v53 = vld [vmem:[%s7315_s3 + $0x18] sm:$0xff]  ;;  %v1022_v54 = vpack.c.bf16 %v5531_v46, %v5528_v45  ;;  %v1025_v55 = vpack.c.bf16 %v1014_v49, %v1013_v47  ;;  %v4965_v60 = vld [vmem:[%s7315_s3 + $0x90] sm:$0xff] }
 0x1d3   : >> { %5028 = vmatpush.bf16.msra.mxu1 %v4959_v14  ;;  %5029 = vmatpush.bf16.msra.mxu2 %v4959_v14  ;;  %v4983_v51 = vld [vmem:[%s7315_s3 + $0x120] sm:$0xff]  ;;  %v4974_v58 = vld [vmem:[%s7315_s3 + $0xd8] sm:$0xff]  ;;  %v4949_v61 = vld [vmem:[%s7315_s3 + $0x10] sm:$0xff] }
 0x1d4   : >> { %5030 = vmatpush.bf16.msra.mxu3 %v4959_v14  ;;  %1096 = vmatpush.bf16.msra.mxu0 %v4959_v14  ;;  %v5551_v57 = vld [vmem:[%s5469_s24 + $0x19] sm:$0xff]  ;;  %v4973_v63 = vld [vmem:[%s7315_s3 + $0xd0] sm:$0xff]  ;;  %v4964_v1 = vld [vmem:[%s7315_s3 + $0x88] sm:$0xff] }
 0x1d5   : >> { %v4982_v59 = vld [vmem:[%s7315_s3 + $0x118] sm:$0xff]  ;;  %v1020_v62 = vpack.c.bf16 %v5551_v57, %v1003_v56  ;;  %v4981_v0 = vld [vmem:[%s7315_s3 + $0x110] sm:$0xff]  ;;  %v4948_v2 = vld [vmem:[%s7315_s3 + $0x8] sm:$0xff] }
 0x1d6   : >> { %v4972_v3 = vld [vmem:[%s7315_s3 + $0xc8] sm:$0xff]  ;;  %v4963_v5 = vld [vmem:[%s7315_s3 + $0x80] sm:$0xff]  ;;  %v5002_v8 = vld [vmem:[%s7315_s3 + $0x1b8] sm:$0xff] }
 0x1d7   : >> { %5031 = vmatpush.bf16.msra.mxu1 %v4958_v15  ;;  %5032 = vmatpush.bf16.msra.mxu2 %v4958_v15  ;;  %v4980_v4 = vld [vmem:[%s7315_s3 + $0x108] sm:$0xff]  ;;  %v4947_v6 = vld [vmem:[%s7315_s3] sm:$0xff]  ;;  %v4994_v9 = vld [vmem:[%s7315_s3 + $0x178] sm:$0xff] }
 0x1d8   : >> { %5033 = vmatpush.bf16.msra.mxu3 %v4958_v15  ;;  %1097 = vmatpush.bf16.msra.mxu0 %v4958_v15  ;;  %v5591_v7 = vld [vmem:[%s5469_s24 + $0x41] sm:$0xff]  ;;  %v5600_v10 = vld [vmem:[%s5469_s24 + $0x49] sm:$0xff]  ;;  %v5603_v11 = vld [vmem:[%s5469_s24 + $0x71] sm:$0xff] }
 0x1d9   : >> { %v1016_v12 = vld [vmem:[%s5469_s24 + $0x79] sm:$0xff]  ;;  %v1413_v13 = vld [vmem:[%s5469_s24 + $0xc] sm:$0xff] }
 0x1da   : >> { %v4971_v48 = vld [vmem:[%s7315_s3 + $0xc0] sm:$0xff]  ;;  %v1414_v15 = vld [vmem:[%s5469_s24 + $0x14] sm:$0xff]  ;;  %v1026_v21 = vpack.c.bf16 %v1016_v12, %v5603_v11  ;;  %v5016_v47 = vld [vmem:[%s7315_s3 + $0x228] sm:$0xff] }
 0x1db   : >> { %5034 = vmatpush.bf16.msra.mxu1 %v4957_v16  ;;  %5035 = vmatpush.bf16.msra.mxu2 %v4957_v16  ;;  %v4979_v14 = vld [vmem:[%s7315_s3 + $0x100] sm:$0xff]  ;;  %v1577_v22 = vld [vmem:[%s5469_s24 + $0xd] sm:$0xff] }
 0x1dc   : >> { %5036 = vmatpush.bf16.msra.mxu3 %v4957_v16  ;;  %1098 = vmatpush.bf16.msra.mxu0 %v4957_v16  ;;  %v5010_v16 = vld [vmem:[%s7315_s3 + $0x1f8] sm:$0xff]  ;;  %v4993_v28 = vld [vmem:[%s7315_s3 + $0x170] sm:$0xff]  ;;  %v958_v30 = vld [vmem:[%s5469_s24] sm:$0xff] }
 0x1dd   : >> { %v5017_v29 = vld [vmem:[%s7315_s3 + $0x230] sm:$0xff]  ;;  %v1583_v12 = vld [vmem:[%s5469_s24 + $0x3d] sm:$0xff] }
 0x1de   : >> { %v960_v49 = vld [vmem:[%s5469_s24 + $0x10] sm:$0xff] }
 0x1df   : >> { %5037 = vmatpush.bf16.msra.mxu1 %v4956_v17  ;;  %5038 = vmatpush.bf16.msra.mxu2 %v4956_v17 }
 0x1e0   : >> { %5039 = vmatpush.bf16.msra.mxu3 %v4956_v17  ;;  %1099 = vmatpush.bf16.msra.mxu0 %v4956_v17  ;;  %v5018_v17 = vld [vmem:[%s7315_s3 + $0x238] sm:$0xff] }
 0x1e3   : >> { %5040 = vmatpush.bf16.msra.mxu1 %v4955_v18  ;;  %5041 = vmatpush.bf16.msra.mxu2 %v4955_v18 }
 0x1e4   : >> { %5042 = vmatpush.bf16.msra.mxu3 %v4955_v18  ;;  %1100 = vmatpush.bf16.msra.mxu0 %v4955_v18  ;;  %v1023_v18 = vpack.c.bf16 %v5600_v10, %v5591_v7 }
 0x1e6   : >> { %1111 = vmatmul.bf16.vlgmr.msra.gmra.mxu1 %v1021_v26  ;;  %1126 = vmatmul.bf16.vlgmr.msra.gmra.mxu2 %v1024_v27  ;;  %v5001_v26 = vld [vmem:[%s7315_s3 + $0x1b0] sm:$0xff] }
 0x1e7   : >> { %1341 = vmatpush.bf16.msrb.mxu2 %v4970_v23  ;;  %1195 = vmatpush.bf16.msrb.mxu1 %v4954_v24  ;;  %v1578_v23 = vld [vmem:[%s5469_s24 + $0x15] sm:$0xff]  ;;  %v1431_v24 = vpack.c.bf16 %v1414_v15, %v1413_v13  ;;  %v5015_v15 = vld [vmem:[%s7315_s3 + $0x220] sm:$0xff] }
 0x1e8   : >> { %1505 = vmatpush.bf16.msrb.mxu3 %v4978_v31  ;;  %1669 = vmatpush.bf16.msrb.mxu0 %v4986_v32  ;;  %v1595_v25 = vpack.c.bf16 %v1578_v23, %v1577_v22  ;;  %v5009_v27 = vld [vmem:[%s7315_s3 + $0x1f0] sm:$0xff]  ;;  %v959_v31 = vld [vmem:[%s5469_s24 + $0x8] sm:$0xff]  ;;  %v5716_v22 = vld [vmem:[%s5469_s24 + $0x38] sm:$0xff] }
 0x1e9   : >> { %1101 = vmatmul.bf16.vlgmr.msra.gmra.mxu0 %v1019_v35  ;;  %1141 = vmatmul.bf16.vlgmr.msra.gmra.mxu3 %v1027_v36  ;;  %v1249_v32 = vld [vmem:[%s5469_s24 + $0x2] sm:$0xff]  ;;  %v976_v36 = vpack.c.bf16 %v959_v31, %v958_v30  ;;  %v5719_v23 = vld [vmem:[%s5469_s24 + $0x32] sm:$0xff] }
 0x1ea   : >> { %v1416_v35 = vld [vmem:[%s5469_s24 + $0x24] sm:$0xff]  ;;  %v1586_v30 = vld [vmem:[%s5469_s24 + $0x55] sm:$0xff] }
 0x1eb   : >> { %1342 = vmatpush.bf16.msrb.mxu2 %v4969_v33  ;;  %1196 = vmatpush.bf16.msrb.mxu1 %v4953_v34  ;;  %v1250_v33 = vld [vmem:[%s5469_s24 + $0xa] sm:$0xff]  ;;  %v1415_v34 = vld [vmem:[%s5469_s24 + $0x1c] sm:$0xff] }
 0x1ec   : >> { %1506 = vmatpush.bf16.msrb.mxu3 %v4977_v37  ;;  %1670 = vmatpush.bf16.msrb.mxu0 %v4985_v38  ;;  %v1267_v37 = vpack.c.bf16 %v1250_v33, %v1249_v32  ;;  %v1579_v38 = vld [vmem:[%s5469_s24 + $0x1d] sm:$0xff] }
 0x1ed   : >> { %v5014_v33 = vld [vmem:[%s7315_s3 + $0x218] sm:$0xff] }
 0x1ef   : >> { %1343 = vmatpush.bf16.msrb.mxu2 %v4968_v39  ;;  %1197 = vmatpush.bf16.msrb.mxu1 %v4952_v40  ;;  %v1580_v39 = vld [vmem:[%s5469_s24 + $0x25] sm:$0xff]  ;;  %v1432_v40 = vpack.c.bf16 %v1416_v35, %v1415_v34  ;;  %v4997_v34 = vld [vmem:[%s7315_s3 + $0x190] sm:$0xff] }
 0x1f0   : >> { %1507 = vmatpush.bf16.msrb.mxu3 %v4976_v41  ;;  %1671 = vmatpush.bf16.msrb.mxu0 %v4984_v42  ;;  %v1596_v41 = vpack.c.bf16 %v1580_v39, %v1579_v38  ;;  %v5000_v42 = vld [vmem:[%s7315_s3 + $0x1a8] sm:$0xff]  ;;  %v5739_v35 = vld [vmem:[%s5469_s24 + $0x40] sm:$0xff] }
 0x1f1   : >> { %v5748_v38 = vld [vmem:[%s5469_s24 + $0x4a] sm:$0xff]  ;;  %v1423_v39 = vld [vmem:[%s5469_s24 + $0x5c] sm:$0xff] }
 0x1f3   : >> { %1344 = vmatpush.bf16.msrb.mxu2 %v4967_v43  ;;  %1198 = vmatpush.bf16.msrb.mxu1 %v4951_v44  ;;  %v5008_v43 = vld [vmem:[%s7315_s3 + $0x1e8] sm:$0xff] }
 0x1f4   : >> { %1508 = vmatpush.bf16.msrb.mxu3 %v4975_v50  ;;  %1672 = vmatpush.bf16.msrb.mxu0 %v4983_v51  ;;  %v4992_v44 = vld [vmem:[%s7315_s3 + $0x168] sm:$0xff]  ;;  %v5659_v50 = vld [vmem:[%s5469_s24 + $0x18] sm:$0xff] }
 0x1f5   : >> { %v1251_v51 = vld [vmem:[%s5469_s24 + $0x12] sm:$0xff] }
 0x1f6   : >> { %1116 = vmatmul.bf16.gmra.mxu1 %v1022_v54  ;;  %1131 = vmatmul.bf16.gmra.mxu2 %v1025_v55  ;;  %v1418_v54 = vld [vmem:[%s5469_s24 + $0x34] sm:$0xff]  ;;  %v977_v55 = vpack.c.bf16 %v5659_v50, %v960_v49 }
 0x1f7   : >> { %1345 = vmatpush.bf16.msrb.mxu2 %v4966_v52  ;;  %1199 = vmatpush.bf16.msrb.mxu1 %v4950_v53  ;;  %v5663_v52 = vld [vmem:[%s5469_s24 + $0x1a] sm:$0xff]  ;;  %v1417_v53 = vld [vmem:[%s5469_s24 + $0x2c] sm:$0xff] }
 0x1f8   : >> { %1509 = vmatpush.bf16.msrb.mxu3 %v4974_v58  ;;  %1673 = vmatpush.bf16.msrb.mxu0 %v4982_v59  ;;  %v1268_v56 = vpack.c.bf16 %v5663_v52, %v1251_v51  ;;  %v1581_v58 = vld [vmem:[%s5469_s24 + $0x2d] sm:$0xff]  ;;  %v1582_v59 = vld [vmem:[%s5469_s24 + $0x35] sm:$0xff] }
 0x1f9   : >> { %1106 = vmatmul.bf16.gmra.mxu0 %v1020_v62  ;;  %v4999_v62 = vld [vmem:[%s7315_s3 + $0x1a0] sm:$0xff]  ;;  %v4989_v51 = vld [vmem:[%s7315_s3 + $0x150] sm:$0xff] }
 0x1fb   : >> { %1346 = vmatpush.bf16.msrb.mxu2 %v4965_v60  ;;  %1200 = vmatpush.bf16.msrb.mxu1 %v4949_v61  ;;  %v1433_v60 = vpack.c.bf16 %v1418_v54, %v1417_v53  ;;  %v1597_v61 = vpack.c.bf16 %v1582_v59, %v1581_v58  ;;  %v5013_v54 = vld [vmem:[%s7315_s3 + $0x210] sm:$0xff]  ;;  %v5777_v59 = vld [vmem:[%s5469_s24 + $0x5a] sm:$0xff] }
 0x1fc   : >> { %1510 = vmatpush.bf16.msrb.mxu3 %v4973_v63  ;;  %1674 = vmatpush.bf16.msrb.mxu0 %v4981_v0  ;;  %v5007_v63 = vld [vmem:[%s7315_s3 + $0x1e0] sm:$0xff]  ;;  %v5774_v58 = vld [vmem:[%s5469_s24 + $0x52] sm:$0xff] }
 0x1fd   : >> { %v4991_v0 = vld [vmem:[%s7315_s3 + $0x160] sm:$0xff] }
 0x1ff   : >> { %1347 = vmatpush.bf16.msrb.mxu2 %v4964_v1  ;;  %1201 = vmatpush.bf16.msrb.mxu1 %v4948_v2  ;;  %v5681_v1 = vld [vmem:[%s5469_s24 + $0x20] sm:$0xff]  ;;  %v5684_v2 = vld [vmem:[%s5469_s24 + $0x28] sm:$0xff] }
 0x200   : >> { %1511 = vmatpush.bf16.msrb.mxu3 %v4972_v3  ;;  %1675 = vmatpush.bf16.msrb.mxu0 %v4980_v4  ;;  %v5687_v3 = vld [vmem:[%s5469_s24 + $0x22] sm:$0xff]  ;;  %v5690_v4 = vld [vmem:[%s5469_s24 + $0x2a] sm:$0xff] }
 0x203   : >> { %1348 = vmatpush.bf16.msrb.mxu2 %v4963_v5  ;;  %1202 = vmatpush.bf16.msrb.mxu1 %v4947_v6  ;;  %v1419_v5 = vld [vmem:[%s5469_s24 + $0x3c] sm:$0xff]  ;;  %v1420_v6 = vld [vmem:[%s5469_s24 + $0x44] sm:$0xff] }
 0x204   : >> { %1512 = vmatpush.bf16.msrb.mxu3 %v4971_v48  ;;  %1676 = vmatpush.bf16.msrb.mxu0 %v4979_v14  ;;  %v1584_v48 = vld [vmem:[%s5469_s24 + $0x45] sm:$0xff]  ;;  %v1434_v13 = vpack.c.bf16 %v1420_v6, %v1419_v5  ;;  %v1589_v5 = vld [vmem:[%s5469_s24 + $0x6d] sm:$0xff]  ;;  %v1590_v6 = vld [vmem:[%s5469_s24 + $0x75] sm:$0xff] }
 0x205   : >> { %v1598_v14 = vpack.c.bf16 %v1584_v48, %v1583_v12  ;;  %v5004_v12 = vld [vmem:[%s7315_s3 + $0x1c8] sm:$0xff]  ;;  %v1601_v48 = vpack.c.bf16 %v1590_v6, %v1589_v5  ;;  %v5863_v5 = vld [vmem:[%s5469_s24 + $0x7a] sm:$0xff] }
 0x206   : >> { %1121 = vmatmul.bf16.gmra.mxu1 %v1023_v18  ;;  %1136 = vmatmul.bf16.gmra.mxu2 %v1026_v21  ;;  %v4990_v18 = vld [vmem:[%s7315_s3 + $0x158] sm:$0xff]  ;;  %v5713_v21 = vld [vmem:[%s5469_s24 + $0x30] sm:$0xff] }
 0x207   : >> { %1997 = vmatpush.bf16.msra.mxu2 %v5002_v8  ;;  %1833 = vmatpush.bf16.msra.mxu1 %v4994_v9  ;;  %v978_v8 = vpack.c.bf16 %v5684_v2, %v5681_v1  ;;  %v1269_v9 = vpack.c.bf16 %v5690_v4, %v5687_v3 }
 0x208   : >> { %2161 = vmatpush.bf16.msra.mxu3 %v5010_v16  ;;  %2325 = vmatpush.bf16.msra.mxu0 %v5018_v17  ;;  %v4998_v16 = vld [vmem:[%s7315_s3 + $0x198] sm:$0xff] }
 0x209   : >> { %1513 = vmatmul.bf16.vlgmr.msrb.gmra.mxu3 %v1431_v24  ;;  %1677 = vmatmul.bf16.vlgmr.msrb.gmra.mxu0 %v1595_v25  ;;  %v5006_v17 = vld [vmem:[%s7315_s3 + $0x1d8] sm:$0xff]  ;;  %v1421_v25 = vld [vmem:[%s5469_s24 + $0x4c] sm:$0xff] }
 0x20a   : >> { %v5722_v24 = vld [vmem:[%s5469_s24 + $0x3a] sm:$0xff] }
 0x20b   : >> { %1998 = vmatpush.bf16.msra.mxu2 %v5001_v26  ;;  %1834 = vmatpush.bf16.msra.mxu1 %v4993_v28  ;;  %v1422_v26 = vld [vmem:[%s5469_s24 + $0x54] sm:$0xff]  ;;  %v1270_v28 = vpack.c.bf16 %v5722_v24, %v5719_v23 }
 0x20c   : >> { %2162 = vmatpush.bf16.msra.mxu3 %v5009_v27  ;;  %2326 = vmatpush.bf16.msra.mxu0 %v5017_v29  ;;  %v979_v27 = vpack.c.bf16 %v5716_v22, %v5713_v21  ;;  %v1585_v29 = vld [vmem:[%s5469_s24 + $0x4d] sm:$0xff]  ;;  %v1435_v31 = vpack.c.bf16 %v1422_v26, %v1421_v25 }
 0x20d   : >> { %v1599_v32 = vpack.c.bf16 %v1586_v30, %v1585_v29  ;;  %v5813_v26 = vld [vmem:[%s5469_s24 + $0x68] sm:$0xff]  ;;  %v1427_v29 = vld [vmem:[%s5469_s24 + $0x7c] sm:$0xff] }
 0x20e   : >> { %v1428_v30 = vld [vmem:[%s5469_s24 + $0x84] sm:$0xff] }
 0x20f   : >> { %1999 = vmatpush.bf16.msra.mxu2 %v5000_v42  ;;  %1835 = vmatpush.bf16.msra.mxu1 %v4992_v44  ;;  %v1587_v44 = vld [vmem:[%s5469_s24 + $0x5d] sm:$0xff] }
 0x210   : >> { %2163 = vmatpush.bf16.msra.mxu3 %v5008_v43  ;;  %2327 = vmatpush.bf16.msra.mxu0 %v5016_v47  ;;  %v1588_v47 = vld [vmem:[%s5469_s24 + $0x65] sm:$0xff] }
 0x211   : >> { %v1600_v53 = vpack.c.bf16 %v1588_v47, %v1587_v44 }
 0x213   : >> { %2000 = vmatpush.bf16.msra.mxu2 %v4999_v62  ;;  %1836 = vmatpush.bf16.msra.mxu1 %v4991_v0  ;;  %v4996_v62 = vld [vmem:[%s7315_s3 + $0x188] sm:$0xff]  ;;  %v1272_v0 = vpack.c.bf16 %v5777_v59, %v5774_v58 }
 0x214   : >> { %2164 = vmatpush.bf16.msra.mxu3 %v5007_v63  ;;  %2328 = vmatpush.bf16.msra.mxu0 %v5015_v15 }
 0x216   : >> { %1203 = vmatmul.bf16.vlgmr.msrb.gmra.mxu1 %v976_v36  ;;  %1349 = vmatmul.bf16.vlgmr.msrb.gmra.mxu2 %v1267_v37  ;;  %v5742_v36 = vld [vmem:[%s5469_s24 + $0x48] sm:$0xff] }
 0x217   : >> { %2001 = vmatpush.bf16.msra.mxu2 %v4998_v16  ;;  %1837 = vmatpush.bf16.msra.mxu1 %v4990_v18  ;;  %v5745_v37 = vld [vmem:[%s5469_s24 + $0x42] sm:$0xff]  ;;  %v980_v42 = vpack.c.bf16 %v5742_v36, %v5739_v35 }
 0x218   : >> { %2165 = vmatpush.bf16.msra.mxu3 %v5006_v17  ;;  %2329 = vmatpush.bf16.msra.mxu0 %v5014_v33  ;;  %v1271_v43 = vpack.c.bf16 %v5748_v38, %v5745_v37  ;;  %v5012_v17 = vld [vmem:[%s7315_s3 + $0x208] sm:$0xff]  ;;  %v5808_v18 = vld [vmem:[%s5469_s24 + $0x60] sm:$0xff] }
 0x219   : >> { %1518 = vmatmul.bf16.gmra.mxu3 %v1432_v40  ;;  %1682 = vmatmul.bf16.gmra.mxu0 %v1596_v41  ;;  %v1424_v40 = vld [vmem:[%s5469_s24 + $0x64] sm:$0xff]  ;;  %v5005_v41 = vld [vmem:[%s7315_s3 + $0x1d0] sm:$0xff] }
 0x21a   : >> { %v1436_v49 = vpack.c.bf16 %v1424_v40, %v1423_v39  ;;  %v1592_v39 = vld [vmem:[%s5469_s24 + $0x85] sm:$0xff] }
 0x21b   : >> { %2002 = vmatpush.bf16.msra.mxu2 %v4997_v34  ;;  %1838 = vmatpush.bf16.msra.mxu1 %v4989_v51  ;;  %v1591_v34 = vld [vmem:[%s5469_s24 + $0x7d] sm:$0xff] }
 0x21c   : >> { %2166 = vmatpush.bf16.msra.mxu3 %v5005_v41  ;;  %2330 = vmatpush.bf16.msra.mxu0 %v5013_v54  ;;  %v1438_v41 = vpack.c.bf16 %v1428_v30, %v1427_v29  ;;  %v4987_v51 = vld [vmem:[%s7315_s3 + $0x140] sm:$0xff]  ;;  %v1593_v29 = vld [vmem:[%s5469_s24 + $0x8d] sm:$0xff]  ;;  %v1594_v30 = vld [vmem:[%s5469_s24 + $0x95] sm:$0xff] }
 0x21f   : >> { %2003 = vmatpush.bf16.msra.mxu2 %v4996_v62 }
 0x220   : >> { %2167 = vmatpush.bf16.msra.mxu3 %v5004_v12  ;;  %2331 = vmatpush.bf16.msra.mxu0 %v5012_v17  ;;  %v1430_v12 = vld [vmem:[%s5469_s24 + $0x94] sm:$0xff] }
 0x226   : >> { %1208 = vmatmul.bf16.gmra.mxu1 %v977_v55  ;;  %1354 = vmatmul.bf16.gmra.mxu2 %v1268_v56  ;;  %v5768_v55 = vld [vmem:[%s5469_s24 + $0x50] sm:$0xff]  ;;  %v5771_v56 = vld [vmem:[%s5469_s24 + $0x58] sm:$0xff] }
 0x227   : >> { %v981_v63 = vpack.c.bf16 %v5771_v56, %v5768_v55 }
 0x229   : >> { %1523 = vmatmul.bf16.gmra.mxu3 %v1433_v60  ;;  %1687 = vmatmul.bf16.gmra.mxu0 %v1597_v61  ;;  %v1425_v60 = vld [vmem:[%s5469_s24 + $0x6c] sm:$0xff]  ;;  %v1426_v61 = vld [vmem:[%s5469_s24 + $0x74] sm:$0xff] }
 0x236   : >> { %1213 = vmatmul.bf16.gmra.mxu1 %v978_v8  ;;  %1359 = vmatmul.bf16.gmra.mxu2 %v1269_v9  ;;  %v1437_v9 = vpack.c.bf16 %v1426_v61, %v1425_v60  ;;  %v5011_v60 = vld [vmem:[%s7315_s3 + $0x200] sm:$0xff]  ;;  %v5852_v61 = vld [vmem:[%s5469_s24 + $0x70] sm:$0xff] }
 0x237   : >> { %2332 = vmatpush.bf16.msra.mxu0 %v5011_v60  ;;  %v5888_v60 = vld [vmem:[%s5469_s24 + $0x82] sm:$0xff] }
 0x238   : >> { %7336 = vst [vmem:[#allocation14_spill] sm:$0xff] %v5888_v60 }
 0x239   : >> { %1528 = vmatmul.bf16.gmra.mxu3 %v1434_v13  ;;  %1692 = vmatmul.bf16.gmra.mxu0 %v1598_v14  ;;  %v4988_v14 = vld [vmem:[%s7315_s3 + $0x148] sm:$0xff] }
 0x23a   : >> { %1839 = vmatpush.bf16.msra.mxu1 %v4988_v14 }
 0x23e   : >> { %1840 = vmatpush.bf16.msra.mxu1 %v4987_v51  ;;  %v5885_v51 = vld [vmem:[%s5469_s24 + $0x88] sm:$0xff] }
 0x23f   : >> { %7335 = vst [vmem:[#allocation13_spill] sm:$0xff] %v5885_v51 }
 0x246   : >> { %1218 = vmatmul.bf16.gmra.mxu1 %v979_v27  ;;  %1364 = vmatmul.bf16.gmra.mxu2 %v1270_v28  ;;  %v5816_v27 = vld [vmem:[%s5469_s24 + $0x62] sm:$0xff]  ;;  %v5819_v28 = vld [vmem:[%s5469_s24 + $0x6a] sm:$0xff] }
 0x247   : >> { %v1273_v33 = vpack.c.bf16 %v5819_v28, %v5816_v27 }
 0x249   : >> { %1533 = vmatmul.bf16.gmra.mxu3 %v1435_v31  ;;  %1697 = vmatmul.bf16.gmra.mxu0 %v1599_v32  ;;  %v982_v32 = vpack.c.bf16 %v5813_v26, %v5808_v18 }
 0x256   : >> { %1223 = vmatmul.bf16.gmra.mxu1 %v980_v42  ;;  %1369 = vmatmul.bf16.gmra.mxu2 %v1271_v43  ;;  %v4995_v42 = vld [vmem:[%s7315_s3 + $0x180] sm:$0xff]  ;;  %v1602_v43 = vpack.c.bf16 %v1592_v39, %v1591_v34  ;;  %v1603_v34 = vpack.c.bf16 %v1594_v30, %v1593_v29  ;;  %v2087_v30 = vpack.c.bf16 %v5472_v19, %v5551_v57 }
 0x257   : >> { %2004 = vmatpush.bf16.msra.mxu2 %v4995_v42 }
 0x259   : >> { %1538 = vmatmul.bf16.gmra.mxu3 %v1436_v49  ;;  %1702 = vmatmul.bf16.gmra.mxu0 %v1600_v53  ;;  %v5003_v49 = vld [vmem:[%s7315_s3 + $0x1c0] sm:$0xff] }
 0x25a   : >> { %2168 = vmatpush.bf16.msra.mxu3 %v5003_v49 }
 0x263   : >> { %v5790_v8 = vpop.f32.mrf.mxu1 }
 0x266   : >> { %1228 = vmatmul.bf16.gmra.mxu1 %v981_v63  ;;  %1374 = vmatmul.bf16.gmra.mxu2 %v1272_v0  ;;  %v5795_v13 = vpop.f32.mrf.mxu0  ;;  %v5857_v63 = vld [vmem:[%s5469_s24 + $0x78] sm:$0xff] }
 0x267   : >> { %7331 = vst [vmem:[#allocation9_spill] sm:$0xff] %v5857_v63  ;;  %v5860_v0 = vld [vmem:[%s5469_s24 + $0x72] sm:$0xff]  ;;  %v983_v14 = vpack.c.bf16 %v5857_v63, %v5852_v61 }
 0x268   : >> { %v1274_v17 = vpack.c.bf16 %v5863_v5, %v5860_v0 }
 0x269   : >> { %1543 = vmatmul.bf16.gmra.mxu3 %v1437_v9  ;;  %v5800_v15 = vpop.f32.mrf.mxu2  ;;  %1707 = vmatmul.bf16.gmra.mxu0 %v1601_v48  ;;  %v1429_v9 = vld [vmem:[%s5469_s24 + $0x8c] sm:$0xff] }
 0x26b   : >> { %v5802_v16 = vpop.f32.mrf.mxu1 }
 0x26c   : >> { %v1142_v44 = vpop.f32.mrf.mxu3 }
 0x26d   : >> { %v5882_v44 = vld [vmem:[%s5469_s24 + $0x80] sm:$0xff] }
 0x26e   : >> { %v5810_v25 = vpop.f32.mrf.mxu0  ;;  %7334 = vst [vmem:[#allocation12_spill] sm:$0xff] %v5882_v44 }
 0x271   : >> { %v5823_v31 = vpop.f32.mrf.mxu2 }
 0x273   : >> { %v5831_v40 = vpop.f32.mrf.mxu1 }
 0x274   : >> { %v1144_v6 = vpop.f32.mrf.mxu3 }
 0x275   : >> { %v5891_v6 = vld [vmem:[%s5469_s24 + $0x8a] sm:$0xff] }
 0x276   : >> { %1233 = vmatmul.bf16.gmra.mxu1 %v982_v32  ;;  %1379 = vmatmul.bf16.gmra.mxu2 %v1273_v33  ;;  %v5836_v47 = vpop.f32.mrf.mxu0  ;;  %v1439_v33 = vpack.c.bf16 %v1430_v12, %v1429_v9  ;;  %7337 = vst [vmem:[#allocation15_spill] sm:$0xff] %v5891_v6  ;;  %v984_v12 = vpack.c.bf16 %v5885_v51, %v5882_v44 }
 0x279   : >> { %1548 = vmatmul.bf16.gmra.mxu3 %v1438_v41  ;;  %v5844_v53 = vpop.f32.mrf.mxu2  ;;  %1712 = vmatmul.bf16.gmra.mxu0 %v1602_v43 }
 0x27a   : >> { %7330 = vst [vmem:[#allocation8_spill] sm:$0xff] %v5844_v53 }
 0x27b   : >> { %v5846_v54 = vpop.f32.mrf.mxu1 }
 0x27e   : >> { %v5854_v62 = vpop.f32.mrf.mxu0 }
 0x281   : >> { %v5867_v48 = vpop.f32.mrf.mxu2 }
 0x282   : >> { %7332 = vst [vmem:[#allocation10_spill] sm:$0xff] %v5867_v48 }
 0x283   : >> { %v5875_v32 = vpop.f32.mrf.mxu1 }
 0x286   : >> { %1238 = vmatmul.bf16.gmra.mxu1 %v983_v14  ;;  %1384 = vmatmul.bf16.gmra.mxu2 %v1274_v17  ;;  %v1678_v39 = vpop.f32.mrf.mxu0  ;;  %v1275_v14 = vpack.c.bf16 %v5891_v6, %v5888_v60 }
 0x289   : >> { %1553 = vmatmul.bf16.gmra.mxu3 %v1439_v33  ;;  %v5877_v41 = vpop.f32.mrf.mxu2  ;;  %1717 = vmatmul.bf16.gmra.mxu0 %v1603_v34  ;;  %v2251_v34 = vpack.c.bf16 %v5687_v3, %v5663_v52  ;;  %v1923_v3 = vpack.c.bf16 %v5681_v1, %v5659_v50 }
 0x28a   : >> { %7333 = vst [vmem:[#allocation11_spill] sm:$0xff] %v5877_v41 }
 0x28b   : >> { %v5879_v43 = vpop.f32.mrf.mxu1 }
 0x28c   : >> { %v1514_v42 = vpop.f32.mrf.mxu3 }
 0x28e   : >> { %v1680_v49 = vpop.f32.mrf.mxu0 }
 0x291   : >> { %v1139_v9 = vpop.f32.mrf.mxu2 }
 0x293   : >> { %v1204_v29 = vpop.f32.mrf.mxu1 }
 0x294   : >> { %v1516_v17 = vpop.f32.mrf.mxu3  ;;  %v1205_v33 = vadd.f32 %v1204_v29, %v5795_v13  ;;  %v1741_v13 = vld [vmem:[%s5469_s24 + $0xe] sm:$0xff]  ;;  %v1742_v29 = vld [vmem:[%s5469_s24 + $0x16] sm:$0xff] }
 0x295   : >> { %v1759_v52 = vpack.c.bf16 %v1742_v29, %v1741_v13  ;;  %v2089_v13 = vpack.c.bf16 %v5591_v7, %v5531_v46 }
 0x296   : >> { %1243 = vmatmul.bf16.gmra.mxu1 %v984_v12  ;;  %1389 = vmatmul.bf16.gmra.mxu2 %v1275_v14  ;;  %v1683_v9 = vpop.f32.mrf.mxu0 }
 0x299   : >> { %2169 = vmatmul.bf16.vlgmr.msra.gmra.mxu3 %v2087_v30  ;;  %v1350_v51 = vpop.f32.mrf.mxu2  ;;  %2333 = vmatmul.bf16.vlgmr.msra.gmra.mxu0 %v2251_v34 }
 0x29a   : >> { %v1395_v41 = vadd.f32 %v1350_v51, %v1205_v33  ;;  %v2088_v51 = vpack.c.bf16 %v5528_v45, %v5475_v20 }
 0x29b   : >> { %v1206_v44 = vpop.f32.mrf.mxu1 }
 0x29c   : >> { %v1519_v6 = vpop.f32.mrf.mxu3  ;;  %v1559_v63 = vadd.f32 %v1514_v42, %v1395_v41  ;;  %v1207_v48 = vadd.f32 %v1206_v44, %v5810_v25  ;;  %v2252_v25 = vpack.c.bf16 %v5719_v23, %v5690_v4  ;;  %v1743_v44 = vld [vmem:[%s5469_s24 + $0x1e] sm:$0xff]  ;;  %v1744_v4 = vld [vmem:[%s5469_s24 + $0x26] sm:$0xff] }
 0x29e   : >> { %v1685_v19 = vpop.f32.mrf.mxu0  ;;  %v5903_v57 = vadd.f32 %v1678_v39, %v1559_v63 }
 0x2a1   : >> { %v1352_v53 = vpop.f32.mrf.mxu2 }
 0x2a2   : >> { %v1396_v60 = vadd.f32 %v1352_v53, %v1207_v48 }
 0x2a3   : >> { %v1209_v14 = vpop.f32.mrf.mxu1 }
 0x2a4   : >> { %v1521_v12 = vpop.f32.mrf.mxu3  ;;  %v1560_v30 = vadd.f32 %v1516_v17, %v1396_v60  ;;  %v1210_v41 = vadd.f32 %v1209_v14, %v5836_v47  ;;  %v1760_v17 = vpack.c.bf16 %v1744_v4, %v1743_v44 }
 0x2a6   : >> { %1841 = vmatmul.bf16.vlgmr.msra.gmra.mxu1 %v1759_v52  ;;  %2005 = vmatmul.bf16.vlgmr.msra.gmra.mxu2 %v1923_v3  ;;  %v1688_v53 = vpop.f32.mrf.mxu0  ;;  %v5914_v63 = vadd.f32 %v1680_v49, %v1560_v30  ;;  %v1924_v49 = vpack.c.bf16 %v5713_v21, %v5684_v2  ;;  %v2076_v30 = vld [vmem:[%s5469_s24 + $0x51] sm:$0xff] }
 0x2a9   : >> { %2174 = vmatmul.bf16.gmra.mxu3 %v2088_v51  ;;  %v1355_v50 = vpop.f32.mrf.mxu2  ;;  %2338 = vmatmul.bf16.gmra.mxu0 %v2252_v25 }
 0x2aa   : >> { %v1397_v1 = vadd.f32 %v1355_v50, %v1210_v41 }
 0x2ab   : >> { %v1211_v39 = vpop.f32.mrf.mxu1 }
 0x2ac   : >> { %v1524_v48 = vpop.f32.mrf.mxu3  ;;  %v1561_v20 = vadd.f32 %v1519_v6, %v1397_v1  ;;  %v1212_v45 = vadd.f32 %v1211_v39, %v5854_v62  ;;  %v2253_v62 = vpack.c.bf16 %v5745_v37, %v5722_v24  ;;  %v1745_v24 = vld [vmem:[%s5469_s24 + $0x2e] sm:$0xff]  ;;  %v1746_v37 = vld [vmem:[%s5469_s24 + $0x36] sm:$0xff]  ;;  %v2090_v39 = vpack.c.bf16 %v2076_v30, %v5600_v10 }
 0x2ad   : >> { %v1761_v25 = vpack.c.bf16 %v1746_v37, %v1745_v24 }
 0x2ae   : >> { %v1690_v47 = vpop.f32.mrf.mxu0  ;;  %v5917_v42 = vadd.f32 %v1683_v9, %v1561_v20 }
 0x2b1   : >> { %v1357_v23 = vpop.f32.mrf.mxu2 }
 0x2b2   : >> { %v1398_v60 = vadd.f32 %v1357_v23, %v1212_v45 }
 0x2b3   : >> { %v1214_v34 = vpop.f32.mrf.mxu1 }
 0x2b4   : >> { %v1526_v33 = vpop.f32.mrf.mxu3  ;;  %v1562_v29 = vadd.f32 %v1521_v12, %v1398_v60  ;;  %v1215_v2 = vadd.f32 %v1214_v34, %v5790_v8  ;;  %v1925_v8 = vpack.c.bf16 %v5739_v35, %v5716_v22 }
 0x2b6   : >> { %1846 = vmatmul.bf16.gmra.mxu1 %v1760_v17  ;;  %2010 = vmatmul.bf16.gmra.mxu2 %v1924_v49  ;;  %v1693_v6 = vpop.f32.mrf.mxu0  ;;  %v5927_v9 = vadd.f32 %v1685_v19, %v1562_v29  ;;  %v2077_v49 = vld [vmem:[%s5469_s24 + $0x59] sm:$0xff] }
 0x2b9   : >> { %2179 = vmatmul.bf16.gmra.mxu3 %v2089_v13  ;;  %v1360_v21 = vpop.f32.mrf.mxu2  ;;  %2343 = vmatmul.bf16.gmra.mxu0 %v2253_v62 }
 0x2ba   : >> { %v1399_v52 = vadd.f32 %v1360_v21, %v1215_v2 }
 0x2bb   : >> { %v1216_v46 = vpop.f32.mrf.mxu1 }
 0x2bc   : >> { %v1529_v3 = vpop.f32.mrf.mxu3  ;;  %v1563_v7 = vadd.f32 %v1524_v48, %v1399_v52  ;;  %v1217_v51 = vadd.f32 %v1216_v46, %v5802_v16 }
 0x2be   : >> { %v1695_v12 = vpop.f32.mrf.mxu0  ;;  %v5930_v14 = vadd.f32 %v1688_v53, %v1563_v7  ;;  %v2254_v53 = vpack.c.bf16 %v5774_v58, %v5748_v38  ;;  %v1747_v38 = vld [vmem:[%s5469_s24 + $0x3e] sm:$0xff]  ;;  %v1748_v58 = vld [vmem:[%s5469_s24 + $0x46] sm:$0xff] }
 0x2bf   : >> { %v1762_v13 = vpack.c.bf16 %v1748_v58, %v1747_v38  ;;  %v2082_v38 = vld [vmem:[%s5469_s24 + $0x81] sm:$0xff] }
 0x2c1   : >> { %v1362_v41 = vpop.f32.mrf.mxu2 }
 0x2c2   : >> { %v1400_v19 = vadd.f32 %v1362_v41, %v1217_v51  ;;  %v2079_v41 = vld [vmem:[%s5469_s24 + $0x69] sm:$0xff] }
 0x2c3   : >> { %v1219_v1 = vpop.f32.mrf.mxu1 }
 0x2c4   : >> { %v1531_v50 = vpop.f32.mrf.mxu3  ;;  %v1564_v20 = vadd.f32 %v1526_v33, %v1400_v19  ;;  %v1220_v22 = vadd.f32 %v1219_v1, %v5831_v40  ;;  %v2078_v33 = vld [vmem:[%s5469_s24 + $0x61] sm:$0xff]  ;;  %v1926_v40 = vpack.c.bf16 %v5768_v55, %v5742_v36  ;;  %v2092_v1 = vpack.c.bf16 %v5603_v11, %v2079_v41 }
 0x2c5   : >> { %v2091_v2 = vpack.c.bf16 %v2078_v33, %v2077_v49  ;;  %v7341_v41 = vld [vmem:[#allocation9_spill] sm:$0xff] }
 0x2c6   : >> { %1851 = vmatmul.bf16.gmra.mxu1 %v1761_v25  ;;  %2015 = vmatmul.bf16.gmra.mxu2 %v1925_v8  ;;  %v1698_v16 = vpop.f32.mrf.mxu0  ;;  %v5941_v48 = vadd.f32 %v1690_v47, %v1564_v20  ;;  %v2256_v20 = vpack.c.bf16 %v5860_v0, %v5819_v28  ;;  %v1751_v28 = vld [vmem:[%s5469_s24 + $0x5e] sm:$0xff]  ;;  %v1752_v0 = vld [vmem:[%s5469_s24 + $0x66] sm:$0xff] }
 0x2c9   : >> { %2184 = vmatmul.bf16.gmra.mxu3 %v2090_v39  ;;  %v1365_v35 = vpop.f32.mrf.mxu2  ;;  %2348 = vmatmul.bf16.gmra.mxu0 %v2254_v53 }
 0x2ca   : >> { %v1401_v45 = vadd.f32 %v1365_v35, %v1220_v22 }
 0x2cb   : >> { %v1221_v44 = vpop.f32.mrf.mxu1 }
 0x2cc   : >> { %v1534_v10 = vpop.f32.mrf.mxu3  ;;  %v1565_v4 = vadd.f32 %v1529_v3, %v1401_v45  ;;  %v1222_v17 = vadd.f32 %v1221_v44, %v5846_v54 }
 0x2ce   : >> { %v1700_v23 = vpop.f32.mrf.mxu0  ;;  %v5944_v60 = vadd.f32 %v1693_v6, %v1565_v4  ;;  %v2255_v6 = vpack.c.bf16 %v5816_v27, %v5777_v59  ;;  %v1749_v59 = vld [vmem:[%s5469_s24 + $0x4e] sm:$0xff]  ;;  %v1750_v27 = vld [vmem:[%s5469_s24 + $0x56] sm:$0xff] }
 0x2cf   : >> { %v1763_v25 = vpack.c.bf16 %v1750_v27, %v1749_v59  ;;  %v2081_v4 = vld [vmem:[%s5469_s24 + $0x79] sm:$0xff] }
 0x2d1   : >> { %v1367_v47 = vpop.f32.mrf.mxu2 }
 0x2d2   : >> { %v1402_v34 = vadd.f32 %v1367_v47, %v1222_v17  ;;  %v1764_v17 = vpack.c.bf16 %v1752_v0, %v1751_v28  ;;  %v2093_v47 = vpack.c.bf16 %v2082_v38, %v2081_v4  ;;  %v1755_v38 = vld [vmem:[%s5469_s24 + $0x7e] sm:$0xff] }
 0x2d3   : >> { %v1224_v62 = vpop.f32.mrf.mxu1 }
 0x2d4   : >> { %v1536_v29 = vpop.f32.mrf.mxu3  ;;  %v1566_v21 = vadd.f32 %v1531_v50, %v1402_v34  ;;  %v1225_v3 = vadd.f32 %v1224_v62, %v5875_v32  ;;  %v1927_v32 = vpack.c.bf16 %v5808_v18, %v5771_v56  ;;  %v7339_v62 = vld [vmem:[#allocation8_spill] sm:$0xff] }
 0x2d6   : >> { %1856 = vmatmul.bf16.gmra.mxu1 %v1762_v13  ;;  %2020 = vmatmul.bf16.gmra.mxu2 %v1926_v40  ;;  %v1703_v54 = vpop.f32.mrf.mxu0  ;;  %v5955_v52 = vadd.f32 %v1695_v12, %v1566_v21  ;;  %v7338_v13 = vld [vmem:[#allocation14_spill] sm:$0xff] }
 0x2d7   : >> { %v2257_v40 = vpack.c.bf16 %v7338_v13, %v5863_v5  ;;  %v2249_v13 = vld [vmem:[%s5469_s24 + $0x9a] sm:$0xff] }
 0x2d9   : >> { %2189 = vmatmul.bf16.gmra.mxu3 %v2091_v2  ;;  %v1370_v46 = vpop.f32.mrf.mxu2  ;;  %2353 = vmatmul.bf16.gmra.mxu0 %v2255_v6 }
 0x2da   : >> { %v1403_v36 = vadd.f32 %v1370_v46, %v1225_v3  ;;  %v1753_v46 = vld [vmem:[%s5469_s24 + $0x6e] sm:$0xff] }
 0x2db   : >> { %v1226_v7 = vpop.f32.mrf.mxu1 }
 0x2dc   : >> { %v1539_v55 = vpop.f32.mrf.mxu3  ;;  %v1567_v24 = vadd.f32 %v1534_v10, %v1403_v36  ;;  %v1227_v30 = vadd.f32 %v1226_v7, %v5879_v43  ;;  %v1754_v36 = vld [vmem:[%s5469_s24 + $0x76] sm:$0xff] }
 0x2de   : >> { %v1705_v37 = vpop.f32.mrf.mxu0  ;;  %v5958_v51 = vadd.f32 %v1698_v16, %v1567_v24  ;;  %v2083_v24 = vld [vmem:[%s5469_s24 + $0x89] sm:$0xff] }
 0x2e1   : >> { %v1372_v19 = vpop.f32.mrf.mxu2 }
 0x2e2   : >> { %v1404_v12 = vadd.f32 %v1372_v19, %v1227_v30  ;;  %v1765_v30 = vpack.c.bf16 %v1754_v36, %v1753_v46  ;;  %v7342_v19 = vld [vmem:[#allocation12_spill] sm:$0xff]  ;;  %v1758_v46 = vld [vmem:[%s5469_s24 + $0x96] sm:$0xff] }
 0x2e3   : >> { %v1229_v50 = vpop.f32.mrf.mxu1  ;;  %v1921_v36 = vld [vmem:[%s5469_s24 + $0x98] sm:$0xff] }
 0x2e4   : >> { %v1541_v8 = vpop.f32.mrf.mxu3  ;;  %v1568_v39 = vadd.f32 %v1536_v29, %v1404_v12  ;;  %v1230_v56 = vadd.f32 %v1229_v50, %v5800_v15  ;;  %v1928_v15 = vpack.c.bf16 %v5852_v61, %v5813_v26  ;;  %v1929_v12 = vpack.c.bf16 %v7342_v19, %v7341_v41 }
 0x2e6   : >> { %1861 = vmatmul.bf16.gmra.mxu1 %v1763_v25  ;;  %2025 = vmatmul.bf16.gmra.mxu2 %v1927_v32  ;;  %v1708_v43 = vpop.f32.mrf.mxu0  ;;  %v5969_v53 = vadd.f32 %v1700_v23, %v1568_v39  ;;  %v2248_v32 = vld [vmem:[%s5469_s24 + $0x92] sm:$0xff] }
 0x2e7   : >> { %v7343_v39 = vld [vmem:[#allocation15_spill] sm:$0xff] }
 0x2e9   : >> { %2194 = vmatmul.bf16.gmra.mxu3 %v2092_v1  ;;  %v1375_v18 = vpop.f32.mrf.mxu2  ;;  %2358 = vmatmul.bf16.gmra.mxu0 %v2256_v20  ;;  %v2258_v20 = vpack.c.bf16 %v2248_v32, %v7343_v39 }
 0x2ea   : >> { %v1405_v16 = vadd.f32 %v1375_v18, %v1230_v56  ;;  %v7344_v18 = vld [vmem:[#allocation11_spill] sm:$0xff] }
 0x2eb   : >> { %v1231_v22 = vpop.f32.mrf.mxu1 }
 0x2ec   : >> { %v1544_v11 = vpop.f32.mrf.mxu3  ;;  %v1569_v35 = vadd.f32 %v1539_v55, %v1405_v16  ;;  %v1232_v44 = vadd.f32 %v1231_v22, %v5823_v31  ;;  %v7340_v55 = vld [vmem:[#allocation10_spill] sm:$0xff] }
 0x2ee   : >> { %v1710_v45 = vpop.f32.mrf.mxu0  ;;  %v5972_v10 = vadd.f32 %v1703_v54, %v1569_v35 }
 0x2f1   : >> { %v1377_v23 = vpop.f32.mrf.mxu2 }
 0x2f2   : >> { %v1406_v58 = vadd.f32 %v1377_v23, %v1232_v44  ;;  %v1756_v23 = vld [vmem:[%s5469_s24 + $0x86] sm:$0xff] }
 0x2f3   : >> { %v1234_v33 = vpop.f32.mrf.mxu1 }
 0x2f4   : >> { %v1546_v49 = vpop.f32.mrf.mxu3  ;;  %v1570_v34 = vadd.f32 %v1541_v8, %v1406_v58  ;;  %v1235_v2 = vadd.f32 %v1234_v33, %v7339_v62  ;;  %v1920_v58 = vld [vmem:[%s5469_s24 + $0x90] sm:$0xff]  ;;  %v7345_v33 = vld [vmem:[#allocation13_spill] sm:$0xff] }
 0x2f6   : >> { %1866 = vmatmul.bf16.gmra.mxu1 %v1764_v17  ;;  %2030 = vmatmul.bf16.gmra.mxu2 %v1928_v15  ;;  %v1713_v31 = vpop.f32.mrf.mxu0  ;;  %v5983_v29 = vadd.f32 %v1705_v37, %v1570_v34  ;;  %v2084_v37 = vld [vmem:[%s5469_s24 + $0x91] sm:$0xff]  ;;  %v2085_v17 = vld [vmem:[%s5469_s24 + $0x99] sm:$0xff] }
 0x2f7   : >> { %v2094_v50 = vpack.c.bf16 %v2084_v37, %v2083_v24 }
 0x2f9   : >> { %2199 = vmatmul.bf16.gmra.mxu3 %v2093_v47  ;;  %v1380_v26 = vpop.f32.mrf.mxu2  ;;  %2363 = vmatmul.bf16.gmra.mxu0 %v2257_v40  ;;  %v1930_v47 = vpack.c.bf16 %v1920_v58, %v7345_v33  ;;  %v2250_v40 = vld [vmem:[%s5469_s24 + $0xa2] sm:$0xff] }
 0x2fa   : >> { %v1407_v61 = vadd.f32 %v1380_v26, %v1235_v2 }
 0x2fb   : >> { %v1236_v6 = vpop.f32.mrf.mxu1 }
 0x2fc   : >> { %v1549_v21 = vpop.f32.mrf.mxu3  ;;  %v1571_v54 = vadd.f32 %v1544_v11, %v1407_v61  ;;  %v1237_v7 = vadd.f32 %v1236_v6, %v7340_v55  ;;  %v1922_v55 = vld [vmem:[%s5469_s24 + $0xa0] sm:$0xff] }
 0x2fd   : >> { %v1931_v37 = vpack.c.bf16 %v1922_v55, %v1921_v36 }
 0x2fe   : >> { %v1715_v3 = vpop.f32.mrf.mxu0  ;;  %v5986_v5 = vadd.f32 %v1708_v43, %v1571_v54  ;;  %v1757_v54 = vld [vmem:[%s5469_s24 + $0x8e] sm:$0xff] }
 0x2ff   : >> { %v1767_v24 = vpack.c.bf16 %v1758_v46, %v1757_v54 }
 0x301   : >> { %v1382_v59 = vpop.f32.mrf.mxu2 }
 0x302   : >> { %v1408_v27 = vadd.f32 %v1382_v59, %v1237_v7 }
 0x303   : >> { %v1239_v8 = vpop.f32.mrf.mxu1 }
 0x304   : >> { %v1551_v25 = vpop.f32.mrf.mxu3  ;;  %v1572_v1 = vadd.f32 %v1546_v49, %v1408_v27  ;;  %v1240_v16 = vadd.f32 %v1239_v8, %v7344_v18  ;;  %v1766_v49 = vpack.c.bf16 %v1756_v23, %v1755_v38 }
 0x306   : >> { %1871 = vmatmul.bf16.gmra.mxu1 %v1765_v30  ;;  %2035 = vmatmul.bf16.gmra.mxu2 %v1929_v12  ;;  %v1718_v43 = vpop.f32.mrf.mxu0  ;;  %v5997_v56 = vadd.f32 %v1710_v45, %v1572_v1  ;;  %v2086_v45 = vld [vmem:[%s5469_s24 + $0xa1] sm:$0xff]  ;;  %s4536_s24 = sshll.u32 %s5189_s25, 6  ;;  %s955_s25 = sadd.s32 1, %s5189_s25  }
 0x307   : >> { %v2095_v2 = vpack.c.bf16 %v2086_v45, %v2085_v17  ;;  %s6029_s14 = scalar_lea.vmem [#allocation4], %s4536_s24  ;;  %p952_p12 = scmp.ge.s32.totalorder %s955_s25, 8  }
 0x308   : > { %vm3887_vm1 = vcmask (%p952_p12), 1043456   ;;  %vm3883_vm2 = vcmask (%p952_p12), 162816   ;;  %s3938_s24 = scalar_lea.hbm (%p952_p12), %s7321_s9, %s5291_s22  ;;  %s7348_s13 = sand.u32 (%p952_p12), 1, %s5173_s10  }
 0x309   : >> { %2204 = vmatmul.bf16.gmra.mxu3 %v2094_v50  ;;  %v1385_v11 = vpop.f32.mrf.mxu2  ;;  %2368 = vmatmul.bf16.gmra.mxu0 %v2258_v20  ;;  %v6018_v50 = vld [vmem:[%s7316_s4] ss:$0 sm:$0xff]  ;;  %s3942_s21 = sshll.u32 (%p952_p12), %s3938_s24, 4  ;;  %s3928_s16 = scalar_lea.sflag (%p952_p12), [#allocation6], %s7348_s13  ;;  %s3943_s21 = int_to_ptr.hbm [resolvable:$true] %s3942_s21 }
 0x30a   : >> { %v1409_v22 = vadd.f32 %v1385_v11, %v1240_v16  ;;  %s5125_s17 = sshra.s32 (%p952_p12), %s3943_s21, 4  ;;  %s5131_s25 = scalar_lea.hbm (%p952_p12), %s7321_s9, 16  ;;  %s5126_s17 = int_to_ptr.hbm [resolvable:$true] %s5125_s17 }
 0x30b   : >> { %v1241_v28 = vpop.f32.mrf.mxu1  ;;  %s5127_s26 = scalar_lea.hbm (%p952_p12), %s5126_s17, 8  ;;  %p5132_p2 = scmp.lt.s32.totalorder (%p952_p12), %s5126_s17, %s7321_s9 }
 0x30c   : >> { %v1554_v35 = vpop.f32.mrf.mxu3  ;;  %v1573_v0 = vadd.f32 %v1549_v21, %v1409_v22  ;;  %p5128_p13 = scmp.ne.s32.totalorder (%p952_p12), %s5126_s17, %s5127_s26  ;;  %p5133_p3 = scmp.lt.s32.totalorder (%p952_p12), %s5131_s25, %s5127_s26 }
 0x30e   : >> { %v1720_v44 = vpop.f32.mrf.mxu0  ;;  %v6000_v4 = vadd.f32 %v1713_v31, %v1573_v0  ;;  %v2259_v31 = vpack.c.bf16 %v2250_v40, %v2249_v13  ;;  %p5129_p0 = pnand (%p952_p12), %p5128_p13, %p5280_p5  ;;  %p5134_p4 = por (%p952_p12), %p5133_p3, %p5132_p2 }
 0x310   : > { %p5130_p1 = pneg (%p952_p12), %p5129_p0 }
 0x311   : >> { %v1387_v15 = vpop.f32.mrf.mxu2 }
 0x312   : > { %p5135_p7 = pnand (%p952_p12), %p5134_p4, %p5130_p1 }
 0x313   : >> { %v1244_v62 = vpop.f32.mrf.mxu1 }
 0x314   : >> { %v1556_v34 = vpop.f32.mrf.mxu3 }
 0x316   : >> { %1876 = vmatmul.bf16.gmra.mxu1 %v1766_v49  ;;  %2040 = vmatmul.bf16.gmra.mxu2 %v1930_v47  ;;  %v2334_v26 = vpop.f32.mrf.mxu0 }
 0x319   : >> { %2209 = vmatmul.bf16.gmra.mxu3 %v2095_v2  ;;  %v1390_v61 = vpop.f32.mrf.mxu2  ;;  %2373 = vmatmul.bf16.gmra.mxu0 %v2259_v31 }
 0x31b   : >> { %v1246_v6 = vpop.f32.mrf.mxu1 }
 0x31c   : >> { %v2170_v21 = vpop.f32.mrf.mxu3 }
 0x31e   : >> { %v2336_v3 = vpop.f32.mrf.mxu0 }
 0x321   : >> { %v1392_v7 = vpop.f32.mrf.mxu2 }
 0x323   : >> { %v1842_v27 = vpop.f32.mrf.mxu1 }
 0x324   : >> { %v2172_v59 = vpop.f32.mrf.mxu3  ;;  %v1887_v41 = vadd.f32 %v1842_v27, %v5903_v57 }
 0x326   : >> { %1881 = vmatmul.bf16.gmra.mxu1 %v1767_v24  ;;  %2045 = vmatmul.bf16.gmra.mxu2 %v1931_v37  ;;  %v2339_v30 = vpop.f32.mrf.mxu0 }
 0x329   : >> { %v2006_v19 = vpop.f32.mrf.mxu2 }
 0x32a   : >> { %v2051_v12 = vadd.f32 %v2006_v19, %v1887_v41 }
 0x32b   : >> { %v1844_v32 = vpop.f32.mrf.mxu1 }
 0x32c   : >> { %v2175_v25 = vpop.f32.mrf.mxu3  ;;  %v2215_v8 = vadd.f32 %v2170_v21, %v2051_v12  ;;  %v1888_v43 = vadd.f32 %v1844_v32, %v5914_v63 }
 0x32e   : >> { %v2379_v1 = vadd.f32 %v2334_v26, %v2215_v8  ;;  %v2341_v39 = vpop.f32.mrf.mxu0 }
 0x330   : >> { %v2401_v20 = vadd.f32 %v6018_v50, %v2379_v1 }
 0x331   : >> { %v2008_v18 = vpop.f32.mrf.mxu2 }
 0x332   : >> { %v2419_v16 = vmax.f32 %v2401_v20, 0.0  ;;  %v2052_v11 = vadd.f32 %v2008_v18, %v1888_v43 }
 0x333   : >> { %v1847_v22 = vpop.f32.mrf.mxu1 }
 0x334   : >> { %v2177_v57 = vpop.f32.mrf.mxu3  ;;  %2437 = vst [vmem:[#allocation3] sm:$0xff] %v2419_v16  ;;  %v2216_v35 = vadd.f32 %v2172_v59, %v2052_v11  ;;  %v1889_v38 = vadd.f32 %v1847_v22, %v5917_v42 }
 0x336   : >> { %v2380_v28 = vadd.f32 %v2336_v3, %v2216_v35  ;;  %v2344_v0 = vpop.f32.mrf.mxu0 }
 0x338   : >> { %v2402_v44 = vadd.f32 %v6018_v50, %v2380_v28 }
 0x339   : >> { %v2011_v23 = vpop.f32.mrf.mxu2 }
 0x33a   : >> { %v2420_v58 = vmax.f32 %v2402_v44, 0.0  ;;  %v2053_v17 = vadd.f32 %v2011_v23, %v1889_v38 }
 0x33b   : >> { %v1849_v15 = vpop.f32.mrf.mxu1 }
 0x33c   : >> { %v2180_v45 = vpop.f32.mrf.mxu3  ;;  %2438 = vst [vmem:[#allocation3 + $0x8] sm:$0xff] %v2420_v58  ;;  %v2217_v63 = vadd.f32 %v2175_v25, %v2053_v17  ;;  %v1890_v34 = vadd.f32 %v1849_v15, %v5927_v9 }
 0x33e   : >> { %v2381_v49 = vadd.f32 %v2339_v30, %v2217_v63  ;;  %v2346_v33 = vpop.f32.mrf.mxu0 }
 0x340   : >> { %v2403_v47 = vadd.f32 %v6018_v50, %v2381_v49 }
 0x341   : >> { %v2013_v13 = vpop.f32.mrf.mxu2 }
 0x342   : >> { %v2421_v40 = vmax.f32 %v2403_v47, 0.0  ;;  %v2054_v62 = vadd.f32 %v2013_v13, %v1890_v34 }
 0x343   : >> { %v1852_v31 = vpop.f32.mrf.mxu1  ;;  %v2455_v54 = vld [vmem:[#allocation3] ss:$2 sm:$0x1f]  ;;  %v2457_v3 = vld [vmem:[#allocation3 + $0x1] ss:$2 sm:$0x1f] }
 0x344   : >> { %v2182_v2 = vpop.f32.mrf.mxu3  ;;  %2439 = vst [vmem:[#allocation3 + $0x10] sm:$0xff] %v2421_v40  ;;  %v2218_v42 = vadd.f32 %v2177_v57, %v2054_v62  ;;  %v1891_v6 = vadd.f32 %v1852_v31, %v5930_v14  ;;  %v2458_v59 = vmax.f32 %v2455_v54, %v2457_v3 }
 0x346   : >> { %v2382_v26 = vadd.f32 %v2341_v39, %v2218_v42  ;;  %v2349_v61 = vpop.f32.mrf.mxu0 }
 0x348   : >> { %v2404_v21 = vadd.f32 %v6018_v50, %v2382_v26 }
 0x349   : >> { %v2016_v46 = vpop.f32.mrf.mxu2 }
 0x34a   : >> { %v2422_v36 = vmax.f32 %v2404_v21, 0.0  ;;  %v2055_v55 = vadd.f32 %v2016_v46, %v1891_v6 }
 0x34b   : >> { %v2460_v7 = vld [vmem:[#allocation3 + $0xc] ss:$2 sm:$0x1f]  ;;  %v2462_v24 = vld [vmem:[#allocation3 + $0xd] ss:$2 sm:$0x1f]  ;;  %v1854_v37 = vpop.f32.mrf.mxu1 }
 0x34c   : >> { %v2185_v9 = vpop.f32.mrf.mxu3  ;;  %v2463_v27 = vmax.f32 %v2460_v7, %v2462_v24  ;;  %2440 = vst [vmem:[#allocation3 + $0x18] sm:$0xff] %v2422_v36  ;;  %v2219_v30 = vadd.f32 %v2180_v45, %v2055_v55  ;;  %v1892_v12 = vadd.f32 %v1854_v37, %v5941_v48 }
 0x34e   : >> { %v2464_v41 = vmax.f32 %v2458_v59, %v2463_v27  ;;  %v2383_v19 = vadd.f32 %v2344_v0, %v2219_v30  ;;  %v2351_v32 = vpop.f32.mrf.mxu0 }
 0x350   : >> { %2467 = vst [vmem:[%s6029_s14] sm:$0x1f] %v2464_v41  ;;  %v2405_v14 = vadd.f32 %v6018_v50, %v2383_v19 }
 0x351   : >> { %v2018_v25 = vpop.f32.mrf.mxu2 }
 0x352   : >> { %v2423_v8 = vmax.f32 %v2405_v14, 0.0  ;;  %v2056_v1 = vadd.f32 %v2018_v25, %v1892_v12 }
 0x353   : >> { %v1857_v20 = vpop.f32.mrf.mxu1 }
 0x354   : >> { %v2187_v39 = vpop.f32.mrf.mxu3  ;;  %2441 = vst [vmem:[#allocation3 + $0x20] sm:$0xff] %v2423_v8  ;;  %v2220_v43 = vadd.f32 %v2182_v2, %v2056_v1  ;;  %v1893_v11 = vadd.f32 %v1857_v20, %v5944_v60 }
 0x356   : >> { %v2384_v18 = vadd.f32 %v2346_v33, %v2220_v43  ;;  %v2354_v44 = vpop.f32.mrf.mxu0 }
 0x358   : >> { %v2406_v16 = vadd.f32 %v6018_v50, %v2384_v18 }
 0x359   : >> { %v2021_v57 = vpop.f32.mrf.mxu2 }
 0x35a   : >> { %v2424_v22 = vmax.f32 %v2406_v16, 0.0  ;;  %v2057_v35 = vadd.f32 %v2021_v57, %v1893_v11 }
 0x35b   : >> { %v1859_v0 = vpop.f32.mrf.mxu1  ;;  %v2469_v17 = vld [vmem:[#allocation3 + $0x18] ss:$2 sm:$0x1f]  ;;  %v2471_v45 = vld [vmem:[#allocation3 + $0x19] ss:$2 sm:$0x1f] }
 0x35c   : >> { %v2190_v28 = vpop.f32.mrf.mxu3  ;;  %2442 = vst [vmem:[#allocation3 + $0x28] sm:$0xff] %v2424_v22  ;;  %v2221_v48 = vadd.f32 %v2185_v9, %v2057_v35  ;;  %v1894_v58 = vadd.f32 %v1859_v0, %v5955_v52  ;;  %v2472_v13 = vmax.f32 %v2469_v17, %v2471_v45 }
 0x35e   : >> { %v2385_v38 = vadd.f32 %v2349_v61, %v2221_v48  ;;  %v2356_v2 = vpop.f32.mrf.mxu0 }
 0x360   : >> { %v2407_v23 = vadd.f32 %v6018_v50, %v2385_v38 }
 0x361   : >> { %v2023_v15 = vpop.f32.mrf.mxu2 }
 0x362   : >> { %v2425_v63 = vmax.f32 %v2407_v23, 0.0  ;;  %v2058_v49 = vadd.f32 %v2023_v15, %v1894_v58 }
 0x363   : >> { %v2474_v60 = vld [vmem:[#allocation3 + $0x24] ss:$2 sm:$0x1f]  ;;  %v2476_v33 = vld [vmem:[#allocation3 + $0x25] ss:$2 sm:$0x1f]  ;;  %v1862_v47 = vpop.f32.mrf.mxu1 }
 0x364   : >> { %v2192_v34 = vpop.f32.mrf.mxu3  ;;  %v2477_v40 = vmax.f32 %v2474_v60, %v2476_v33  ;;  %2443 = vst [vmem:[#allocation3 + $0x30] sm:$0xff] %v2425_v63  ;;  %v2222_v62 = vadd.f32 %v2187_v39, %v2058_v49  ;;  %v1895_v26 = vadd.f32 %v1862_v47, %v5958_v51 }
 0x366   : >> { %v2478_v31 = vmax.f32 %v2472_v13, %v2477_v40  ;;  %v2386_v42 = vadd.f32 %v2351_v32, %v2222_v62  ;;  %v2359_v55 = vpop.f32.mrf.mxu0 }
 0x368   : >> { %4538 = vst [vmem:[%s6029_s14 + $0x8] sm:$0x1f] %v2478_v31  ;;  %v2408_v52 = vadd.f32 %v6018_v50, %v2386_v42 }
 0x369   : >> { %v2026_v61 = vpop.f32.mrf.mxu2 }
 0x36a   : >> { %v2426_v21 = vmax.f32 %v2408_v52, 0.0  ;;  %v2059_v6 = vadd.f32 %v2026_v61, %v1895_v26 }
 0x36b   : >> { %v1864_v54 = vpop.f32.mrf.mxu1 }
 0x36c   : >> { %2444 = vst [vmem:[#allocation3 + $0x38] sm:$0xff] %v2426_v21  ;;  %v2223_v3 = vadd.f32 %v2190_v28, %v2059_v6  ;;  %v2195_v46 = vpop.f32.mrf.mxu3  ;;  %v1896_v7 = vadd.f32 %v1864_v54, %v5969_v53 }
 0x36e   : >> { %v2387_v36 = vadd.f32 %v2354_v44, %v2223_v3  ;;  %v2361_v8 = vpop.f32.mrf.mxu0 }
 0x370   : >> { %v2409_v9 = vadd.f32 %v6018_v50, %v2387_v36 }
 0x371   : >> { %v2028_v24 = vpop.f32.mrf.mxu2 }
 0x372   : >> { %v2427_v37 = vmax.f32 %v2409_v9, 0.0  ;;  %v2060_v59 = vadd.f32 %v2028_v24, %v1896_v7 }
 0x373   : >> { %v1867_v27 = vpop.f32.mrf.mxu1  ;;  %v2483_v12 = vld [vmem:[#allocation3 + $0x30] ss:$2 sm:$0x1f]  ;;  %v2485_v25 = vld [vmem:[#allocation3 + $0x31] ss:$2 sm:$0x1f] }
 0x374   : >> { %2445 = vst [vmem:[#allocation3 + $0x40] sm:$0xff] %v2427_v37  ;;  %v2224_v30 = vadd.f32 %v2192_v34, %v2060_v59  ;;  %v2197_v41 = vpop.f32.mrf.mxu3  ;;  %v1897_v14 = vadd.f32 %v1867_v27, %v5972_v10  ;;  %v2486_v18 = vmax.f32 %v2483_v12, %v2485_v25 }
 0x376   : >> { %v2388_v51 = vadd.f32 %v2356_v2, %v2224_v30  ;;  %v2364_v23 = vpop.f32.mrf.mxu0 }
 0x378   : >> { %v2410_v19 = vadd.f32 %v6018_v50, %v2388_v51 }
 0x379   : >> { %v2031_v32 = vpop.f32.mrf.mxu2 }
 0x37a   : >> { %v2428_v1 = vmax.f32 %v2410_v19, 0.0  ;;  %v2061_v39 = vadd.f32 %v2031_v32, %v1897_v14 }
 0x37b   : >> { %v2488_v53 = vld [vmem:[#allocation3 + $0x3c] ss:$2 sm:$0x1f]  ;;  %v2490_v20 = vld [vmem:[#allocation3 + $0x3d] ss:$2 sm:$0x1f]  ;;  %v1869_v43 = vpop.f32.mrf.mxu1 }
 0x37c   : >> { %v2491_v16 = vmax.f32 %v2488_v53, %v2490_v20  ;;  %2446 = vst [vmem:[#allocation3 + $0x48] sm:$0xff] %v2428_v1  ;;  %v2225_v11 = vadd.f32 %v2195_v46, %v2061_v39  ;;  %v1898_v10 = vadd.f32 %v1869_v43, %v5983_v29  ;;  %v2200_v0 = vpop.f32.mrf.mxu3 }
 0x37e   : >> { %v2492_v57 = vmax.f32 %v2486_v18, %v2491_v16  ;;  %v2389_v22 = vadd.f32 %v2359_v55, %v2225_v11  ;;  %v2366_v34 = vpop.f32.mrf.mxu0 }
 0x380   : >> { %4540 = vst [vmem:[%s6029_s14 + $0x10] sm:$0x1f] %v2492_v57  ;;  %v2411_v35 = vadd.f32 %v6018_v50, %v2389_v22 }
 0x381   : >> { %v2033_v28 = vpop.f32.mrf.mxu2 }
 0x382   : >> { %v2429_v44 = vmax.f32 %v2411_v35, 0.0  ;;  %v2062_v48 = vadd.f32 %v2033_v28, %v1898_v10  ;;  %v4560_v10 = vld [vmem:[%s7317_s5 + $0xf8] sm:$0xff] (%p952_p12) }
 0x383   : >> { %v1872_v38 = vpop.f32.mrf.mxu1  ;;  %v4576_v28 = vld [vmem:[%s7317_s5 + $0x178] sm:$0xff] (%p952_p12)  ;;  %2588 = vmatpush.msra.mxu0 (%p952_p12), %v4560_v10  ;;  %v2539_v10 = vld [vmem:[%s7317_s5] sm:$0xff] (%p952_p12) }
 0x384   : >> { %2447 = vst [vmem:[#allocation3 + $0x50] sm:$0xff] %v2429_v44  ;;  %v2226_v58 = vadd.f32 %v2197_v41, %v2062_v48  ;;  %v1899_v15 = vadd.f32 %v1872_v38, %v5986_v5  ;;  %v2202_v47 = vpop.f32.mrf.mxu3  ;;  %2661 = vmatpush.msra.mxu2 (%p952_p12), %v4576_v28  ;;  %v2554_v44 = vld [vmem:[%s7317_s5 + $0x78] sm:$0xff] (%p952_p12)  ;;  %v4575_v48 = vld [vmem:[%s7317_s5 + $0x170] sm:$0xff] (%p952_p12)  ;;  %v4577_v28 = vld [vmem:[%s7317_s5 + $0x180] sm:$0xff] (%p952_p12) }
 0x385   : > { %v4592_v38 = vld [vmem:[%s7317_s5 + $0x1f8] sm:$0xff] (%p952_p12)  ;;  %2608 = vmatpush.msra.mxu1 (%p952_p12), %v2554_v44 }
 0x386   : >> { %v2390_v17 = vadd.f32 %v2361_v8, %v2226_v58  ;;  %v2369_v9 = vpop.f32.mrf.mxu0  ;;  %2715 = vmatpush.msra.mxu3 (%p952_p12), %v4592_v38  ;;  %v2553_v58 = vld [vmem:[%s7317_s5 + $0x70] sm:$0xff] (%p952_p12)  ;;  %2662 = vmatpush.msra.mxu2 (%p952_p12), %v4575_v48  ;;  %v4624_v44 = vld [vmem:[%s7317_s5 + $0x2f8] sm:$0xff] (%p952_p12) }
 0x387   : > { %2609 = vmatpush.msra.mxu1 (%p952_p12), %v2553_v58  ;;  %v4639_v48 = vld [vmem:[%s7317_s5 + $0x370] sm:$0xff] (%p952_p12)  ;;  %v4656_v38 = vld [vmem:[%s7317_s5 + $0x3f8] sm:$0xff] (%p952_p12) }
 0x388   : >> { %v2412_v45 = vadd.f32 %v6018_v50, %v2390_v17  ;;  %v4574_v17 = vld [vmem:[%s7317_s5 + $0x168] sm:$0xff] (%p952_p12)  ;;  %v4623_v58 = vld [vmem:[%s7317_s5 + $0x2f0] sm:$0xff] (%p952_p12) }
 0x389   : >> { %v2036_v63 = vpop.f32.mrf.mxu2  ;;  %2663 = vmatpush.msra.mxu2 (%p952_p12), %v4574_v17  ;;  %v4638_v17 = vld [vmem:[%s7317_s5 + $0x368] sm:$0xff] (%p952_p12) }
 0x38a   : >> { %v2430_v49 = vmax.f32 %v2412_v45, 0.0  ;;  %v2063_v60 = vadd.f32 %v2036_v63, %v1899_v15  ;;  %v4591_v45 = vld [vmem:[%s7317_s5 + $0x1f0] sm:$0xff] (%p952_p12)  ;;  %v2552_v15 = vld [vmem:[%s7317_s5 + $0x68] sm:$0xff] (%p952_p12)  ;;  %v4557_v63 = vld [vmem:[%s7317_s5 + $0xe0] sm:$0xff] (%p952_p12) }
 0x38b   : >> { %v1874_v33 = vpop.f32.mrf.mxu1  ;;  %v2497_v2 = vld [vmem:[#allocation3 + $0x48] ss:$2 sm:$0x1f]  ;;  %v2499_v31 = vld [vmem:[#allocation3 + $0x49] ss:$2 sm:$0x1f]  ;;  %2716 = vmatpush.msra.mxu3 (%p952_p12), %v4591_v45  ;;  %2610 = vmatpush.msra.mxu1 (%p952_p12), %v2552_v15 }
 0x38c   : >> { %2448 = vst [vmem:[#allocation3 + $0x58] sm:$0xff] %v2430_v49  ;;  %v2227_v29 = vadd.f32 %v2200_v0, %v2063_v60  ;;  %v1900_v62 = vadd.f32 %v1874_v33, %v5997_v56  ;;  %v2500_v6 = vmax.f32 %v2497_v2, %v2499_v31  ;;  %v2205_v46 = vpop.f32.mrf.mxu3  ;;  %v4559_v0 = vld [vmem:[%s7317_s5 + $0xf0] sm:$0xff] (%p952_p12)  ;;  %v4573_v49 = vld [vmem:[%s7317_s5 + $0x160] sm:$0xff] (%p952_p12)  ;;  %v4590_v60 = vld [vmem:[%s7317_s5 + $0x1e8] sm:$0xff] (%p952_p12) }
 0x38d   : > { %2589 = vmatpush.msra.mxu0 (%p952_p12), %v4559_v0  ;;  %v2551_v33 = vld [vmem:[%s7317_s5 + $0x60] sm:$0xff] (%p952_p12)  ;;  %2717 = vmatpush.msra.mxu3 (%p952_p12), %v4590_v60  ;;  %v4571_v2 = vld [vmem:[%s7317_s5 + $0x150] sm:$0xff] (%p952_p12)  ;;  %v4654_v60 = vld [vmem:[%s7317_s5 + $0x3e8] sm:$0xff] (%p952_p12) }
 0x38e   : >> { %v2391_v13 = vadd.f32 %v2364_v23, %v2227_v29  ;;  %v2371_v14 = vpop.f32.mrf.mxu0  ;;  %v4558_v23 = vld [vmem:[%s7317_s5 + $0xe8] sm:$0xff] (%p952_p12)  ;;  %v4556_v29 = vld [vmem:[%s7317_s5 + $0xd8] sm:$0xff] (%p952_p12)  ;;  %2664 = vmatpush.msra.mxu2 (%p952_p12), %v4573_v49  ;;  %2611 = vmatpush.msra.mxu1 (%p952_p12), %v2551_v33  ;;  %v2549_v31 = vld [vmem:[%s7317_s5 + $0x50] sm:$0xff] (%p952_p12) }
 0x38f   : > { %2590 = vmatpush.msra.mxu0 (%p952_p12), %v4558_v23  ;;  %v2543_v14 = vld [vmem:[%s7317_s5 + $0x20] sm:$0xff] (%p952_p12)  ;;  %v4607_v0 = vld [vmem:[%s7317_s5 + $0x270] sm:$0xff] (%p952_p12)  ;;  %v4606_v23 = vld [vmem:[%s7317_s5 + $0x268] sm:$0xff] (%p952_p12) }
 0x390   : >> { %v2413_v40 = vadd.f32 %v6018_v50, %v2391_v13  ;;  %v2550_v13 = vld [vmem:[%s7317_s5 + $0x58] sm:$0xff] (%p952_p12)  ;;  %v4655_v45 = vld [vmem:[%s7317_s5 + $0x3f0] sm:$0xff] (%p952_p12)  ;;  %v4605_v15 = vld [vmem:[%s7317_s5 + $0x260] sm:$0xff] (%p952_p12) }
 0x391   : >> { %v2038_v42 = vpop.f32.mrf.mxu2  ;;  %2591 = vmatpush.msra.mxu0 (%p952_p12), %v4557_v63  ;;  %2612 = vmatpush.msra.mxu1 (%p952_p12), %v2550_v13  ;;  %v4622_v63 = vld [vmem:[%s7317_s5 + $0x2e8] sm:$0xff] (%p952_p12)  ;;  %v4637_v49 = vld [vmem:[%s7317_s5 + $0x360] sm:$0xff] (%p952_p12)  ;;  %v4604_v33 = vld [vmem:[%s7317_s5 + $0x258] sm:$0xff] (%p952_p12) }
 0x392   : >> { %v2431_v52 = vmax.f32 %v2413_v40, 0.0  ;;  %v2064_v26 = vadd.f32 %v2038_v42, %v1900_v62  ;;  %v4588_v40 = vld [vmem:[%s7317_s5 + $0x1d8] sm:$0xff] (%p952_p12)  ;;  %v4555_v62 = vld [vmem:[%s7317_s5 + $0xd0] sm:$0xff] (%p952_p12) }
 0x393   : >> { %v2502_v5 = vld [vmem:[#allocation3 + $0x54] ss:$2 sm:$0x1f]  ;;  %v2504_v61 = vld [vmem:[#allocation3 + $0x55] ss:$2 sm:$0x1f]  ;;  %v1877_v21 = vpop.f32.mrf.mxu1  ;;  %2592 = vmatpush.msra.mxu0 (%p952_p12), %v4556_v29  ;;  %2613 = vmatpush.msra.mxu1 (%p952_p12), %v2549_v31 }
 0x394   : >> { %v2505_v54 = vmax.f32 %v2502_v5, %v2504_v61  ;;  %2449 = vst [vmem:[#allocation3 + $0x60] sm:$0xff] %v2431_v52  ;;  %v2228_v3 = vadd.f32 %v2202_v47, %v2064_v26  ;;  %v1901_v7 = vadd.f32 %v1877_v21, %v6000_v4  ;;  %v2207_v41 = vpop.f32.mrf.mxu3  ;;  %v4589_v47 = vld [vmem:[%s7317_s5 + $0x1e0] sm:$0xff] (%p952_p12)  ;;  %v4587_v42 = vld [vmem:[%s7317_s5 + $0x1d0] sm:$0xff] (%p952_p12)  ;;  %v4554_v52 = vld [vmem:[%s7317_s5 + $0xc8] sm:$0xff] (%p952_p12) }
 0x395   : > { %2718 = vmatpush.msra.mxu3 (%p952_p12), %v4589_v47  ;;  %v4570_v26 = vld [vmem:[%s7317_s5 + $0x148] sm:$0xff] (%p952_p12)  ;;  %2593 = vmatpush.msra.mxu0 (%p952_p12), %v4555_v62  ;;  %v4553_v21 = vld [vmem:[%s7317_s5 + $0xc0] sm:$0xff] (%p952_p12)  ;;  %v4636_v29 = vld [vmem:[%s7317_s5 + $0x358] sm:$0xff] (%p952_p12) }
 0x396   : >> { %v2506_v36 = vmax.f32 %v2500_v6, %v2505_v54  ;;  %v2392_v55 = vadd.f32 %v2366_v34, %v2228_v3  ;;  %v2374_v43 = vpop.f32.mrf.mxu0  ;;  %v4572_v34 = vld [vmem:[%s7317_s5 + $0x158] sm:$0xff] (%p952_p12)  ;;  %v2548_v5 = vld [vmem:[%s7317_s5 + $0x48] sm:$0xff] (%p952_p12)  ;;  %v4569_v6 = vld [vmem:[%s7317_s5 + $0x140] sm:$0xff] (%p952_p12) }
 0x397   : > { %2665 = vmatpush.msra.mxu2 (%p952_p12), %v4572_v34  ;;  %2719 = vmatpush.msra.mxu3 (%p952_p12), %v4588_v40  ;;  %v4586_v61 = vld [vmem:[%s7317_s5 + $0x1c8] sm:$0xff] (%p952_p12)  ;;  %v2547_v54 = vld [vmem:[%s7317_s5 + $0x40] sm:$0xff] (%p952_p12)  ;;  %v4603_v13 = vld [vmem:[%s7317_s5 + $0x250] sm:$0xff] (%p952_p12) }
 0x398   : >> { %4542 = vst [vmem:[%s6029_s14 + $0x18] sm:$0x1f] %v2506_v36  ;;  %v2414_v56 = vadd.f32 %v6018_v50, %v2392_v55  ;;  %2594 = vmatpush.msra.mxu0 (%p952_p12), %v4554_v52  ;;  %v4585_v3 = vld [vmem:[%s7317_s5 + $0x1c0] sm:$0xff] (%p952_p12)  ;;  %2614 = vmatpush.msra.mxu1 (%p952_p12), %v2548_v5  ;;  %v4568_v36 = vld [vmem:[%s7317_s5 + $0x138] sm:$0xff] (%p952_p12)  ;;  %v4546_v43 = vld [vmem:[%s7317_s5 + $0x88] sm:$0xff] (%p952_p12) }
 0x399   : >> { %v2041_v24 = vpop.f32.mrf.mxu2  ;;  %2666 = vmatpush.msra.mxu2 (%p952_p12), %v4571_v2  ;;  %2720 = vmatpush.msra.mxu3 (%p952_p12), %v4587_v42  ;;  %v2546_v55 = vld [vmem:[%s7317_s5 + $0x38] sm:$0xff] (%p952_p12)  ;;  %v4549_v41 = vld [vmem:[%s7317_s5 + $0xa0] sm:$0xff] (%p952_p12)  ;;  %v4635_v62 = vld [vmem:[%s7317_s5 + $0x350] sm:$0xff] (%p952_p12) }
 0x39a   : >> { %v2432_v37 = vmax.f32 %v2414_v56, 0.0  ;;  %v2065_v59 = vadd.f32 %v2041_v24, %v1901_v7  ;;  %2595 = vmatpush.msra.mxu0 (%p952_p12), %v4553_v21  ;;  %2615 = vmatpush.msra.mxu1 (%p952_p12), %v2547_v54  ;;  %v4551_v56 = vld [vmem:[%s7317_s5 + $0xb0] sm:$0xff] (%p952_p12)  ;;  %v4621_v47 = vld [vmem:[%s7317_s5 + $0x2e0] sm:$0xff] (%p952_p12)  ;;  %v4620_v40 = vld [vmem:[%s7317_s5 + $0x2d8] sm:$0xff] (%p952_p12) }
 0x39b   : >> { %v1879_v27 = vpop.f32.mrf.mxu1  ;;  %2667 = vmatpush.msra.mxu2 (%p952_p12), %v4570_v26  ;;  %2721 = vmatpush.msra.mxu3 (%p952_p12), %v4586_v61  ;;  %v4567_v7 = vld [vmem:[%s7317_s5 + $0x130] sm:$0xff] (%p952_p12)  ;;  %v4653_v34 = vld [vmem:[%s7317_s5 + $0x3e0] sm:$0xff] (%p952_p12)  ;;  %v4652_v2 = vld [vmem:[%s7317_s5 + $0x3d8] sm:$0xff] (%p952_p12) }
 0x39c   : >> { %2450 = vst [vmem:[#allocation3 + $0x68] sm:$0xff] %v2432_v37  ;;  %v2229_v30 = vadd.f32 %v2205_v46, %v2065_v59  ;;  %v2210_v39 = vpop.f32.mrf.mxu3  ;;  %v4552_v46 = vld [vmem:[%s7317_s5 + $0xb8] sm:$0xff] (%p952_p12)  ;;  %v2545_v24 = vld [vmem:[%s7317_s5 + $0x30] sm:$0xff] (%p952_p12)  ;;  %2616 = vmatpush.msra.mxu1 (%p952_p12), %v2546_v55  ;;  %v4550_v59 = vld [vmem:[%s7317_s5 + $0xa8] sm:$0xff] (%p952_p12) }
 0x39d   : > { %2668 = vmatpush.msra.mxu2 (%p952_p12), %v4569_v6  ;;  %2722 = vmatpush.msra.mxu3 (%p952_p12), %v4585_v3  ;;  %v4583_v37 = vld [vmem:[%s7317_s5 + $0x1b0] sm:$0xff] (%p952_p12)  ;;  %v4566_v27 = vld [vmem:[%s7317_s5 + $0x128] sm:$0xff] (%p952_p12)  ;;  %v4601_v6 = vld [vmem:[%s7317_s5 + $0x240] sm:$0xff] (%p952_p12) }
 0x39e   : >> { %v2393_v51 = vadd.f32 %v2369_v9, %v2229_v30  ;;  %v2376_v35 = vpop.f32.mrf.mxu0  ;;  %v4584_v9 = vld [vmem:[%s7317_s5 + $0x1b8] sm:$0xff] (%p952_p12)  ;;  %2596 = vmatpush.msra.mxu0 (%p952_p12), %v4552_v46  ;;  %v2544_v30 = vld [vmem:[%s7317_s5 + $0x28] sm:$0xff] (%p952_p12)  ;;  %2617 = vmatpush.msra.mxu1 (%p952_p12), %v2545_v24  ;;  %v4547_v39 = vld [vmem:[%s7317_s5 + $0x90] sm:$0xff] (%p952_p12) }
 0x39f   : > { %2669 = vmatpush.msra.mxu2 (%p952_p12), %v4568_v36  ;;  %2723 = vmatpush.msra.mxu3 (%p952_p12), %v4584_v9  ;;  %v4640_v35 = vld [vmem:[%s7317_s5 + $0x378] sm:$0xff] (%p952_p12)  ;;  %v4602_v31 = vld [vmem:[%s7317_s5 + $0x248] sm:$0xff] (%p952_p12)  ;;  %v4619_v42 = vld [vmem:[%s7317_s5 + $0x2d0] sm:$0xff] (%p952_p12) }
 0x3a0   : >> { %v2415_v19 = vadd.f32 %v6018_v50, %v2393_v51  ;;  %2597 = vmatpush.msra.mxu0 (%p952_p12), %v4551_v56  ;;  %v4582_v51 = vld [vmem:[%s7317_s5 + $0x1a8] sm:$0xff] (%p952_p12)  ;;  %2618 = vmatpush.msra.mxu1 (%p952_p12), %v2544_v30  ;;  %v4651_v21 = vld [vmem:[%s7317_s5 + $0x3d0] sm:$0xff] (%p952_p12)  ;;  %v4633_v46 = vld [vmem:[%s7317_s5 + $0x340] sm:$0xff] (%p952_p12) }
 0x3a1   : >> { %v2043_v12 = vpop.f32.mrf.mxu2  ;;  %2670 = vmatpush.msra.mxu2 (%p952_p12), %v4567_v7  ;;  %2724 = vmatpush.msra.mxu3 (%p952_p12), %v4583_v37  ;;  %v4634_v61 = vld [vmem:[%s7317_s5 + $0x348] sm:$0xff] (%p952_p12)  ;;  %v4600_v9 = vld [vmem:[%s7317_s5 + $0x238] sm:$0xff] (%p952_p12)  ;;  %v4617_v56 = vld [vmem:[%s7317_s5 + $0x2c0] sm:$0xff] (%p952_p12) }
 0x3a2   : >> { %v2433_v25 = vmax.f32 %v2415_v19, 0.0  ;;  %v4565_v19 = vld [vmem:[%s7317_s5 + $0x120] sm:$0xff] (%p952_p12)  ;;  %2598 = vmatpush.msra.mxu0 (%p952_p12), %v4550_v59  ;;  %2619 = vmatpush.msra.mxu1 (%p952_p12), %v2543_v14  ;;  %v4618_v3 = vld [vmem:[%s7317_s5 + $0x2c8] sm:$0xff] (%p952_p12)  ;;  %v4632_v24 = vld [vmem:[%s7317_s5 + $0x338] sm:$0xff] (%p952_p12) }
 0x3a3   : >> { %v1882_v32 = vpop.f32.mrf.mxu1  ;;  %v2511_v8 = vld [vmem:[#allocation3 + $0x60] ss:$2 sm:$0x1f]  ;;  %v2513_v1 = vld [vmem:[#allocation3 + $0x61] ss:$2 sm:$0x1f]  ;;  %2671 = vmatpush.msra.mxu2 (%p952_p12), %v4566_v27  ;;  %2725 = vmatpush.msra.mxu3 (%p952_p12), %v4582_v51 }
 0x3a4   : >> { %2451 = vst [vmem:[#allocation3 + $0x70] sm:$0xff] %v2433_v25  ;;  %v2514_v18 = vmax.f32 %v2511_v8, %v2513_v1  ;;  %v2212_v50 = vpop.f32.mrf.mxu3  ;;  %v4581_v12 = vld [vmem:[%s7317_s5 + $0x1a0] sm:$0xff] (%p952_p12)  ;;  %v4548_v25 = vld [vmem:[%s7317_s5 + $0x98] sm:$0xff] (%p952_p12)  ;;  %2599 = vmatpush.msra.mxu0 (%p952_p12), %v4549_v41  ;;  %v4650_v55 = vld [vmem:[%s7317_s5 + $0x3c8] sm:$0xff] (%p952_p12) }
 0x3a5   : > { %v4564_v32 = vld [vmem:[%s7317_s5 + $0x118] sm:$0xff] (%p952_p12)  ;;  %2672 = vmatpush.msra.mxu2 (%p952_p12), %v4565_v19  ;;  %2726 = vmatpush.msra.mxu3 (%p952_p12), %v4581_v12  ;;  %v4649_v37 = vld [vmem:[%s7317_s5 + $0x3c0] sm:$0xff] (%p952_p12)  ;;  %v4599_v30 = vld [vmem:[%s7317_s5 + $0x230] sm:$0xff] (%p952_p12) }
 0x3a6   : > { %v2542_v8 = vld [vmem:[%s7317_s5 + $0x18] sm:$0xff] (%p952_p12)  ;;  %2600 = vmatpush.msra.mxu0 (%p952_p12), %v4548_v25  ;;  %v4631_v12 = vld [vmem:[%s7317_s5 + $0x330] sm:$0xff] (%p952_p12) }
 0x3a7   : > { %v4580_v1 = vld [vmem:[%s7317_s5 + $0x198] sm:$0xff] (%p952_p12)  ;;  %2673 = vmatpush.msra.mxu2 (%p952_p12), %v4564_v32  ;;  %2620 = vmatpush.msra.mxu1 (%p952_p12), %v2542_v8 }
 0x3a8   : > { %2727 = vmatpush.msra.mxu3 (%p952_p12), %v4580_v1  ;;  %2601 = vmatpush.msra.mxu0 (%p952_p12), %v4547_v39  ;;  %v4608_v50 = vld [vmem:[%s7317_s5 + $0x278] sm:$0xff] (%p952_p12)  ;;  %v4598_v1 = vld [vmem:[%s7317_s5 + $0x228] sm:$0xff] (%p952_p12)  ;;  %v4615_v39 = vld [vmem:[%s7317_s5 + $0x2b0] sm:$0xff] (%p952_p12) }
 0x3a9   : >> { %v2046_v4 = vpop.f32.mrf.mxu2  ;;  %v4616_v51 = vld [vmem:[%s7317_s5 + $0x2b8] sm:$0xff] (%p952_p12) }
 0x3aa   : > { %v4563_v4 = vld [vmem:[%s7317_s5 + $0x110] sm:$0xff] (%p952_p12)  ;;  %2602 = vmatpush.msra.mxu0 (%p952_p12), %v4546_v43  ;;  %v4648_v25 = vld [vmem:[%s7317_s5 + $0x3b8] sm:$0xff] (%p952_p12)  ;;  %v4630_v43 = vld [vmem:[%s7317_s5 + $0x328] sm:$0xff] (%p952_p12) }
 0x3ab   : >> { %v2516_v53 = vld [vmem:[#allocation3 + $0x6c] ss:$2 sm:$0x1f]  ;;  %v2518_v20 = vld [vmem:[#allocation3 + $0x6d] ss:$2 sm:$0x1f]  ;;  %v1884_v11 = vpop.f32.mrf.mxu1  ;;  %2674 = vmatpush.msra.mxu2 (%p952_p12), %v4563_v4 }
 0x3ac   : >> { %v2519_v16 = vmax.f32 %v2516_v53, %v2518_v20  ;;  %v2541_v53 = vld [vmem:[%s7317_s5 + $0x10] sm:$0xff] (%p952_p12)  ;;  %v4578_v11 = vld [vmem:[%s7317_s5 + $0x188] sm:$0xff] (%p952_p12) }
 0x3ad   : > { %954 = sbr.rel (!%p952_p12) target bundleno = 454 (0x1c6), region = 199  ;;  %v4579_v20 = vld [vmem:[%s7317_s5 + $0x190] sm:$0xff] (%p952_p12)  ;;  %2621 = vmatpush.msra.mxu1 (%p952_p12), %v2541_v53 }
 0x3ae   : >> { %v2520_v57 = vmax.f32 %v2514_v18, %v2519_v16  ;;  %v4562_v18 = vld [vmem:[%s7317_s5 + $0x108] sm:$0xff] (%p952_p12)  ;;  %2728 = vmatpush.msra.mxu3 (%p952_p12), %v4579_v20 }
 0x3af   : > { %v2540_v16 = vld [vmem:[%s7317_s5 + $0x8] sm:$0xff] (%p952_p12)  ;;  %2675 = vmatpush.msra.mxu2 (%p952_p12), %v4562_v18  ;;  %v4647_v18 = vld [vmem:[%s7317_s5 + $0x3b0] sm:$0xff] (%p952_p12) }
 0x3b0   : >> { %4544 = vst [vmem:[%s6029_s14 + $0x20] sm:$0x1f] %v2520_v57  ;;  %v4545_v57 = vld [vmem:[%s7317_s5 + $0x80] sm:$0xff] (%p952_p12)  ;;  %2622 = vmatpush.msra.mxu1 (%p952_p12), %v2540_v16  ;;  %2729 = vmatpush.msra.mxu3 (%p952_p12), %v4578_v11  ;;  %s7346_s14 = scalar_lea.vmem (%p952_p12), [#allocation5], %s5295_s23 }
 0x3b1   : >> { %v2048_v22 = vpop.f32.mrf.mxu2  ;;  %2603 = vmatpush.msra.mxu0 (%p952_p12), %v4545_v57  ;;  %s3940_s29 = sshll.u32 (%p952_p12), %s7346_s14, 4  ;;  %s7347_s28 = smov (%p952_p12), %s7346_s14  ;;  %s3941_s29 = int_to_ptr.vmem [resolvable:$true] %s3940_s29 }
 0x3b2   : > { %v4561_v22 = vld [vmem:[%s7317_s5 + $0x100] sm:$0xff]  ;;  %2623 = vmatpush.msra.mxu1 %v2539_v10  ;;  %2730 = vmatpush.msra.mxu3 %v4577_v28  ;;  %v4614_v28 = vld [vmem:[%s7317_s5 + $0x2a8] sm:$0xff] }
 0x3b3   : > { %2676 = vmatpush.msra.mxu2 %v4561_v22  ;;  %2769 = vmatpush.msrb.mxu0 %v4608_v50  ;;  %v4597_v22 = vld [vmem:[%s7317_s5 + $0x220] sm:$0xff] }
 0x3b4   : > { %2823 = vmatpush.msrb.mxu1 %v4624_v44  ;;  %2931 = vmatpush.msrb.mxu3 %v4656_v38  ;;  %v4646_v44 = vld [vmem:[%s7317_s5 + $0x3a8] sm:$0xff] }
 0x3b5   : > { %2877 = vmatpush.msrb.mxu2 %v4640_v35  ;;  %2770 = vmatpush.msrb.mxu0 %v4607_v0  ;;  %v4629_v0 = vld [vmem:[%s7317_s5 + $0x320] sm:$0xff] }
 0x3b6   : > { %2824 = vmatpush.msrb.mxu1 %v4623_v58  ;;  %2932 = vmatpush.msrb.mxu3 %v4655_v45  ;;  %v4613_v58 = vld [vmem:[%s7317_s5 + $0x2a0] sm:$0xff] }
 0x3b7   : > { %2878 = vmatpush.msrb.mxu2 %v4639_v48  ;;  %2771 = vmatpush.msrb.mxu0 %v4606_v23  ;;  %v2629_v52 = vld [vmem:[#allocation4 + $0x2] ss:$64 sm:$0x1]  ;;  %v2556_v27 = vld [vmem:[#allocation4 + $0x1] ss:$64 sm:$0x1] }
 0x3b8   : > { %2825 = vmatpush.msrb.mxu1 %v4622_v63  ;;  %2933 = vmatpush.msrb.mxu3 %v4654_v60  ;;  %v2630_v26 = vld [vmem:[#allocation4 + $0x2] ss:$64 sm:$0x2]  ;;  %v2557_v19 = vld [vmem:[#allocation4 + $0x1] ss:$64 sm:$0x2] }
 0x3b9   : > { %2879 = vmatpush.msrb.mxu2 %v4638_v17  ;;  %2772 = vmatpush.msrb.mxu0 %v4605_v15  ;;  %v2632_v5 = vld [vmem:[#allocation4 + $0x2] ss:$64 sm:$0x4]  ;;  %v2631_v54 = vor.u32 %v2630_v26, %v2629_v52  ;;  %v2559_v14 = vld [vmem:[#allocation4 + $0x1] ss:$64 sm:$0x4]  ;;  %v2558_v8 = vor.u32 %v2557_v19, %v2556_v27 }
 0x3ba   : > { %2826 = vmatpush.msrb.mxu1 %v4621_v47  ;;  %2934 = vmatpush.msrb.mxu3 %v4653_v34  ;;  %v2634_v36 = vld [vmem:[#allocation4 + $0x2] ss:$64 sm:$0x8]  ;;  %v2561_v20 = vld [vmem:[#allocation4 + $0x1] ss:$64 sm:$0x8] }
 0x3bb   : > { %2880 = vmatpush.msrb.mxu2 %v4637_v49  ;;  %2773 = vmatpush.msrb.mxu0 %v4604_v33  ;;  %v2633_v7 = vor.u32 %v2632_v5, %v2631_v54  ;;  %v2636_v59 = vld [vmem:[#allocation4 + $0x2] ss:$64 sm:$0x10]  ;;  %v2560_v16 = vor.u32 %v2559_v14, %v2558_v8  ;;  %v2563_v11 = vld [vmem:[#allocation4 + $0x1] ss:$64 sm:$0x10] }
 0x3bc   : > { %2827 = vmatpush.msrb.mxu1 %v4620_v40  ;;  %2935 = vmatpush.msrb.mxu3 %v4652_v2  ;;  %v2638_v32 = vld [vmem:[#allocation4 + $0x2] ss:$64 sm:$0x20]  ;;  %v2683_v57 = vld [vmem:[#allocation4 + $0x3] ss:$64 sm:$0x1] }
 0x3bd   : > { %2881 = vmatpush.msrb.mxu2 %v4636_v29  ;;  %2774 = vmatpush.msrb.mxu0 %v4603_v13  ;;  %v2635_v41 = vor.u32 %v2634_v36, %v2633_v7  ;;  %v2640_v53 = vld [vmem:[#allocation4 + $0x2] ss:$64 sm:$0x40]  ;;  %v2684_v35 = vld [vmem:[#allocation4 + $0x3] ss:$64 sm:$0x2]  ;;  %v2562_v48 = vor.u32 %v2561_v20, %v2560_v16 }
 0x3be   : > { %2828 = vmatpush.msrb.mxu1 %v4619_v42  ;;  %2936 = vmatpush.msrb.mxu3 %v4651_v21  ;;  %v2686_v10 = vld [vmem:[#allocation4 + $0x3] ss:$64 sm:$0x4]  ;;  %v2685_v38 = vor.u32 %v2684_v35, %v2683_v57  ;;  %v4596_v23 = vld [vmem:[%s7317_s5 + $0x218] sm:$0xff]  ;;  %v4645_v63 = vld [vmem:[%s7317_s5 + $0x3a0] sm:$0xff] }
 0x3bf   : > { %2882 = vmatpush.msrb.mxu2 %v4635_v62  ;;  %2775 = vmatpush.msrb.mxu0 %v4602_v31  ;;  %v2637_v4 = vor.u32 %v2636_v59, %v2635_v41  ;;  %v2565_v17 = vld [vmem:[#allocation4 + $0x1] ss:$64 sm:$0x20]  ;;  %v2688_v45 = vld [vmem:[#allocation4 + $0x3] ss:$64 sm:$0x8]  ;;  %v2564_v33 = vor.u32 %v2563_v11, %v2562_v48 }
 0x3c0   : > { %2829 = vmatpush.msrb.mxu1 %v4618_v3  ;;  %2937 = vmatpush.msrb.mxu3 %v4650_v55  ;;  %v4628_v15 = vld [vmem:[%s7317_s5 + $0x318] sm:$0xff]  ;;  %v2642_v60 = vld [vmem:[#allocation4 + $0x2] ss:$64 sm:$0x80]  ;;  %v2687_v29 = vor.u32 %v2686_v10, %v2685_v38  ;;  %v4626_v36 = vld [vmem:[%s7317_s5 + $0x308] sm:$0xff] }
 0x3c1   : > { %2883 = vmatpush.msrb.mxu2 %v4634_v61  ;;  %2776 = vmatpush.msrb.mxu0 %v4601_v6  ;;  %v2639_v50 = vor.u32 %v2638_v32, %v2637_v4  ;;  %v2567_v47 = vld [vmem:[#allocation4 + $0x1] ss:$64 sm:$0x40]  ;;  %v4612_v13 = vld [vmem:[%s7317_s5 + $0x298] sm:$0xff]  ;;  %v2566_v42 = vor.u32 %v2565_v17, %v2564_v33  ;;  %v4594_v61 = vld [vmem:[%s7317_s5 + $0x208] sm:$0xff] }
 0x3c2   : > { %2830 = vmatpush.msrb.mxu1 %v4617_v56  ;;  %2938 = vmatpush.msrb.mxu3 %v4649_v37  ;;  %v4595_v34 = vld [vmem:[%s7317_s5 + $0x210] sm:$0xff]  ;;  %v4644_v31 = vld [vmem:[%s7317_s5 + $0x398] sm:$0xff]  ;;  %v2689_v52 = vor.u32 %v2688_v45, %v2687_v29  ;;  %v4610_v41 = vld [vmem:[%s7317_s5 + $0x288] sm:$0xff] }
 0x3c3   : > { %2884 = vmatpush.msrb.mxu2 %v4633_v46  ;;  %2777 = vmatpush.msrb.mxu0 %v4600_v9  ;;  %v2641_v49 = vor.u32 %v2640_v53, %v2639_v50  ;;  %v2690_v40 = vld [vmem:[#allocation4 + $0x3] ss:$64 sm:$0x10]  ;;  %v2524_v62 = vld [vmem:[#allocation4] ss:$64 sm:$0x1]  ;;  %v2568_v55 = vor.u32 %v2567_v47, %v2566_v42 }
 0x3c4   : > { %2831 = vmatpush.msrb.mxu1 %v4616_v51  ;;  %2939 = vmatpush.msrb.mxu3 %v4648_v25  ;;  %v4627_v2 = vld [vmem:[%s7317_s5 + $0x310] sm:$0xff]  ;;  %v2691_v9 = vor.u32 %v2690_v40, %v2689_v52  ;;  %v4593_v51 = vld [vmem:[%s7317_s5 + $0x200] sm:$0xff]  ;;  %v2845_v32 = vld [vmem:[#allocation4 + $0x9] ss:$64 sm:$0x1] }
 0x3c5   : > { %2885 = vmatpush.msrb.mxu2 %v4632_v24  ;;  %2778 = vmatpush.msrb.mxu0 %v4599_v30  ;;  %v2525_v26 = vld [vmem:[#allocation4] ss:$64 sm:$0x2]  ;;  %v2569_v21 = vld [vmem:[#allocation4 + $0x1] ss:$64 sm:$0x80]  ;;  %v2643_v3 = vor.u32 %v2642_v60, %v2641_v49 }
 0x3c6   : > { %2832 = vmatpush.msrb.mxu1 %v4615_v39  ;;  %2940 = vmatpush.msrb.mxu3 %v4647_v18  ;;  %v2527_v5 = vld [vmem:[#allocation4] ss:$64 sm:$0x4]  ;;  %v2692_v6 = vld [vmem:[#allocation4 + $0x3] ss:$64 sm:$0x20]  ;;  %v2526_v54 = vor.u32 %v2525_v26, %v2524_v62  ;;  %v2570_v27 = vor.u32 %v2569_v21, %v2568_v55 }
 0x3c7   : > { %2886 = vmatpush.msrb.mxu2 %v4631_v12  ;;  %2779 = vmatpush.msrb.mxu0 %v4598_v1  ;;  %v4611_v46 = vld [vmem:[%s7317_s5 + $0x290] sm:$0xff]  ;;  %v2693_v30 = vor.u32 %v2692_v6, %v2691_v9  ;;  %v4625_v14 = vld [vmem:[%s7317_s5 + $0x300] sm:$0xff]  ;;  %v4642_v1 = vld [vmem:[%s7317_s5 + $0x388] sm:$0xff] }
 0x3c8   : > { %2833 = vmatpush.msrb.mxu1 %v4614_v28  ;;  %2941 = vmatpush.msrb.mxu3 %v4646_v44  ;;  %v2529_v56 = vld [vmem:[#allocation4] ss:$64 sm:$0x8]  ;;  %v2694_v24 = vld [vmem:[#allocation4 + $0x3] ss:$64 sm:$0x40]  ;;  %v2528_v59 = vor.u32 %v2527_v5, %v2526_v54 }
 0x3c9   : > { %2887 = vmatpush.msrb.mxu2 %v4630_v43  ;;  %2780 = vmatpush.msrb.mxu0 %v4597_v22  ;;  %v4643_v7 = vld [vmem:[%s7317_s5 + $0x390] sm:$0xff]  ;;  %v2695_v8 = vor.u32 %v2694_v24, %v2693_v30  ;;  %v4672_v39 = vld [vmem:[%s7317_s5 + $0x478] sm:$0xff]  ;;  %v4609_v16 = vld [vmem:[%s7317_s5 + $0x280] sm:$0xff] }
 0x3ca   : > { %2834 = vmatpush.msrb.mxu1 %v4613_v58  ;;  %2942 = vmatpush.msrb.mxu3 %v4645_v63  ;;  %v2696_v37 = vld [vmem:[#allocation4 + $0x3] ss:$64 sm:$0x80]  ;;  %v2531_v19 = vld [vmem:[#allocation4] ss:$64 sm:$0x10]  ;;  %v2530_v12 = vor.u32 %v2529_v56, %v2528_v59 }
 0x3cb   : > { %2888 = vmatpush.msrb.mxu2 %v4629_v0  ;;  %2781 = vmatpush.msrb.mxu0 %v4596_v23  ;;  %v2533_v25 = vld [vmem:[#allocation4] ss:$64 sm:$0x20]  ;;  %v2846_v4 = vld [vmem:[#allocation4 + $0x9] ss:$64 sm:$0x2]  ;;  %v2697_v57 = vor.u32 %v2696_v37, %v2695_v8 }
 0x3cc   : > { %2835 = vmatpush.msrb.mxu1 %v4612_v13  ;;  %2943 = vmatpush.msrb.mxu3 %v4644_v31  ;;  %v2848_v53 = vld [vmem:[#allocation4 + $0x9] ss:$64 sm:$0x4]  ;;  %v2532_v20 = vor.u32 %v2531_v19, %v2530_v12  ;;  %v2535_v43 = vld [vmem:[#allocation4] ss:$64 sm:$0x40]  ;;  %v2847_v11 = vor.u32 %v2846_v4, %v2845_v32 }
 0x3cd   : > { %2889 = vmatpush.msrb.mxu2 %v4628_v15  ;;  %2782 = vmatpush.msrb.mxu0 %v4595_v34  ;;  %v4704_v18 = vld [vmem:[%s7317_s5 + $0x578] sm:$0xff]  ;;  %v2537_v22 = vld [vmem:[#allocation4] ss:$64 sm:$0x80]  ;;  %v4641_v50 = vld [vmem:[%s7317_s5 + $0x380] sm:$0xff] }
 0x3ce   : > { %2677 = vmatmul.f32.vlgmr.msra.gmra.mxu2 %v2643_v3  ;;  %2836 = vmatpush.msrb.mxu1 %v4611_v46  ;;  %v4671_v35 = vld [vmem:[%s7317_s5 + $0x470] sm:$0xff]  ;;  %v2850_v10 = vld [vmem:[#allocation4 + $0x9] ss:$64 sm:$0x8]  ;;  %v2534_v28 = vor.u32 %v2533_v25, %v2532_v20  ;;  %v2849_v48 = vor.u32 %v2848_v53, %v2847_v11  ;;  %v4670_v33 = vld [vmem:[%s7317_s5 + $0x468] sm:$0xff] }
 0x3cf   : > { %2890 = vmatpush.msrb.mxu2 %v4627_v2  ;;  %2783 = vmatpush.msrb.mxu0 %v4594_v61  ;;  %v4703_v0 = vld [vmem:[%s7317_s5 + $0x570] sm:$0xff]  ;;  %v4720_v44 = vld [vmem:[%s7317_s5 + $0x5f8] sm:$0xff]  ;;  %v4702_v40 = vld [vmem:[%s7317_s5 + $0x568] sm:$0xff] }
 0x3d0   : > { %2944 = vmatpush.msrb.mxu3 %v4643_v7  ;;  %2604 = vmatmul.f32.vlgmr.msra.gmra.mxu0 %v2570_v27  ;;  %v2852_v38 = vld [vmem:[#allocation4 + $0x9] ss:$64 sm:$0x10]  ;;  %v2737_v58 = vld [vmem:[#allocation4 + $0x4] ss:$64 sm:$0x1]  ;;  %v2536_v17 = vor.u32 %v2535_v43, %v2534_v28  ;;  %v2851_v45 = vor.u32 %v2850_v10, %v2849_v48 }
 0x3d1   : > { %2891 = vmatpush.msrb.mxu2 %v4626_v36  ;;  %2784 = vmatpush.msrb.mxu0 %v4593_v51  ;;  %v2854_v23 = vld [vmem:[#allocation4 + $0x9] ss:$64 sm:$0x20]  ;;  %v2738_v15 = vld [vmem:[#allocation4 + $0x4] ss:$64 sm:$0x2] }
 0x3d2   : > { %2837 = vmatpush.msrb.mxu1 %v4610_v41  ;;  %2731 = vmatmul.f32.vlgmr.msra.gmra.mxu3 %v2697_v57  ;;  %v2740_v63 = vld [vmem:[#allocation4 + $0x4] ss:$64 sm:$0x4]  ;;  %v4688_v49 = vld [vmem:[%s7317_s5 + $0x4f8] sm:$0xff]  ;;  %v2739_v47 = vor.u32 %v2738_v15, %v2737_v58  ;;  %v2538_v29 = vor.u32 %v2537_v22, %v2536_v17  ;;  %v2853_v34 = vor.u32 %v2852_v38, %v2851_v45  ;;  %v4669_v24 = vld [vmem:[%s7317_s5 + $0x460] sm:$0xff] }
 0x3d3   : > { %2892 = vmatpush.msrb.mxu2 %v4625_v14  ;;  %2945 = vmatpush.msrb.mxu3 %v4642_v1  ;;  %v2856_v60 = vld [vmem:[#allocation4 + $0x9] ss:$64 sm:$0x40]  ;;  %v4687_v13 = vld [vmem:[%s7317_s5 + $0x4f0] sm:$0xff]  ;;  %v4686_v37 = vld [vmem:[%s7317_s5 + $0x4e8] sm:$0xff] }
 0x3d4   : > { %2985 = vmatpush.msra.mxu0 %v4672_v39  ;;  %2838 = vmatpush.msrb.mxu1 %v4609_v16  ;;  %v4719_v62 = vld [vmem:[%s7317_s5 + $0x5f0] sm:$0xff]  ;;  %v2741_v31 = vor.u32 %v2740_v63, %v2739_v47  ;;  %v2899_v52 = vld [vmem:[#allocation4 + $0xa] ss:$64 sm:$0x1]  ;;  %v2855_v26 = vor.u32 %v2854_v23, %v2853_v34  ;;  %v4701_v27 = vld [vmem:[%s7317_s5 + $0x560] sm:$0xff] }
 0x3d5   : > { %3093 = vmatpush.msra.mxu2 %v4704_v18  ;;  %2946 = vmatpush.msrb.mxu3 %v4641_v50  ;;  %v2742_v2 = vld [vmem:[#allocation4 + $0x4] ss:$64 sm:$0x8]  ;;  %v2900_v5 = vld [vmem:[#allocation4 + $0xa] ss:$64 sm:$0x2] }
 0x3d6   : > { %2986 = vmatpush.msra.mxu0 %v4671_v35  ;;  %v2744_v42 = vld [vmem:[#allocation4 + $0x4] ss:$64 sm:$0x10]  ;;  %2624 = vmatmul.f32.vlgmr.msra.gmra.mxu1 %v2538_v29  ;;  %v2902_v61 = vld [vmem:[#allocation4 + $0xa] ss:$64 sm:$0x4]  ;;  %v2743_v6 = vor.u32 %v2742_v2, %v2741_v31  ;;  %v2901_v3 = vor.u32 %v2900_v5, %v2899_v52  ;;  %v2857_v46 = vor.u32 %v2856_v60, %v2855_v26 }
 0x3d7   : > { %3094 = vmatpush.msra.mxu2 %v4703_v0  ;;  %3147 = vmatpush.msra.mxu3 %v4720_v44  ;;  %v2858_v21 = vld [vmem:[#allocation4 + $0x9] ss:$64 sm:$0x80]  ;;  %v2746_v54 = vld [vmem:[#allocation4 + $0x4] ss:$64 sm:$0x20] }
 0x3d8   : > { %2987 = vmatpush.msra.mxu0 %v4670_v33  ;;  %3039 = vmatpush.msra.mxu1 %v4688_v49  ;;  %v2748_v36 = vld [vmem:[#allocation4 + $0x4] ss:$64 sm:$0x40]  ;;  %v2904_v55 = vld [vmem:[#allocation4 + $0xa] ss:$64 sm:$0x8]  ;;  %v2745_v9 = vor.u32 %v2744_v42, %v2743_v6  ;;  %v2903_v56 = vor.u32 %v2902_v61, %v2901_v3  ;;  %v2859_v59 = vor.u32 %v2858_v21, %v2857_v46 }
 0x3d9   : > { %3095 = vmatpush.msra.mxu2 %v4702_v40  ;;  %3148 = vmatpush.msra.mxu3 %v4719_v62  ;;  %v2906_v7 = vld [vmem:[#allocation4 + $0xa] ss:$64 sm:$0x10]  ;;  %v4718_v30 = vld [vmem:[%s7317_s5 + $0x5e8] sm:$0xff]  ;;  %v4685_v11 = vld [vmem:[%s7317_s5 + $0x4e0] sm:$0xff] }
 0x3da   : > { %3040 = vmatpush.msra.mxu1 %v4687_v13  ;;  %2988 = vmatpush.msra.mxu0 %v4669_v24  ;;  %v2791_v51 = vld [vmem:[#allocation4 + $0x8] ss:$64 sm:$0x1]  ;;  %v2747_v41 = vor.u32 %v2746_v54, %v2745_v9  ;;  %v2905_v19 = vor.u32 %v2904_v55, %v2903_v56  ;;  %v2750_v25 = vld [vmem:[#allocation4 + $0x4] ss:$64 sm:$0x80] }
 0x3db   : > { %3096 = vmatpush.msra.mxu2 %v4701_v27  ;;  %v2792_v14 = vld [vmem:[#allocation4 + $0x8] ss:$64 sm:$0x2]  ;;  %v2908_v32 = vld [vmem:[#allocation4 + $0xa] ss:$64 sm:$0x20]  ;;  %3149 = vmatpush.msra.mxu3 %v4718_v30 }
 0x3dc   : > { %3041 = vmatpush.msra.mxu1 %v4686_v37  ;;  %v2794_v12 = vld [vmem:[#allocation4 + $0x8] ss:$64 sm:$0x4]  ;;  %2893 = vmatmul.f32.vlgmr.msrb.gmra.mxu2 %v2859_v59  ;;  %v2793_v8 = vor.u32 %v2792_v14, %v2791_v51  ;;  %v2749_v1 = vor.u32 %v2748_v36, %v2747_v41  ;;  %v2907_v39 = vor.u32 %v2906_v7, %v2905_v19  ;;  %v2910_v4 = vld [vmem:[#allocation4 + $0xa] ss:$64 sm:$0x40] }
 0x3dd   : > { %v2796_v53 = vld [vmem:[#allocation4 + $0x8] ss:$64 sm:$0x8]  ;;  %v2912_v20 = vld [vmem:[#allocation4 + $0xa] ss:$64 sm:$0x80] }
 0x3de   : > { %v2795_v43 = vor.u32 %v2794_v12, %v2793_v8  ;;  %v2798_v18 = vld [vmem:[#allocation4 + $0x8] ss:$64 sm:$0x10]  ;;  %v2751_v57 = vor.u32 %v2750_v25, %v2749_v1  ;;  %v2909_v22 = vor.u32 %v2908_v32, %v2907_v39  ;;  %3042 = vmatpush.msra.mxu1 %v4685_v11  ;;  %v4717_v10 = vld [vmem:[%s7317_s5 + $0x5e0] sm:$0xff]  ;;  %v4667_v28 = vld [vmem:[%s7317_s5 + $0x450] sm:$0xff] }
 0x3df   : > { %v4668_v16 = vld [vmem:[%s7317_s5 + $0x458] sm:$0xff]  ;;  %3150 = vmatpush.msra.mxu3 %v4717_v10  ;;  %v4699_v48 = vld [vmem:[%s7317_s5 + $0x550] sm:$0xff]  ;;  %v4666_v58 = vld [vmem:[%s7317_s5 + $0x448] sm:$0xff] }
 0x3e0   : > { %v2800_v50 = vld [vmem:[#allocation4 + $0x8] ss:$64 sm:$0x20]  ;;  %2989 = vmatpush.msra.mxu0 %v4668_v16  ;;  %v2797_v0 = vor.u32 %v2796_v53, %v2795_v43  ;;  %v2911_v23 = vor.u32 %v2910_v4, %v2909_v22  ;;  %v4683_v17 = vld [vmem:[%s7317_s5 + $0x4d0] sm:$0xff]  ;;  %v4698_v45 = vld [vmem:[%s7317_s5 + $0x548] sm:$0xff] }
 0x3e1   : > { %v4700_v35 = vld [vmem:[%s7317_s5 + $0x558] sm:$0xff]  ;;  %2785 = vmatmul.f32.vlgmr.msrb.gmra.mxu0 %v2751_v57  ;;  %v4682_v63 = vld [vmem:[%s7317_s5 + $0x4c8] sm:$0xff]  ;;  %v4715_v33 = vld [vmem:[%s7317_s5 + $0x5d0] sm:$0xff] }
 0x3e2   : > { %3097 = vmatpush.msra.mxu2 %v4700_v35  ;;  %v4684_v44 = vld [vmem:[%s7317_s5 + $0x4d8] sm:$0xff]  ;;  %v2799_v15 = vor.u32 %v2798_v18, %v2797_v0  ;;  %2990 = vmatpush.msra.mxu0 %v4667_v28  ;;  %v2913_v49 = vor.u32 %v2912_v20, %v2911_v23  ;;  %v4665_v47 = vld [vmem:[%s7317_s5 + $0x440] sm:$0xff]  ;;  %v4714_v62 = vld [vmem:[%s7317_s5 + $0x5c8] sm:$0xff] }
 0x3e3   : > { %v4716_v38 = vld [vmem:[%s7317_s5 + $0x5d8] sm:$0xff]  ;;  %3043 = vmatpush.msra.mxu1 %v4684_v44  ;;  %v4697_v34 = vld [vmem:[%s7317_s5 + $0x540] sm:$0xff]  ;;  %v4663_v61 = vld [vmem:[%s7317_s5 + $0x430] sm:$0xff] }
 0x3e4   : > { %3098 = vmatpush.msra.mxu2 %v4699_v48  ;;  %v2802_v60 = vld [vmem:[#allocation4 + $0x8] ss:$64 sm:$0x40]  ;;  %3151 = vmatpush.msra.mxu3 %v4716_v38  ;;  %v2801_v29 = vor.u32 %v2800_v50, %v2799_v15  ;;  %v4681_v13 = vld [vmem:[%s7317_s5 + $0x4c0] sm:$0xff]  ;;  %v4695_v21 = vld [vmem:[%s7317_s5 + $0x530] sm:$0xff] }
 0x3e5   : > { %3044 = vmatpush.msra.mxu1 %v4683_v17  ;;  %2991 = vmatpush.msra.mxu0 %v4666_v58  ;;  %v2804_v40 = vld [vmem:[#allocation4 + $0x8] ss:$64 sm:$0x80]  ;;  %v4713_v26 = vld [vmem:[%s7317_s5 + $0x5c0] sm:$0xff]  ;;  %v4679_v54 = vld [vmem:[%s7317_s5 + $0x4b0] sm:$0xff] }
 0x3e6   : > { %3099 = vmatpush.msra.mxu2 %v4698_v45  ;;  %2947 = vmatmul.f32.vlgmr.msrb.gmra.mxu3 %v2913_v49  ;;  %v4664_v2 = vld [vmem:[%s7317_s5 + $0x438] sm:$0xff]  ;;  %v2803_v31 = vor.u32 %v2802_v60, %v2801_v29  ;;  %v4662_v3 = vld [vmem:[%s7317_s5 + $0x428] sm:$0xff]  ;;  %v4711_v36 = vld [vmem:[%s7317_s5 + $0x5b0] sm:$0xff] }
 0x3e7   : > { %3045 = vmatpush.msra.mxu1 %v4682_v63  ;;  %3152 = vmatpush.msra.mxu3 %v4715_v33  ;;  %v4696_v42 = vld [vmem:[%s7317_s5 + $0x538] sm:$0xff]  ;;  %v4694_v46 = vld [vmem:[%s7317_s5 + $0x528] sm:$0xff]  ;;  %v4661_v55 = vld [vmem:[%s7317_s5 + $0x420] sm:$0xff] }
 0x3e8   : > { %2992 = vmatpush.msra.mxu0 %v4665_v47  ;;  %v4680_v52 = vld [vmem:[%s7317_s5 + $0x4b8] sm:$0xff]  ;;  %3100 = vmatpush.msra.mxu2 %v4697_v34  ;;  %v2805_v5 = vor.u32 %v2804_v40, %v2803_v31  ;;  %v4678_v9 = vld [vmem:[%s7317_s5 + $0x4a8] sm:$0xff]  ;;  %v4693_v56 = vld [vmem:[%s7317_s5 + $0x520] sm:$0xff] }
 0x3e9   : > { %3046 = vmatpush.msra.mxu1 %v4681_v13  ;;  %3153 = vmatpush.msra.mxu3 %v4714_v62  ;;  %v4712_v6 = vld [vmem:[%s7317_s5 + $0x5b8] sm:$0xff]  ;;  %v4710_v7 = vld [vmem:[%s7317_s5 + $0x5a8] sm:$0xff]  ;;  %v4677_v37 = vld [vmem:[%s7317_s5 + $0x4a0] sm:$0xff] }
 0x3ea   : > { %2993 = vmatpush.msra.mxu0 %v4664_v2  ;;  %3101 = vmatpush.msra.mxu2 %v4696_v42  ;;  %v4660_v24 = vld [vmem:[%s7317_s5 + $0x418] sm:$0xff]  ;;  %v4709_v27 = vld [vmem:[%s7317_s5 + $0x5a0] sm:$0xff]  ;;  %v4659_v30 = vld [vmem:[%s7317_s5 + $0x410] sm:$0xff] }
 0x3eb   : > { %3047 = vmatpush.msra.mxu1 %v4680_v52  ;;  %3154 = vmatpush.msra.mxu3 %v4713_v26  ;;  %v4692_v59 = vld [vmem:[%s7317_s5 + $0x518] sm:$0xff]  ;;  %v4691_v41 = vld [vmem:[%s7317_s5 + $0x510] sm:$0xff]  ;;  %v4658_v32 = vld [vmem:[%s7317_s5 + $0x408] sm:$0xff] }
 0x3ec   : > { %2839 = vmatmul.f32.vlgmr.msrb.gmra.mxu1 %v2805_v5  ;;  %2994 = vmatpush.msra.mxu0 %v4663_v61  ;;  %v4676_v51 = vld [vmem:[%s7317_s5 + $0x498] sm:$0xff]  ;;  %v4675_v8 = vld [vmem:[%s7317_s5 + $0x490] sm:$0xff]  ;;  %v4690_v1 = vld [vmem:[%s7317_s5 + $0x508] sm:$0xff] }
 0x3ed   : > { %3102 = vmatpush.msra.mxu2 %v4695_v21  ;;  %3155 = vmatpush.msra.mxu3 %v4712_v6  ;;  %v2953_v19 = vld [vmem:[#allocation4 + $0xb] ss:$64 sm:$0x1]  ;;  %v4707_v4 = vld [vmem:[%s7317_s5 + $0x590] sm:$0xff]  ;;  %v4674_v53 = vld [vmem:[%s7317_s5 + $0x488] sm:$0xff] }
 0x3ee   : > { %3048 = vmatpush.msra.mxu1 %v4679_v54  ;;  %2995 = vmatpush.msra.mxu0 %v4662_v3  ;;  %v4708_v14 = vld [vmem:[%s7317_s5 + $0x598] sm:$0xff]  ;;  %v4657_v43 = vld [vmem:[%s7317_s5 + $0x400] sm:$0xff]  ;;  %v4706_v35 = vld [vmem:[%s7317_s5 + $0x588] sm:$0xff] }
 0x3ef   : > { %3103 = vmatpush.msra.mxu2 %v4694_v46  ;;  %3156 = vmatpush.msra.mxu3 %v4711_v36  ;;  %v2954_v12 = vld [vmem:[#allocation4 + $0xb] ss:$64 sm:$0x2]  ;;  %v4689_v18 = vld [vmem:[%s7317_s5 + $0x500] sm:$0xff]  ;;  %v4735_v60 = vld [vmem:[%s7317_s5 + $0x670] sm:$0xff] }
 0x3f0   : > { %3049 = vmatpush.msra.mxu1 %v4678_v9  ;;  %2996 = vmatpush.msra.mxu0 %v4661_v55  ;;  %v2956_v25 = vld [vmem:[#allocation4 + $0xb] ss:$64 sm:$0x4]  ;;  %v2955_v39 = vor.u32 %v2954_v12, %v2953_v19  ;;  %v3061_v57 = vld [vmem:[#allocation4 + $0x10] ss:$64 sm:$0x1] }
 0x3f1   : > { %3104 = vmatpush.msra.mxu2 %v4693_v56  ;;  %3157 = vmatpush.msra.mxu3 %v4710_v7  ;;  %v2958_v20 = vld [vmem:[#allocation4 + $0xb] ss:$64 sm:$0x8]  ;;  %v3062_v22 = vld [vmem:[#allocation4 + $0x10] ss:$64 sm:$0x2] }
 0x3f2   : > { %3050 = vmatpush.msra.mxu1 %v4677_v37  ;;  %2997 = vmatpush.msra.mxu0 %v4660_v24  ;;  %v2957_v16 = vor.u32 %v2956_v25, %v2955_v39  ;;  %v2960_v11 = vld [vmem:[#allocation4 + $0xb] ss:$64 sm:$0x10]  ;;  %v3064_v50 = vld [vmem:[#allocation4 + $0x10] ss:$64 sm:$0x4]  ;;  %v3063_v0 = vor.u32 %v3062_v22, %v3061_v57 }
 0x3f3   : > { %3105 = vmatpush.msra.mxu2 %v4692_v59  ;;  %3158 = vmatpush.msra.mxu3 %v4709_v27  ;;  %v2962_v28 = vld [vmem:[#allocation4 + $0xb] ss:$64 sm:$0x20]  ;;  %v3066_v38 = vld [vmem:[#allocation4 + $0x10] ss:$64 sm:$0x8] }
 0x3f4   : > { %3051 = vmatpush.msra.mxu1 %v4676_v51  ;;  %2998 = vmatpush.msra.mxu0 %v4659_v30  ;;  %v2959_v10 = vor.u32 %v2958_v20, %v2957_v16  ;;  %v4736_v44 = vld [vmem:[%s7317_s5 + $0x678] sm:$0xff]  ;;  %v3065_v58 = vor.u32 %v3064_v50, %v3063_v0  ;;  %v3068_v17 = vld [vmem:[#allocation4 + $0x10] ss:$64 sm:$0x10]  ;;  %v4767_v51 = vld [vmem:[%s7317_s5 + $0x770] sm:$0xff] }
 0x3f5   : > { %3106 = vmatpush.msra.mxu2 %v4691_v41  ;;  %3159 = vmatpush.msra.mxu3 %v4708_v14  ;;  %v2964_v48 = vld [vmem:[#allocation4 + $0xb] ss:$64 sm:$0x40]  ;;  %v4673_v15 = vld [vmem:[%s7317_s5 + $0x480] sm:$0xff]  ;;  %v4734_v25 = vld [vmem:[%s7317_s5 + $0x668] sm:$0xff] }
 0x3f6   : > { %3052 = vmatpush.msra.mxu1 %v4675_v8  ;;  %2999 = vmatpush.msra.mxu0 %v4658_v32  ;;  %v2961_v23 = vor.u32 %v2960_v11, %v2959_v10  ;;  %v4768_v45 = vld [vmem:[%s7317_s5 + $0x778] sm:$0xff]  ;;  %v4705_v63 = vld [vmem:[%s7317_s5 + $0x580] sm:$0xff]  ;;  %v3067_v47 = vor.u32 %v3066_v38, %v3065_v58  ;;  %v4751_v32 = vld [vmem:[%s7317_s5 + $0x6f0] sm:$0xff] }
 0x3f7   : > { %3107 = vmatpush.msra.mxu2 %v4690_v1  ;;  %3160 = vmatpush.msra.mxu3 %v4707_v4  ;;  %v3007_v49 = vld [vmem:[#allocation4 + $0xc] ss:$64 sm:$0x1]  ;;  %v2966_v13 = vld [vmem:[#allocation4 + $0xb] ss:$64 sm:$0x80] }
 0x3f8   : > { %3053 = vmatpush.msra.mxu1 %v4674_v53  ;;  %3000 = vmatpush.msra.mxu0 %v4657_v43  ;;  %v2963_v33 = vor.u32 %v2962_v28, %v2961_v23  ;;  %v3008_v29 = vld [vmem:[#allocation4 + $0xc] ss:$64 sm:$0x2]  ;;  %v3070_v40 = vld [vmem:[#allocation4 + $0x10] ss:$64 sm:$0x20]  ;;  %v3069_v31 = vor.u32 %v3068_v17, %v3067_v47 }
 0x3f9   : > { %3108 = vmatpush.msra.mxu2 %v4689_v18  ;;  %3161 = vmatpush.msra.mxu3 %v4706_v35  ;;  %v3010_v34 = vld [vmem:[#allocation4 + $0xc] ss:$64 sm:$0x4]  ;;  %v3009_v62 = vor.u32 %v3008_v29, %v3007_v49  ;;  %v3072_v42 = vld [vmem:[#allocation4 + $0x10] ss:$64 sm:$0x40] }
 0x3fa   : > { %3201 = vmatpush.msrb.mxu0 %v4736_v44  ;;  %3054 = vmatpush.msra.mxu1 %v4673_v15  ;;  %v2965_v2 = vor.u32 %v2964_v48, %v2963_v33  ;;  %v3012_v52 = vld [vmem:[#allocation4 + $0xc] ss:$64 sm:$0x8]  ;;  %v3115_v61 = vld [vmem:[#allocation4 + $0x11] ss:$64 sm:$0x1]  ;;  %v3071_v6 = vor.u32 %v3070_v40, %v3069_v31 }
 0x3fb   : > { %3309 = vmatpush.msrb.mxu2 %v4768_v45  ;;  %3162 = vmatpush.msra.mxu3 %v4705_v63  ;;  %v3011_v26 = vor.u32 %v3010_v34, %v3009_v62  ;;  %v3014_v5 = vld [vmem:[#allocation4 + $0xc] ss:$64 sm:$0x10]  ;;  %v3116_v54 = vld [vmem:[#allocation4 + $0x11] ss:$64 sm:$0x2] }
 0x3fc   : > { %3202 = vmatpush.msrb.mxu0 %v4735_v60  ;;  %v2967_v21 = vor.u32 %v2966_v13, %v2965_v2  ;;  %v3118_v3 = vld [vmem:[#allocation4 + $0x11] ss:$64 sm:$0x4]  ;;  %v3074_v46 = vld [vmem:[#allocation4 + $0x10] ss:$64 sm:$0x80]  ;;  %v3117_v9 = vor.u32 %v3116_v54, %v3115_v61  ;;  %v3073_v56 = vor.u32 %v3072_v42, %v3071_v6 }
 0x3fd   : > { %v3013_v36 = vor.u32 %v3012_v52, %v3011_v26  ;;  %v3016_v55 = vld [vmem:[#allocation4 + $0xc] ss:$64 sm:$0x20]  ;;  %v3120_v24 = vld [vmem:[#allocation4 + $0x11] ss:$64 sm:$0x8]  ;;  %3310 = vmatpush.msrb.mxu2 %v4767_v51 }
 0x3fe   : > { %3001 = vmatmul.f32.vlgmr.msra.gmra.mxu0 %v2967_v21  ;;  %v3018_v7 = vld [vmem:[#allocation4 + $0xc] ss:$64 sm:$0x40]  ;;  %v3119_v59 = vor.u32 %v3118_v3, %v3117_v9  ;;  %v3122_v27 = vld [vmem:[#allocation4 + $0x11] ss:$64 sm:$0x10]  ;;  %v3075_v41 = vor.u32 %v3074_v46, %v3073_v56 }
 0x3ff   : > { %v3015_v37 = vor.u32 %v3014_v5, %v3013_v36  ;;  %v4752_v30 = vld [vmem:[%s7317_s5 + $0x6f8] sm:$0xff]  ;;  %v3124_v14 = vld [vmem:[#allocation4 + $0x11] ss:$64 sm:$0x20]  ;;  %3203 = vmatpush.msrb.mxu0 %v4734_v25  ;;  %v4766_v39 = vld [vmem:[%s7317_s5 + $0x768] sm:$0xff] }
 0x400   : > { %v3020_v19 = vld [vmem:[#allocation4 + $0xc] ss:$64 sm:$0x80]  ;;  %3255 = vmatpush.msrb.mxu1 %v4752_v30  ;;  %v3121_v1 = vor.u32 %v3120_v24, %v3119_v59  ;;  %v4783_v4 = vld [vmem:[%s7317_s5 + $0x7f0] sm:$0xff]  ;;  %v4733_v53 = vld [vmem:[%s7317_s5 + $0x660] sm:$0xff]  ;;  %3109 = vmatmul.f32.vlgmr.msra.gmra.mxu2 %v3075_v41 }
 0x401   : > { %v4784_v12 = vld [vmem:[%s7317_s5 + $0x7f8] sm:$0xff]  ;;  %v3017_v8 = vor.u32 %v3016_v55, %v3015_v37  ;;  %v4750_v20 = vld [vmem:[%s7317_s5 + $0x6e8] sm:$0xff]  ;;  %v4765_v43 = vld [vmem:[%s7317_s5 + $0x760] sm:$0xff]  ;;  %3311 = vmatpush.msrb.mxu2 %v4766_v39  ;;  %3204 = vmatpush.msrb.mxu0 %v4733_v53 }
 0x402   : > { %3363 = vmatpush.msrb.mxu3 %v4784_v12  ;;  %3256 = vmatpush.msrb.mxu1 %v4751_v32  ;;  %v4782_v18 = vld [vmem:[%s7317_s5 + $0x7e8] sm:$0xff]  ;;  %v3123_v11 = vor.u32 %v3122_v27, %v3121_v1  ;;  %v4732_v57 = vld [vmem:[%s7317_s5 + $0x658] sm:$0xff]  ;;  %v4749_v22 = vld [vmem:[%s7317_s5 + $0x6e0] sm:$0xff] }
 0x403   : > { %v3019_v16 = vor.u32 %v3018_v7, %v3017_v8  ;;  %v3126_v50 = vld [vmem:[#allocation4 + $0x11] ss:$64 sm:$0x40]  ;;  %v4764_v35 = vld [vmem:[%s7317_s5 + $0x758] sm:$0xff]  ;;  %3312 = vmatpush.msrb.mxu2 %v4765_v43  ;;  %v4731_v44 = vld [vmem:[%s7317_s5 + $0x650] sm:$0xff]  ;;  %3205 = vmatpush.msrb.mxu0 %v4732_v57 }
 0x404   : > { %3364 = vmatpush.msrb.mxu3 %v4783_v4  ;;  %3257 = vmatpush.msrb.mxu1 %v4750_v20  ;;  %v3125_v28 = vor.u32 %v3124_v14, %v3123_v11  ;;  %v4781_v0 = vld [vmem:[%s7317_s5 + $0x7e0] sm:$0xff]  ;;  %v4748_v38 = vld [vmem:[%s7317_s5 + $0x6d8] sm:$0xff]  ;;  %v4763_v23 = vld [vmem:[%s7317_s5 + $0x750] sm:$0xff] }
 0x405   : > { %v3021_v10 = vor.u32 %v3020_v19, %v3019_v16  ;;  %v3128_v48 = vld [vmem:[#allocation4 + $0x11] ss:$64 sm:$0x80]  ;;  %3313 = vmatpush.msrb.mxu2 %v4764_v35  ;;  %v4780_v17 = vld [vmem:[%s7317_s5 + $0x7d8] sm:$0xff]  ;;  %v4730_v45 = vld [vmem:[%s7317_s5 + $0x648] sm:$0xff]  ;;  %3206 = vmatpush.msrb.mxu0 %v4731_v44 }
 0x406   : > { %3365 = vmatpush.msrb.mxu3 %v4782_v18  ;;  %3258 = vmatpush.msrb.mxu1 %v4749_v22  ;;  %v3127_v58 = vor.u32 %v3126_v50, %v3125_v28  ;;  %v4747_v15 = vld [vmem:[%s7317_s5 + $0x6d0] sm:$0xff]  ;;  %v4762_v49 = vld [vmem:[%s7317_s5 + $0x748] sm:$0xff]  ;;  %v4729_v33 = vld [vmem:[%s7317_s5 + $0x640] sm:$0xff] }
 0x407   : > { %3055 = vmatmul.f32.vlgmr.msra.gmra.mxu1 %v3021_v10  ;;  %3314 = vmatpush.msrb.mxu2 %v4763_v23  ;;  %v4779_v60 = vld [vmem:[%s7317_s5 + $0x7d0] sm:$0xff]  ;;  %v4746_v47 = vld [vmem:[%s7317_s5 + $0x6c8] sm:$0xff]  ;;  %v4761_v29 = vld [vmem:[%s7317_s5 + $0x740] sm:$0xff] }
 0x408   : > { %3366 = vmatpush.msrb.mxu3 %v4781_v0  ;;  %v3129_v63 = vor.u32 %v3128_v48, %v3127_v58  ;;  %3259 = vmatpush.msrb.mxu1 %v4748_v38  ;;  %v4778_v34 = vld [vmem:[%s7317_s5 + $0x7c8] sm:$0xff]  ;;  %v4728_v13 = vld [vmem:[%s7317_s5 + $0x638] sm:$0xff]  ;;  %v4745_v40 = vld [vmem:[%s7317_s5 + $0x6c0] sm:$0xff] }
 0x409   : > { %3207 = vmatpush.msrb.mxu0 %v4730_v45  ;;  %3315 = vmatpush.msrb.mxu2 %v4762_v49  ;;  %v4760_v62 = vld [vmem:[%s7317_s5 + $0x738] sm:$0xff]  ;;  %v4777_v2 = vld [vmem:[%s7317_s5 + $0x7c0] sm:$0xff]  ;;  %v4727_v31 = vld [vmem:[%s7317_s5 + $0x630] sm:$0xff] }
 0x40a   : > { %3367 = vmatpush.msrb.mxu3 %v4780_v17  ;;  %3260 = vmatpush.msrb.mxu1 %v4747_v15  ;;  %v4744_v42 = vld [vmem:[%s7317_s5 + $0x6b8] sm:$0xff]  ;;  %v4759_v52 = vld [vmem:[%s7317_s5 + $0x730] sm:$0xff]  ;;  %v4726_v5 = vld [vmem:[%s7317_s5 + $0x628] sm:$0xff] }
 0x40b   : > { %3163 = vmatmul.f32.vlgmr.msra.gmra.mxu3 %v3129_v63  ;;  %3208 = vmatpush.msrb.mxu0 %v4729_v33  ;;  %v4776_v26 = vld [vmem:[%s7317_s5 + $0x7b8] sm:$0xff]  ;;  %v4743_v61 = vld [vmem:[%s7317_s5 + $0x6b0] sm:$0xff]  ;;  %v4758_v21 = vld [vmem:[%s7317_s5 + $0x728] sm:$0xff] }
 0x40c   : > { %3368 = vmatpush.msrb.mxu3 %v4779_v60  ;;  %3261 = vmatpush.msrb.mxu1 %v4746_v47  ;;  %v4775_v6 = vld [vmem:[%s7317_s5 + $0x7b0] sm:$0xff]  ;;  %v4725_v54 = vld [vmem:[%s7317_s5 + $0x620] sm:$0xff]  ;;  %v4742_v3 = vld [vmem:[%s7317_s5 + $0x6a8] sm:$0xff] }
 0x40d   : > { %3316 = vmatpush.msrb.mxu2 %v4761_v29  ;;  %3209 = vmatpush.msrb.mxu0 %v4728_v13  ;;  %v4757_v46 = vld [vmem:[%s7317_s5 + $0x720] sm:$0xff]  ;;  %v4774_v36 = vld [vmem:[%s7317_s5 + $0x7a8] sm:$0xff]  ;;  %v4724_v55 = vld [vmem:[%s7317_s5 + $0x618] sm:$0xff] }
 0x40e   : > { %3369 = vmatpush.msrb.mxu3 %v4778_v34  ;;  %3262 = vmatpush.msrb.mxu1 %v4745_v40  ;;  %v4741_v9 = vld [vmem:[%s7317_s5 + $0x6a0] sm:$0xff]  ;;  %v4756_v56 = vld [vmem:[%s7317_s5 + $0x718] sm:$0xff]  ;;  %v4723_v59 = vld [vmem:[%s7317_s5 + $0x610] sm:$0xff] }
 0x40f   : > { %3317 = vmatpush.msrb.mxu2 %v4760_v62  ;;  %3210 = vmatpush.msrb.mxu0 %v4727_v31  ;;  %v4773_v7 = vld [vmem:[%s7317_s5 + $0x7a0] sm:$0xff]  ;;  %v4740_v27 = vld [vmem:[%s7317_s5 + $0x698] sm:$0xff]  ;;  %v4755_v41 = vld [vmem:[%s7317_s5 + $0x710] sm:$0xff] }
 0x410   : > { %3370 = vmatpush.msrb.mxu3 %v4777_v2  ;;  %3263 = vmatpush.msrb.mxu1 %v4744_v42  ;;  %v3169_v24 = vld [vmem:[#allocation4 + $0x12] ss:$64 sm:$0x1]  ;;  %v4772_v19 = vld [vmem:[%s7317_s5 + $0x798] sm:$0xff]  ;;  %v4722_v12 = vld [vmem:[%s7317_s5 + $0x608] sm:$0xff] }
 0x411   : > { %3318 = vmatpush.msrb.mxu2 %v4759_v52  ;;  %3211 = vmatpush.msrb.mxu0 %v4726_v5  ;;  %v3170_v37 = vld [vmem:[#allocation4 + $0x12] ss:$64 sm:$0x2]  ;;  %v4739_v25 = vld [vmem:[%s7317_s5 + $0x690] sm:$0xff]  ;;  %v4754_v1 = vld [vmem:[%s7317_s5 + $0x708] sm:$0xff] }
 0x412   : > { %3371 = vmatpush.msrb.mxu3 %v4776_v26  ;;  %3264 = vmatpush.msrb.mxu1 %v4743_v61  ;;  %v3171_v30 = vor.u32 %v3170_v37, %v3169_v24  ;;  %v3172_v51 = vld [vmem:[#allocation4 + $0x12] ss:$64 sm:$0x4]  ;;  %v4771_v39 = vld [vmem:[%s7317_s5 + $0x790] sm:$0xff]  ;;  %v4738_v43 = vld [vmem:[%s7317_s5 + $0x688] sm:$0xff] }
 0x413   : > { %3319 = vmatpush.msrb.mxu2 %v4758_v21  ;;  %3212 = vmatpush.msrb.mxu0 %v4725_v54  ;;  %v3174_v14 = vld [vmem:[#allocation4 + $0x12] ss:$64 sm:$0x8]  ;;  %v3277_v4 = vld [vmem:[#allocation4 + $0x14] ss:$64 sm:$0x1] }
 0x414   : > { %3372 = vmatpush.msrb.mxu3 %v4775_v6  ;;  %3265 = vmatpush.msrb.mxu1 %v4742_v3  ;;  %v3173_v32 = vor.u32 %v3172_v51, %v3171_v30  ;;  %v3176_v8 = vld [vmem:[#allocation4 + $0x12] ss:$64 sm:$0x10]  ;;  %v3278_v53 = vld [vmem:[#allocation4 + $0x14] ss:$64 sm:$0x2] }
 0x415   : > { %3320 = vmatpush.msrb.mxu2 %v4757_v46  ;;  %3213 = vmatpush.msrb.mxu0 %v4724_v55  ;;  %v4721_v20 = vld [vmem:[%s7317_s5 + $0x600] sm:$0xff]  ;;  %v3279_v16 = vor.u32 %v3278_v53, %v3277_v4  ;;  %v4770_v22 = vld [vmem:[%s7317_s5 + $0x788] sm:$0xff]  ;;  %v4800_v23 = vld [vmem:[%s7317_s5 + $0x878] sm:$0xff] }
 0x416   : > { %3373 = vmatpush.msrb.mxu3 %v4774_v36  ;;  %3266 = vmatpush.msrb.mxu1 %v4741_v9  ;;  %v3175_v18 = vor.u32 %v3174_v14, %v3173_v32  ;;  %v3280_v11 = vld [vmem:[#allocation4 + $0x14] ss:$64 sm:$0x4]  ;;  %v3178_v50 = vld [vmem:[#allocation4 + $0x12] ss:$64 sm:$0x20] }
 0x417   : > { %3321 = vmatpush.msrb.mxu2 %v4756_v56  ;;  %3214 = vmatpush.msrb.mxu0 %v4723_v59  ;;  %v4753_v57 = vld [vmem:[%s7317_s5 + $0x700] sm:$0xff]  ;;  %v3281_v0 = vor.u32 %v3280_v11, %v3279_v16  ;;  %v4832_v58 = vld [vmem:[%s7317_s5 + $0x978] sm:$0xff]  ;;  %v4799_v40 = vld [vmem:[%s7317_s5 + $0x870] sm:$0xff] }
 0x418   : > { %3374 = vmatpush.msrb.mxu3 %v4773_v7  ;;  %3267 = vmatpush.msrb.mxu1 %v4740_v27  ;;  %v3282_v35 = vld [vmem:[#allocation4 + $0x14] ss:$64 sm:$0x8]  ;;  %v3177_v10 = vor.u32 %v3176_v8, %v3175_v18  ;;  %v3180_v28 = vld [vmem:[#allocation4 + $0x12] ss:$64 sm:$0x40] }
 0x419   : > { %3322 = vmatpush.msrb.mxu2 %v4755_v41  ;;  %v3284_v44 = vld [vmem:[#allocation4 + $0x14] ss:$64 sm:$0x10]  ;;  %3215 = vmatpush.msrb.mxu0 %v4722_v12  ;;  %v3182_v48 = vld [vmem:[#allocation4 + $0x12] ss:$64 sm:$0x80]  ;;  %v3283_v45 = vor.u32 %v3282_v35, %v3281_v0 }
 0x41a   : > { %3375 = vmatpush.msrb.mxu3 %v4772_v19  ;;  %3268 = vmatpush.msrb.mxu1 %v4739_v25  ;;  %v3286_v38 = vld [vmem:[#allocation4 + $0x14] ss:$64 sm:$0x20]  ;;  %v3179_v17 = vor.u32 %v3178_v50, %v3177_v10  ;;  %v3223_v49 = vld [vmem:[#allocation4 + $0x13] ss:$64 sm:$0x1] }
 0x41b   : > { %3323 = vmatpush.msrb.mxu2 %v4754_v1  ;;  %v4737_v15 = vld [vmem:[%s7317_s5 + $0x680] sm:$0xff]  ;;  %3216 = vmatpush.msrb.mxu0 %v4721_v20  ;;  %v3285_v29 = vor.u32 %v3284_v44, %v3283_v45  ;;  %v3331_v5 = vld [vmem:[#allocation4 + $0x18] ss:$64 sm:$0x1]  ;;  %v4816_v37 = vld [vmem:[%s7317_s5 + $0x8f8] sm:$0xff] }
 0x41c   : > { %3376 = vmatpush.msrb.mxu3 %v4771_v39  ;;  %v4769_v63 = vld [vmem:[%s7317_s5 + $0x780] sm:$0xff]  ;;  %3269 = vmatpush.msrb.mxu1 %v4738_v43  ;;  %v3181_v47 = vor.u32 %v3180_v28, %v3179_v17  ;;  %v3332_v61 = vld [vmem:[#allocation4 + $0x18] ss:$64 sm:$0x2]  ;;  %v4831_v59 = vld [vmem:[%s7317_s5 + $0x970] sm:$0xff] }
 0x41d   : > { %v3224_v60 = vld [vmem:[#allocation4 + $0x13] ss:$64 sm:$0x2]  ;;  %3324 = vmatpush.msrb.mxu2 %v4753_v57  ;;  %v3288_v34 = vld [vmem:[#allocation4 + $0x14] ss:$64 sm:$0x40]  ;;  %3417 = vmatpush.msra.mxu0 %v4800_v23  ;;  %v3287_v42 = vor.u32 %v3286_v38, %v3285_v29  ;;  %v3333_v46 = vor.u32 %v3332_v61, %v3331_v5 }
 0x41e   : > { %v3226_v33 = vld [vmem:[#allocation4 + $0x13] ss:$64 sm:$0x4]  ;;  %3377 = vmatpush.msrb.mxu3 %v4770_v22  ;;  %v3225_v13 = vor.u32 %v3224_v60, %v3223_v49  ;;  %v3290_v62 = vld [vmem:[#allocation4 + $0x14] ss:$64 sm:$0x80]  ;;  %v3183_v31 = vor.u32 %v3182_v48, %v3181_v47  ;;  %3270 = vmatpush.msrb.mxu1 %v4737_v15 }
 0x41f   : > { %3525 = vmatpush.msra.mxu2 %v4832_v58  ;;  %v3228_v2 = vld [vmem:[#allocation4 + $0x13] ss:$64 sm:$0x8]  ;;  %v3334_v21 = vld [vmem:[#allocation4 + $0x18] ss:$64 sm:$0x4]  ;;  %3418 = vmatpush.msra.mxu0 %v4799_v40  ;;  %v3289_v6 = vor.u32 %v3288_v34, %v3287_v42 }
 0x420   : > { %3378 = vmatpush.msrb.mxu3 %v4769_v63  ;;  %v3227_v52 = vor.u32 %v3226_v33, %v3225_v13  ;;  %v3230_v26 = vld [vmem:[#allocation4 + $0x13] ss:$64 sm:$0x10]  ;;  %3217 = vmatmul.f32.vlgmr.msrb.gmra.mxu0 %v3183_v31  ;;  %v3336_v55 = vld [vmem:[#allocation4 + $0x18] ss:$64 sm:$0x8]  ;;  %v3335_v7 = vor.u32 %v3334_v21, %v3333_v46 }
 0x421   : > { %v3232_v3 = vld [vmem:[#allocation4 + $0x13] ss:$64 sm:$0x20]  ;;  %v3291_v9 = vor.u32 %v3290_v62, %v3289_v6  ;;  %v3338_v24 = vld [vmem:[#allocation4 + $0x18] ss:$64 sm:$0x10]  ;;  %3471 = vmatpush.msra.mxu1 %v4816_v37  ;;  %3526 = vmatpush.msra.mxu2 %v4831_v59 }
 0x422   : > { %v3229_v54 = vor.u32 %v3228_v2, %v3227_v52  ;;  %v3234_v36 = vld [vmem:[#allocation4 + $0x13] ss:$64 sm:$0x40]  ;;  %v3340_v30 = vld [vmem:[#allocation4 + $0x18] ss:$64 sm:$0x20]  ;;  %v3337_v12 = vor.u32 %v3336_v55, %v3335_v7 }
 0x423   : > { %v3236_v27 = vld [vmem:[#allocation4 + $0x13] ss:$64 sm:$0x80]  ;;  %v4848_v51 = vld [vmem:[%s7317_s5 + $0x9f8] sm:$0xff]  ;;  %v4798_v41 = vld [vmem:[%s7317_s5 + $0x868] sm:$0xff]  ;;  %3325 = vmatmul.f32.vlgmr.msrb.gmra.mxu2 %v3291_v9 }
 0x424   : > { %v3231_v56 = vor.u32 %v3230_v26, %v3229_v54  ;;  %v4815_v19 = vld [vmem:[%s7317_s5 + $0x8f0] sm:$0xff]  ;;  %3579 = vmatpush.msra.mxu3 %v4848_v51  ;;  %v4830_v25 = vld [vmem:[%s7317_s5 + $0x968] sm:$0xff]  ;;  %v4797_v8 = vld [vmem:[%s7317_s5 + $0x860] sm:$0xff]  ;;  %3419 = vmatpush.msra.mxu0 %v4798_v41  ;;  %v3339_v20 = vor.u32 %v3338_v24, %v3337_v12 }
 0x425   : > { %v4847_v32 = vld [vmem:[%s7317_s5 + $0x9f0] sm:$0xff]  ;;  %3472 = vmatpush.msra.mxu1 %v4815_v19  ;;  %v4814_v1 = vld [vmem:[%s7317_s5 + $0x8e8] sm:$0xff]  ;;  %v4829_v39 = vld [vmem:[%s7317_s5 + $0x960] sm:$0xff]  ;;  %3527 = vmatpush.msra.mxu2 %v4830_v25 }
 0x426   : > { %v3233_v14 = vor.u32 %v3232_v3, %v3231_v56  ;;  %v4846_v4 = vld [vmem:[%s7317_s5 + $0x9e8] sm:$0xff]  ;;  %3580 = vmatpush.msra.mxu3 %v4847_v32  ;;  %v4796_v43 = vld [vmem:[%s7317_s5 + $0x858] sm:$0xff]  ;;  %v4813_v18 = vld [vmem:[%s7317_s5 + $0x8e0] sm:$0xff]  ;;  %3420 = vmatpush.msra.mxu0 %v4797_v8  ;;  %v3341_v22 = vor.u32 %v3340_v30, %v3339_v20 }
 0x427   : > { %v3342_v16 = vld [vmem:[#allocation4 + $0x18] ss:$64 sm:$0x40]  ;;  %3473 = vmatpush.msra.mxu1 %v4814_v1  ;;  %v4828_v11 = vld [vmem:[%s7317_s5 + $0x958] sm:$0xff]  ;;  %3528 = vmatpush.msra.mxu2 %v4829_v39  ;;  %v4845_v50 = vld [vmem:[%s7317_s5 + $0x9e0] sm:$0xff] }
 0x428   : > { %v3235_v53 = vor.u32 %v3234_v36, %v3233_v14  ;;  %3581 = vmatpush.msra.mxu3 %v4846_v4  ;;  %v4795_v35 = vld [vmem:[%s7317_s5 + $0x850] sm:$0xff]  ;;  %v3344_v10 = vld [vmem:[#allocation4 + $0x18] ss:$64 sm:$0x80]  ;;  %3421 = vmatpush.msra.mxu0 %v4796_v43  ;;  %v4812_v28 = vld [vmem:[%s7317_s5 + $0x8d8] sm:$0xff]  ;;  %v3343_v44 = vor.u32 %v3342_v16, %v3341_v22 }
 0x429   : > { %3474 = vmatpush.msra.mxu1 %v4813_v18  ;;  %v4827_v0 = vld [vmem:[%s7317_s5 + $0x950] sm:$0xff]  ;;  %3529 = vmatpush.msra.mxu2 %v4828_v11  ;;  %v4844_v48 = vld [vmem:[%s7317_s5 + $0x9d8] sm:$0xff]  ;;  %v4794_v38 = vld [vmem:[%s7317_s5 + $0x848] sm:$0xff] }
 0x42a   : > { %v3237_v57 = vor.u32 %v3236_v27, %v3235_v53  ;;  %3582 = vmatpush.msra.mxu3 %v4845_v50  ;;  %3422 = vmatpush.msra.mxu0 %v4795_v35  ;;  %v4811_v23 = vld [vmem:[%s7317_s5 + $0x8d0] sm:$0xff]  ;;  %v3345_v58 = vor.u32 %v3344_v10, %v3343_v44  ;;  %v4826_v17 = vld [vmem:[%s7317_s5 + $0x948] sm:$0xff]  ;;  %v4793_v15 = vld [vmem:[%s7317_s5 + $0x840] sm:$0xff] }
 0x42b   : > { %3475 = vmatpush.msra.mxu1 %v4812_v28  ;;  %3530 = vmatpush.msra.mxu2 %v4827_v0  ;;  %v4843_v45 = vld [vmem:[%s7317_s5 + $0x9d0] sm:$0xff]  ;;  %v4810_v63 = vld [vmem:[%s7317_s5 + $0x8c8] sm:$0xff]  ;;  %v4825_v49 = vld [vmem:[%s7317_s5 + $0x940] sm:$0xff] }
 0x42c   : > { %3271 = vmatmul.f32.vlgmr.msrb.gmra.mxu1 %v3237_v57  ;;  %3583 = vmatpush.msra.mxu3 %v4844_v48  ;;  %v4842_v60 = vld [vmem:[%s7317_s5 + $0x9c8] sm:$0xff]  ;;  %v4792_v33 = vld [vmem:[%s7317_s5 + $0x838] sm:$0xff]  ;;  %v4809_v47 = vld [vmem:[%s7317_s5 + $0x8c0] sm:$0xff] }
 0x42d   : > { %3423 = vmatpush.msra.mxu0 %v4794_v38  ;;  %3379 = vmatmul.f32.vlgmr.msrb.gmra.mxu3 %v3345_v58  ;;  %v4824_v29 = vld [vmem:[%s7317_s5 + $0x938] sm:$0xff]  ;;  %v4841_v34 = vld [vmem:[%s7317_s5 + $0x9c0] sm:$0xff]  ;;  %v4791_v13 = vld [vmem:[%s7317_s5 + $0x830] sm:$0xff] }
 0x42e   : > { %3476 = vmatpush.msra.mxu1 %v4811_v23  ;;  %3531 = vmatpush.msra.mxu2 %v4826_v17  ;;  %v4808_v40 = vld [vmem:[%s7317_s5 + $0x8b8] sm:$0xff]  ;;  %v4823_v62 = vld [vmem:[%s7317_s5 + $0x930] sm:$0xff]  ;;  %v4790_v31 = vld [vmem:[%s7317_s5 + $0x828] sm:$0xff] }
 0x42f   : > { %3584 = vmatpush.msra.mxu3 %v4843_v45  ;;  %3424 = vmatpush.msra.mxu0 %v4793_v15  ;;  %v4840_v2 = vld [vmem:[%s7317_s5 + $0x9b8] sm:$0xff]  ;;  %v4807_v42 = vld [vmem:[%s7317_s5 + $0x8b0] sm:$0xff]  ;;  %v4822_v52 = vld [vmem:[%s7317_s5 + $0x928] sm:$0xff] }
 0x430   : > { %3477 = vmatpush.msra.mxu1 %v4810_v63  ;;  %3532 = vmatpush.msra.mxu2 %v4825_v49  ;;  %v4839_v26 = vld [vmem:[%s7317_s5 + $0x9b0] sm:$0xff]  ;;  %v4789_v5 = vld [vmem:[%s7317_s5 + $0x820] sm:$0xff]  ;;  %v4806_v61 = vld [vmem:[%s7317_s5 + $0x8a8] sm:$0xff] }
 0x431   : > { %3585 = vmatpush.msra.mxu3 %v4842_v60  ;;  %3425 = vmatpush.msra.mxu0 %v4792_v33  ;;  %v4821_v21 = vld [vmem:[%s7317_s5 + $0x920] sm:$0xff]  ;;  %v4838_v6 = vld [vmem:[%s7317_s5 + $0x9a8] sm:$0xff]  ;;  %v4788_v54 = vld [vmem:[%s7317_s5 + $0x818] sm:$0xff] }
 0x432   : > { %3478 = vmatpush.msra.mxu1 %v4809_v47  ;;  %3533 = vmatpush.msra.mxu2 %v4824_v29  ;;  %v4805_v3 = vld [vmem:[%s7317_s5 + $0x8a0] sm:$0xff]  ;;  %v4820_v46 = vld [vmem:[%s7317_s5 + $0x918] sm:$0xff]  ;;  %v3385_v55 = vld [vmem:[#allocation4 + $0x19] ss:$64 sm:$0x1] }
 0x433   : > { %3586 = vmatpush.msra.mxu3 %v4841_v34  ;;  %3426 = vmatpush.msra.mxu0 %v4791_v13  ;;  %v4837_v36 = vld [vmem:[%s7317_s5 + $0x9a0] sm:$0xff]  ;;  %v3386_v9 = vld [vmem:[#allocation4 + $0x19] ss:$64 sm:$0x2]  ;;  %v4787_v56 = vld [vmem:[%s7317_s5 + $0x810] sm:$0xff] }
 0x434   : > { %3479 = vmatpush.msra.mxu1 %v4808_v40  ;;  %3534 = vmatpush.msra.mxu2 %v4823_v62  ;;  %v4804_v7 = vld [vmem:[%s7317_s5 + $0x898] sm:$0xff]  ;;  %v3387_v24 = vor.u32 %v3386_v9, %v3385_v55  ;;  %v3388_v37 = vld [vmem:[#allocation4 + $0x19] ss:$64 sm:$0x4]  ;;  %v4819_v59 = vld [vmem:[%s7317_s5 + $0x910] sm:$0xff] }
 0x435   : > { %3587 = vmatpush.msra.mxu3 %v4840_v2  ;;  %3427 = vmatpush.msra.mxu0 %v4790_v31  ;;  %v4836_v27 = vld [vmem:[%s7317_s5 + $0x998] sm:$0xff]  ;;  %v3390_v30 = vld [vmem:[#allocation4 + $0x19] ss:$64 sm:$0x8]  ;;  %v4803_v41 = vld [vmem:[%s7317_s5 + $0x890] sm:$0xff] }
 0x436   : > { %3480 = vmatpush.msra.mxu1 %v4807_v42  ;;  %3535 = vmatpush.msra.mxu2 %v4822_v52  ;;  %v4786_v51 = vld [vmem:[%s7317_s5 + $0x808] sm:$0xff]  ;;  %v3389_v19 = vor.u32 %v3388_v37, %v3387_v24  ;;  %v4835_v25 = vld [vmem:[%s7317_s5 + $0x990] sm:$0xff]  ;;  %v4785_v1 = vld [vmem:[%s7317_s5 + $0x800] sm:$0xff] }
 0x437   : > { %3588 = vmatpush.msra.mxu3 %v4839_v26  ;;  %3428 = vmatpush.msra.mxu0 %v4789_v5  ;;  %v3392_v14 = vld [vmem:[#allocation4 + $0x19] ss:$64 sm:$0x10]  ;;  %v3493_v32 = vld [vmem:[#allocation4 + $0x1b] ss:$64 sm:$0x1] }
 0x438   : > { %3481 = vmatpush.msra.mxu1 %v4806_v61  ;;  %3536 = vmatpush.msra.mxu2 %v4821_v21  ;;  %v4818_v12 = vld [vmem:[%s7317_s5 + $0x908] sm:$0xff]  ;;  %v3391_v4 = vor.u32 %v3390_v30, %v3389_v19  ;;  %v4817_v43 = vld [vmem:[%s7317_s5 + $0x900] sm:$0xff]  ;;  %v4864_v0 = vld [vmem:[%s7317_s5 + $0xa78] sm:$0xff] }
 0x439   : > { %3589 = vmatpush.msra.mxu3 %v4838_v6  ;;  %3429 = vmatpush.msra.mxu0 %v4788_v54  ;;  %v3494_v8 = vld [vmem:[#allocation4 + $0x1b] ss:$64 sm:$0x2]  ;;  %v3394_v16 = vld [vmem:[#allocation4 + $0x19] ss:$64 sm:$0x20] }
 0x43a   : > { %3482 = vmatpush.msra.mxu1 %v4805_v3  ;;  %3537 = vmatpush.msra.mxu2 %v4820_v46  ;;  %v4802_v39 = vld [vmem:[%s7317_s5 + $0x888] sm:$0xff]  ;;  %v3495_v53 = vor.u32 %v3494_v8, %v3493_v32  ;;  %v3393_v57 = vor.u32 %v3392_v14, %v3391_v4  ;;  %v4896_v44 = vld [vmem:[%s7317_s5 + $0xb78] sm:$0xff]  ;;  %v4801_v23 = vld [vmem:[%s7317_s5 + $0x880] sm:$0xff] }
 0x43b   : > { %3590 = vmatpush.msra.mxu3 %v4837_v36  ;;  %v3496_v20 = vld [vmem:[#allocation4 + $0x1b] ss:$64 sm:$0x4]  ;;  %3430 = vmatpush.msra.mxu0 %v4787_v56  ;;  %v3396_v22 = vld [vmem:[#allocation4 + $0x19] ss:$64 sm:$0x40] }
 0x43c   : > { %3483 = vmatpush.msra.mxu1 %v4804_v7  ;;  %v4834_v18 = vld [vmem:[%s7317_s5 + $0x988] sm:$0xff]  ;;  %3538 = vmatpush.msra.mxu2 %v4819_v59  ;;  %v3497_v50 = vor.u32 %v3496_v20, %v3495_v53  ;;  %v3395_v48 = vor.u32 %v3394_v16, %v3393_v57  ;;  %v4833_v58 = vld [vmem:[%s7317_s5 + $0x980] sm:$0xff]  ;;  %v4863_v47 = vld [vmem:[%s7317_s5 + $0xa70] sm:$0xff] }
 0x43d   : > { %v3498_v11 = vld [vmem:[#allocation4 + $0x1b] ss:$64 sm:$0x8]  ;;  %3591 = vmatpush.msra.mxu3 %v4836_v27  ;;  %3431 = vmatpush.msra.mxu0 %v4786_v51  ;;  %v3398_v10 = vld [vmem:[#allocation4 + $0x19] ss:$64 sm:$0x80] }
 0x43e   : > { %v3500_v35 = vld [vmem:[#allocation4 + $0x1b] ss:$64 sm:$0x10]  ;;  %3484 = vmatpush.msra.mxu1 %v4803_v41  ;;  %3539 = vmatpush.msra.mxu2 %v4818_v12  ;;  %v3499_v38 = vor.u32 %v3498_v11, %v3497_v50  ;;  %v3439_v17 = vld [vmem:[#allocation4 + $0x1a] ss:$64 sm:$0x1]  ;;  %v3397_v63 = vor.u32 %v3396_v22, %v3395_v48 }
 0x43f   : > { %v3502_v28 = vld [vmem:[#allocation4 + $0x1b] ss:$64 sm:$0x20]  ;;  %3592 = vmatpush.msra.mxu3 %v4835_v25  ;;  %3432 = vmatpush.msra.mxu0 %v4785_v1  ;;  %v3440_v45 = vld [vmem:[#allocation4 + $0x1a] ss:$64 sm:$0x2] }
 0x440   : > { %3485 = vmatpush.msra.mxu1 %v4802_v39  ;;  %v3442_v15 = vld [vmem:[#allocation4 + $0x1a] ss:$64 sm:$0x4]  ;;  %3540 = vmatpush.msra.mxu2 %v4817_v43  ;;  %v3501_v49 = vor.u32 %v3500_v35, %v3499_v38  ;;  %v3504_v60 = vld [vmem:[#allocation4 + $0x1b] ss:$64 sm:$0x40]  ;;  %v3441_v33 = vor.u32 %v3440_v45, %v3439_v17  ;;  %v3399_v13 = vor.u32 %v3398_v10, %v3397_v63 }
 0x441   : > { %3593 = vmatpush.msra.mxu3 %v4834_v18  ;;  %v3506_v29 = vld [vmem:[#allocation4 + $0x1b] ss:$64 sm:$0x80]  ;;  %3633 = vmatpush.msrb.mxu0 %v4864_v0  ;;  %v3444_v34 = vld [vmem:[#allocation4 + $0x1a] ss:$64 sm:$0x8] }
 0x442   : > { %3741 = vmatpush.msrb.mxu2 %v4896_v44  ;;  %v3503_v40 = vor.u32 %v3502_v28, %v3501_v49  ;;  %3486 = vmatpush.msra.mxu1 %v4801_v23  ;;  %v3443_v62 = vor.u32 %v3442_v15, %v3441_v33  ;;  %v3446_v2 = vld [vmem:[#allocation4 + $0x1a] ss:$64 sm:$0x10]  ;;  %v3547_v31 = vld [vmem:[#allocation4 + $0x1c] ss:$64 sm:$0x1] }
 0x443   : > { %3594 = vmatpush.msra.mxu3 %v4833_v58  ;;  %v3548_v42 = vld [vmem:[#allocation4 + $0x1c] ss:$64 sm:$0x2]  ;;  %3634 = vmatpush.msrb.mxu0 %v4863_v47  ;;  %v3448_v61 = vld [vmem:[#allocation4 + $0x1a] ss:$64 sm:$0x20] }
 0x444   : > { %v3550_v52 = vld [vmem:[#allocation4 + $0x1c] ss:$64 sm:$0x4]  ;;  %3433 = vmatmul.f32.vlgmr.msra.gmra.mxu0 %v3399_v13  ;;  %v3505_v26 = vor.u32 %v3504_v60, %v3503_v40  ;;  %v3445_v5 = vor.u32 %v3444_v34, %v3443_v62  ;;  %v3549_v21 = vor.u32 %v3548_v42, %v3547_v31  ;;  %v3450_v6 = vld [vmem:[#allocation4 + $0x1a] ss:$64 sm:$0x40] }
 0x445   : > { %v3552_v54 = vld [vmem:[#allocation4 + $0x1c] ss:$64 sm:$0x8]  ;;  %v4880_v9 = vld [vmem:[%s7317_s5 + $0xaf8] sm:$0xff]  ;;  %v4895_v56 = vld [vmem:[%s7317_s5 + $0xb70] sm:$0xff] }
 0x446   : > { %v3507_v3 = vor.u32 %v3506_v29, %v3505_v26  ;;  %v3447_v46 = vor.u32 %v3446_v2, %v3445_v5  ;;  %v3551_v36 = vor.u32 %v3550_v52, %v3549_v21  ;;  %v3554_v55 = vld [vmem:[#allocation4 + $0x1c] ss:$64 sm:$0x10]  ;;  %v3452_v7 = vld [vmem:[#allocation4 + $0x1a] ss:$64 sm:$0x80]  ;;  %3687 = vmatpush.msrb.mxu1 %v4880_v9  ;;  %3742 = vmatpush.msrb.mxu2 %v4895_v56 }
 0x447   : > { %v3556_v24 = vld [vmem:[#allocation4 + $0x1c] ss:$64 sm:$0x20]  ;;  %v4912_v37 = vld [vmem:[%s7317_s5 + $0xbf8] sm:$0xff]  ;;  %v4879_v27 = vld [vmem:[%s7317_s5 + $0xaf0] sm:$0xff] }
 0x448   : > { %v4862_v59 = vld [vmem:[%s7317_s5 + $0xa68] sm:$0xff]  ;;  %3541 = vmatmul.f32.vlgmr.msra.gmra.mxu2 %v3507_v3  ;;  %v3449_v30 = vor.u32 %v3448_v61, %v3447_v46  ;;  %v3553_v51 = vor.u32 %v3552_v54, %v3551_v36  ;;  %3795 = vmatpush.msrb.mxu3 %v4912_v37  ;;  %v4911_v19 = vld [vmem:[%s7317_s5 + $0xbf0] sm:$0xff]  ;;  %v4861_v14 = vld [vmem:[%s7317_s5 + $0xa60] sm:$0xff] }
 0x449   : > { %v4894_v41 = vld [vmem:[%s7317_s5 + $0xb68] sm:$0xff]  ;;  %3635 = vmatpush.msrb.mxu0 %v4862_v59  ;;  %3688 = vmatpush.msrb.mxu1 %v4879_v27  ;;  %v4893_v25 = vld [vmem:[%s7317_s5 + $0xb60] sm:$0xff]  ;;  %v4860_v39 = vld [vmem:[%s7317_s5 + $0xa58] sm:$0xff] }
 0x44a   : > { %v4878_v12 = vld [vmem:[%s7317_s5 + $0xae8] sm:$0xff]  ;;  %v3451_v8 = vor.u32 %v3450_v6, %v3449_v30  ;;  %v3555_v1 = vor.u32 %v3554_v55, %v3553_v51  ;;  %3743 = vmatpush.msrb.mxu2 %v4894_v41  ;;  %3796 = vmatpush.msrb.mxu3 %v4911_v19  ;;  %v4877_v4 = vld [vmem:[%s7317_s5 + $0xae0] sm:$0xff]  ;;  %v4892_v20 = vld [vmem:[%s7317_s5 + $0xb58] sm:$0xff] }
 0x44b   : > { %v4910_v32 = vld [vmem:[%s7317_s5 + $0xbe8] sm:$0xff]  ;;  %3636 = vmatpush.msrb.mxu0 %v4861_v14  ;;  %3689 = vmatpush.msrb.mxu1 %v4878_v12  ;;  %v4909_v16 = vld [vmem:[%s7317_s5 + $0xbe0] sm:$0xff]  ;;  %v4859_v11 = vld [vmem:[%s7317_s5 + $0xa50] sm:$0xff] }
 0x44c   : > { %v3558_v53 = vld [vmem:[#allocation4 + $0x1c] ss:$64 sm:$0x40]  ;;  %v3453_v43 = vor.u32 %v3452_v7, %v3451_v8  ;;  %v3557_v18 = vor.u32 %v3556_v24, %v3555_v1  ;;  %3744 = vmatpush.msrb.mxu2 %v4893_v25  ;;  %3797 = vmatpush.msrb.mxu3 %v4910_v32  ;;  %v4876_v22 = vld [vmem:[%s7317_s5 + $0xad8] sm:$0xff]  ;;  %v4891_v50 = vld [vmem:[%s7317_s5 + $0xb50] sm:$0xff] }
 0x44d   : > { %v3560_v57 = vld [vmem:[#allocation4 + $0x1c] ss:$64 sm:$0x80]  ;;  %3637 = vmatpush.msrb.mxu0 %v4860_v39  ;;  %3690 = vmatpush.msrb.mxu1 %v4877_v4  ;;  %v4908_v10 = vld [vmem:[%s7317_s5 + $0xbd8] sm:$0xff]  ;;  %v4875_v0 = vld [vmem:[%s7317_s5 + $0xad0] sm:$0xff] }
 0x44e   : > { %3487 = vmatmul.f32.vlgmr.msra.gmra.mxu1 %v3453_v43  ;;  %v3559_v35 = vor.u32 %v3558_v53, %v3557_v18  ;;  %3745 = vmatpush.msrb.mxu2 %v4892_v20  ;;  %v4858_v28 = vld [vmem:[%s7317_s5 + $0xa48] sm:$0xff]  ;;  %v4907_v38 = vld [vmem:[%s7317_s5 + $0xbd0] sm:$0xff]  ;;  %v4857_v23 = vld [vmem:[%s7317_s5 + $0xa40] sm:$0xff] }
 0x44f   : > { %3798 = vmatpush.msrb.mxu3 %v4909_v16  ;;  %3638 = vmatpush.msrb.mxu0 %v4859_v11  ;;  %v4890_v48 = vld [vmem:[%s7317_s5 + $0xb48] sm:$0xff]  ;;  %v4889_v17 = vld [vmem:[%s7317_s5 + $0xb40] sm:$0xff]  ;;  %v4856_v15 = vld [vmem:[%s7317_s5 + $0xa38] sm:$0xff] }
 0x450   : > { %v3561_v44 = vor.u32 %v3560_v57, %v3559_v35  ;;  %3691 = vmatpush.msrb.mxu1 %v4876_v22  ;;  %3746 = vmatpush.msrb.mxu2 %v4891_v50  ;;  %v4874_v58 = vld [vmem:[%s7317_s5 + $0xac8] sm:$0xff]  ;;  %v4873_v63 = vld [vmem:[%s7317_s5 + $0xac0] sm:$0xff]  ;;  %v4888_v49 = vld [vmem:[%s7317_s5 + $0xb38] sm:$0xff] }
 0x451   : > { %3799 = vmatpush.msrb.mxu3 %v4908_v10  ;;  %3639 = vmatpush.msrb.mxu0 %v4858_v28  ;;  %v4906_v45 = vld [vmem:[%s7317_s5 + $0xbc8] sm:$0xff]  ;;  %v4905_v60 = vld [vmem:[%s7317_s5 + $0xbc0] sm:$0xff]  ;;  %v4855_v33 = vld [vmem:[%s7317_s5 + $0xa30] sm:$0xff] }
 0x452   : > { %3595 = vmatmul.f32.vlgmr.msra.gmra.mxu3 %v3561_v44  ;;  %3692 = vmatpush.msrb.mxu1 %v4875_v0  ;;  %v4872_v47 = vld [vmem:[%s7317_s5 + $0xab8] sm:$0xff]  ;;  %v4887_v29 = vld [vmem:[%s7317_s5 + $0xb30] sm:$0xff]  ;;  %v4854_v13 = vld [vmem:[%s7317_s5 + $0xa28] sm:$0xff] }
 0x453   : > { %3747 = vmatpush.msrb.mxu2 %v4890_v48  ;;  %3800 = vmatpush.msrb.mxu3 %v4907_v38  ;;  %v4904_v34 = vld [vmem:[%s7317_s5 + $0xbb8] sm:$0xff]  ;;  %v4871_v40 = vld [vmem:[%s7317_s5 + $0xab0] sm:$0xff]  ;;  %v4886_v62 = vld [vmem:[%s7317_s5 + $0xb28] sm:$0xff] }
 0x454   : > { %3640 = vmatpush.msrb.mxu0 %v4857_v23  ;;  %3693 = vmatpush.msrb.mxu1 %v4874_v58  ;;  %v4903_v2 = vld [vmem:[%s7317_s5 + $0xbb0] sm:$0xff]  ;;  %v4853_v31 = vld [vmem:[%s7317_s5 + $0xa20] sm:$0xff]  ;;  %v4870_v42 = vld [vmem:[%s7317_s5 + $0xaa8] sm:$0xff] }
 0x455   : > { %3748 = vmatpush.msrb.mxu2 %v4889_v17  ;;  %3801 = vmatpush.msrb.mxu3 %v4906_v45  ;;  %v4885_v52 = vld [vmem:[%s7317_s5 + $0xb20] sm:$0xff]  ;;  %v4902_v26 = vld [vmem:[%s7317_s5 + $0xba8] sm:$0xff]  ;;  %v4852_v5 = vld [vmem:[%s7317_s5 + $0xa18] sm:$0xff] }
 0x456   : > { %3641 = vmatpush.msrb.mxu0 %v4856_v15  ;;  %3694 = vmatpush.msrb.mxu1 %v4873_v63  ;;  %v4869_v61 = vld [vmem:[%s7317_s5 + $0xaa0] sm:$0xff]  ;;  %v4884_v21 = vld [vmem:[%s7317_s5 + $0xb18] sm:$0xff]  ;;  %v3601_v54 = vld [vmem:[#allocation4 + $0x20] ss:$64 sm:$0x1] }
 0x457   : > { %3749 = vmatpush.msrb.mxu2 %v4888_v49  ;;  %3802 = vmatpush.msrb.mxu3 %v4905_v60  ;;  %v4901_v6 = vld [vmem:[%s7317_s5 + $0xba0] sm:$0xff]  ;;  %v3602_v3 = vld [vmem:[#allocation4 + $0x20] ss:$64 sm:$0x2]  ;;  %v4868_v36 = vld [vmem:[%s7317_s5 + $0xa98] sm:$0xff] }
 0x458   : > { %3642 = vmatpush.msrb.mxu0 %v4855_v33  ;;  %3695 = vmatpush.msrb.mxu1 %v4872_v47  ;;  %v4851_v46 = vld [vmem:[%s7317_s5 + $0xa10] sm:$0xff]  ;;  %v3603_v55 = vor.u32 %v3602_v3, %v3601_v54  ;;  %v4900_v7 = vld [vmem:[%s7317_s5 + $0xb98] sm:$0xff]  ;;  %v4850_v37 = vld [vmem:[%s7317_s5 + $0xa08] sm:$0xff] }
 0x459   : > { %3750 = vmatpush.msrb.mxu2 %v4887_v29  ;;  %3803 = vmatpush.msrb.mxu3 %v4904_v34  ;;  %v3604_v9 = vld [vmem:[#allocation4 + $0x20] ss:$64 sm:$0x4]  ;;  %v4882_v51 = vld [vmem:[%s7317_s5 + $0xb08] sm:$0xff]  ;;  %v4849_v12 = vld [vmem:[%s7317_s5 + $0xa00] sm:$0xff] }
 0x45a   : > { %3643 = vmatpush.msrb.mxu0 %v4854_v13  ;;  %3696 = vmatpush.msrb.mxu1 %v4871_v40  ;;  %v4883_v56 = vld [vmem:[%s7317_s5 + $0xb10] sm:$0xff]  ;;  %v3605_v27 = vor.u32 %v3604_v9, %v3603_v55  ;;  %v4866_v25 = vld [vmem:[%s7317_s5 + $0xa88] sm:$0xff]  ;;  %v4881_v39 = vld [vmem:[%s7317_s5 + $0xb00] sm:$0xff] }
 0x45b   : > { %3751 = vmatpush.msrb.mxu2 %v4886_v62  ;;  %3804 = vmatpush.msrb.mxu3 %v4903_v2  ;;  %v3606_v24 = vld [vmem:[#allocation4 + $0x20] ss:$64 sm:$0x8]  ;;  %v3709_v19 = vld [vmem:[#allocation4 + $0x22] ss:$64 sm:$0x1] }
 0x45c   : > { %3644 = vmatpush.msrb.mxu0 %v4853_v31  ;;  %3697 = vmatpush.msrb.mxu1 %v4870_v42  ;;  %v4867_v59 = vld [vmem:[%s7317_s5 + $0xa90] sm:$0xff]  ;;  %v3607_v32 = vor.u32 %v3606_v24, %v3605_v27  ;;  %v4898_v4 = vld [vmem:[%s7317_s5 + $0xb88] sm:$0xff]  ;;  %v4928_v50 = vld [vmem:[%s7317_s5 + $0xc78] sm:$0xff] }
 0x45d   : > { %3752 = vmatpush.msrb.mxu2 %v4885_v52  ;;  %3805 = vmatpush.msrb.mxu3 %v4902_v26  ;;  %v3608_v30 = vld [vmem:[#allocation4 + $0x20] ss:$64 sm:$0x10]  ;;  %v3710_v14 = vld [vmem:[#allocation4 + $0x22] ss:$64 sm:$0x2] }
 0x45e   : > { %3645 = vmatpush.msrb.mxu0 %v4852_v5  ;;  %3698 = vmatpush.msrb.mxu1 %v4869_v61  ;;  %v4899_v41 = vld [vmem:[%s7317_s5 + $0xb90] sm:$0xff]  ;;  %v3711_v8 = vor.u32 %v3710_v14, %v3709_v19  ;;  %v3609_v43 = vor.u32 %v3608_v30, %v3607_v32  ;;  %v4865_v35 = vld [vmem:[%s7317_s5 + $0xa80] sm:$0xff]  ;;  %v4926_v54 = vld [vmem:[%s7317_s5 + $0xc68] sm:$0xff] }
 0x45f   : > { %3753 = vmatpush.msrb.mxu2 %v4884_v21  ;;  %3806 = vmatpush.msrb.mxu3 %v4901_v6  ;;  %v3712_v1 = vld [vmem:[#allocation4 + $0x22] ss:$64 sm:$0x4]  ;;  %v3610_v53 = vld [vmem:[#allocation4 + $0x20] ss:$64 sm:$0x20] }
 0x460   : > { %3646 = vmatpush.msrb.mxu0 %v4851_v46  ;;  %3699 = vmatpush.msrb.mxu1 %v4868_v36  ;;  %v3714_v20 = vld [vmem:[#allocation4 + $0x22] ss:$64 sm:$0x8]  ;;  %v3612_v18 = vld [vmem:[#allocation4 + $0x20] ss:$64 sm:$0x40]  ;;  %v3713_v16 = vor.u32 %v3712_v1, %v3711_v8  ;;  %v3611_v10 = vor.u32 %v3610_v53, %v3609_v43 }
 0x461   : > { %3754 = vmatpush.msrb.mxu2 %v4883_v56  ;;  %3807 = vmatpush.msrb.mxu3 %v4900_v7  ;;  %v3716_v11 = vld [vmem:[#allocation4 + $0x22] ss:$64 sm:$0x10]  ;;  %v3614_v57 = vld [vmem:[#allocation4 + $0x20] ss:$64 sm:$0x80] }
 0x462   : > { %3647 = vmatpush.msrb.mxu0 %v4850_v37  ;;  %3700 = vmatpush.msrb.mxu1 %v4867_v59  ;;  %v3718_v22 = vld [vmem:[#allocation4 + $0x22] ss:$64 sm:$0x20]  ;;  %v3715_v28 = vor.u32 %v3714_v20, %v3713_v16  ;;  %v3655_v0 = vld [vmem:[#allocation4 + $0x21] ss:$64 sm:$0x1]  ;;  %v3613_v58 = vor.u32 %v3612_v18, %v3611_v10 }
 0x463   : > { %3755 = vmatpush.msrb.mxu2 %v4882_v51  ;;  %3808 = vmatpush.msrb.mxu3 %v4899_v41  ;;  %v3656_v44 = vld [vmem:[#allocation4 + $0x21] ss:$64 sm:$0x2]  ;;  %v4897_v48 = vld [vmem:[%s7317_s5 + $0xb80] sm:$0xff]  ;;  %v4924_v59 = vld [vmem:[%s7317_s5 + $0xc58] sm:$0xff] }
 0x464   : > { %3648 = vmatpush.msrb.mxu0 %v4849_v12  ;;  %3701 = vmatpush.msrb.mxu1 %v4866_v25  ;;  %v3657_v38 = vor.u32 %v3656_v44, %v3655_v0  ;;  %v3658_v23 = vld [vmem:[#allocation4 + $0x21] ss:$64 sm:$0x4]  ;;  %v3717_v17 = vor.u32 %v3716_v11, %v3715_v28  ;;  %v3720_v15 = vld [vmem:[#allocation4 + $0x22] ss:$64 sm:$0x40]  ;;  %v3615_v60 = vor.u32 %v3614_v57, %v3613_v58  ;;  %v2625_v58 = vpop.f32.mrf.mxu1 }
 0x465   : > { %3756 = vmatpush.msrb.mxu2 %v4881_v39  ;;  %3809 = vmatpush.msrb.mxu3 %v4898_v4  ;;  %v3660_v45 = vld [vmem:[#allocation4 + $0x21] ss:$64 sm:$0x8]  ;;  %v3763_v47 = vld [vmem:[#allocation4 + $0x23] ss:$64 sm:$0x1] }
 0x466   : > { %3849 = vmatpush.msra.mxu0 %v4928_v50  ;;  %3702 = vmatpush.msrb.mxu1 %v4865_v35  ;;  %v3659_v63 = vor.u32 %v3658_v23, %v3657_v38  ;;  %v3662_v49 = vld [vmem:[#allocation4 + $0x21] ss:$64 sm:$0x10]  ;;  %v3719_v33 = vor.u32 %v3718_v22, %v3717_v17  ;;  %v3764_v29 = vld [vmem:[#allocation4 + $0x23] ss:$64 sm:$0x2]  ;;  %v2605_v17 = vpop.f32.mrf.mxu0 }
 0x467   : > { %3810 = vmatpush.msrb.mxu3 %v4897_v48  ;;  %v3722_v34 = vld [vmem:[#allocation4 + $0x22] ss:$64 sm:$0x80]  ;;  %v3765_v40 = vor.u32 %v3764_v29, %v3763_v47  ;;  %v3766_v62 = vld [vmem:[#allocation4 + $0x23] ss:$64 sm:$0x4]  ;;  %3649 = vmatmul.f32.vlgmr.msrb.gmra.mxu0 %v3615_v60 }
 0x468   : > { %v3661_v13 = vor.u32 %v3660_v45, %v3659_v63  ;;  %v3721_v2 = vor.u32 %v3720_v15, %v3719_v33  ;;  %v3664_v31 = vld [vmem:[#allocation4 + $0x21] ss:$64 sm:$0x20]  ;;  %v3768_v42 = vld [vmem:[#allocation4 + $0x23] ss:$64 sm:$0x8]  ;;  %v2626_v45 = vadd.f32 %v2625_v58, %v2605_v17  ;;  %v2678_v15 = vpop.f32.mrf.mxu2 }
 0x469   : > { %v3666_v26 = vld [vmem:[#allocation4 + $0x21] ss:$64 sm:$0x40]  ;;  %v3767_v5 = vor.u32 %v3766_v62, %v3765_v40  ;;  %v3770_v21 = vld [vmem:[#allocation4 + $0x23] ss:$64 sm:$0x10] }
 0x46a   : > { %v3663_v52 = vor.u32 %v3662_v49, %v3661_v13  ;;  %v3723_v61 = vor.u32 %v3722_v34, %v3721_v2  ;;  %v4927_v6 = vld [vmem:[%s7317_s5 + $0xc70] sm:$0xff]  ;;  %v4925_v9 = vld [vmem:[%s7317_s5 + $0xc60] sm:$0xff]  ;;  %v4922_v8 = vld [vmem:[%s7317_s5 + $0xc48] sm:$0xff]  ;;  %v2681_v63 = vadd.f32 %v2678_v15, %v2626_v45  ;;  %v2732_v49 = vpop.f32.mrf.mxu3 }
 0x46b   : > { %v3668_v46 = vld [vmem:[#allocation4 + $0x21] ss:$64 sm:$0x80]  ;;  %v3769_v36 = vor.u32 %v3768_v42, %v3767_v5  ;;  %3850 = vmatpush.msra.mxu0 %v4927_v6  ;;  %v3772_v55 = vld [vmem:[#allocation4 + $0x23] ss:$64 sm:$0x20] }
 0x46c   : > { %v3665_v3 = vor.u32 %v3664_v31, %v3663_v52  ;;  %3757 = vmatmul.f32.vlgmr.msrb.gmra.mxu2 %v3723_v61  ;;  %v3774_v24 = vld [vmem:[#allocation4 + $0x23] ss:$64 sm:$0x40]  ;;  %v3817_v51 = vld [vmem:[#allocation4 + $0x24] ss:$64 sm:$0x1]  ;;  %v2735_v60 = vadd.f32 %v2732_v49, %v2681_v63  ;;  %v2840_v29 = vpop.f32.mrf.mxu1 }
 0x46d   : > { %v3771_v7 = vor.u32 %v3770_v21, %v3769_v36  ;;  %3851 = vmatpush.msra.mxu0 %v4926_v54  ;;  %v3776_v37 = vld [vmem:[#allocation4 + $0x23] ss:$64 sm:$0x80]  ;;  %v3818_v41 = vld [vmem:[#allocation4 + $0x24] ss:$64 sm:$0x2] }
 0x46e   : > { %v3667_v56 = vor.u32 %v3666_v26, %v3665_v3  ;;  %v4923_v19 = vld [vmem:[%s7317_s5 + $0xc50] sm:$0xff]  ;;  %v3819_v14 = vor.u32 %v3818_v41, %v3817_v51  ;;  %v4921_v4 = vld [vmem:[%s7317_s5 + $0xc40] sm:$0xff]  ;;  %v4920_v43 = vld [vmem:[%s7317_s5 + $0xc38] sm:$0xff]  ;;  %v2786_v33 = vpop.f32.mrf.mxu0 }
 0x46f   : > { %v3773_v30 = vor.u32 %v3772_v55, %v3771_v7  ;;  %3852 = vmatpush.msra.mxu0 %v4925_v9  ;;  %v3820_v12 = vld [vmem:[#allocation4 + $0x24] ss:$64 sm:$0x4]  ;;  %v4918_v57 = vld [vmem:[%s7317_s5 + $0xc28] sm:$0xff]  ;;  %v4917_v22 = vld [vmem:[%s7317_s5 + $0xc20] sm:$0xff]  ;;  %v2789_v47 = vadd.f32 %v2786_v33, %v2735_v60 }
 0x470   : > { %v3669_v27 = vor.u32 %v3668_v46, %v3667_v56  ;;  %v3822_v32 = vld [vmem:[#allocation4 + $0x24] ss:$64 sm:$0x8]  ;;  %v3821_v1 = vor.u32 %v3820_v12, %v3819_v14  ;;  %v4916_v10 = vld [vmem:[%s7317_s5 + $0xc18] sm:$0xff]  ;;  %v4914_v48 = vld [vmem:[%s7317_s5 + $0xc08] sm:$0xff]  ;;  %v2894_v13 = vpop.f32.mrf.mxu2 }
 0x471   : > { %v3775_v25 = vor.u32 %v3774_v24, %v3773_v30  ;;  %3853 = vmatpush.msra.mxu0 %v4924_v59  ;;  %v3824_v20 = vld [vmem:[#allocation4 + $0x24] ss:$64 sm:$0x10]  ;;  %v4913_v38 = vld [vmem:[%s7317_s5 + $0xc00] sm:$0xff]  ;;  %v2843_v34 = vadd.f32 %v2840_v29, %v2789_v47  ;;  %v3878_v5 = vld [vmem:[%s7319_s7 + $0x10] sm:$0xf] }
 0x472   : > { %3703 = vmatmul.f32.vlgmr.msrb.gmra.mxu1 %v3669_v27  ;;  %v3823_v53 = vor.u32 %v3822_v32, %v3821_v1  ;;  %v4919_v18 = vld [vmem:[%s7317_s5 + $0xc30] sm:$0xff]  ;;  %v2948_v62 = vpop.f32.mrf.mxu3  ;;  %v3877_v24 = vld [vmem:[%s7319_s7 + $0x8] sm:$0xff] }
 0x473   : > { %v3777_v39 = vor.u32 %v3776_v37, %v3775_v25  ;;  %3854 = vmatpush.msra.mxu0 %v4923_v19  ;;  %v3826_v11 = vld [vmem:[#allocation4 + $0x24] ss:$64 sm:$0x20]  ;;  %v2897_v40 = vadd.f32 %v2894_v13, %v2843_v34  ;;  %4929 = vmatpush.msk.msra.mxu1 %vm3887_vm1, %v3878_v5  ;;  %v3876_v37 = vld [vmem:[%s7319_s7] sm:$0xff] }
 0x474   : > { %v3825_v16 = vor.u32 %v3824_v20, %v3823_v53  ;;  %v3828_v35 = vld [vmem:[#allocation4 + $0x24] ss:$64 sm:$0x40] }
 0x475   : > { %3811 = vmatmul.f32.vlgmr.msrb.gmra.mxu3 %v3777_v39  ;;  %3855 = vmatpush.msra.mxu0 %v4922_v8  ;;  %v4915_v28 = vld [vmem:[%s7317_s5 + $0xc10] sm:$0xff]  ;;  %v2951_v31 = vadd.f32 %v2948_v62, %v2897_v40 }
 0x476   : > { %v3827_v50 = vor.u32 %v3826_v11, %v3825_v16  ;;  %v3830_v44 = vld [vmem:[#allocation4 + $0x24] ss:$64 sm:$0x80]  ;;  %3905 = vmatpush.msra.mxu1 %v3877_v24 }
 0x477   : > { %3856 = vmatpush.msra.mxu0 %v4921_v4 }
 0x478   : > { %v3829_v0 = vor.u32 %v3828_v35, %v3827_v50  ;;  %3906 = vmatpush.msra.mxu1 %v3876_v37  ;;  %v3911_v50 = vlaneseq }
 0x479   : > { %3857 = vmatpush.msra.mxu0 %v4920_v43 }
 0x47a   : > { %v3831_v23 = vor.u32 %v3830_v44, %v3829_v0  ;;  %v3912_v35 = vand.u32 127, %v3911_v50 }
 0x47b   : > { %3858 = vmatpush.msra.mxu0 %v4919_v18  ;;  %v3002_v2 = vpop.f32.mrf.mxu0  ;;  %v5105_v18 = vld [vmem:[%s7318_s6] ss:$0 sm:$0xff] }
 0x47c   : > { %v3005_v42 = vadd.f32 %v3002_v2, %v2951_v31  ;;  %vm3913_vm3 = vcmp.lt.s32.totalorder %v3912_v35, 10 }
 0x47d   : > { %3859 = vmatpush.msra.mxu0 %v4918_v57 }
 0x47f   : > { %3860 = vmatpush.msra.mxu0 %v4917_v22 }
 0x481   : > { %3861 = vmatpush.msra.mxu0 %v4916_v10  ;;  %v5106_v10 = vld [vmem:[%s7320_s8] ss:$0 sm:$0xff] }
 0x483   : > { %3862 = vmatpush.msra.mxu0 %v4915_v28  ;;  %v3110_v26 = vpop.f32.mrf.mxu2 }
 0x484   : > { %v3056_v52 = vpop.f32.mrf.mxu1 }
 0x485   : > { %3863 = vmatpush.msra.mxu0 %v4914_v48  ;;  %v3059_v61 = vadd.f32 %v3056_v52, %v3005_v42 }
 0x487   : > { %3864 = vmatpush.msra.mxu0 %v4913_v38  ;;  %v3113_v21 = vadd.f32 %v3110_v26, %v3059_v61 }
 0x488   : > { %3865 = vmatmul.f32.vlgmr.msra.gmra.mxu0 %v3831_v23 }
 0x48e   : > { %v3164_v6 = vpop.f32.mrf.mxu3 }
 0x48f   : > { %v3167_v3 = vadd.f32 %v3164_v6, %v3113_v21 }
 0x49d   : > { %v3218_v54 = vpop.f32.mrf.mxu0 }
 0x49e   : > { %v3221_v46 = vadd.f32 %v3218_v54, %v3167_v3 }
 0x4a6   : > { %v3326_v55 = vpop.f32.mrf.mxu2 }
 0x4a9   : > { %v3272_v36 = vpop.f32.mrf.mxu1 }
 0x4aa   : > { %v3275_v9 = vadd.f32 %v3272_v36, %v3221_v46 }
 0x4ac   : > { %v3329_v56 = vadd.f32 %v3326_v55, %v3275_v9 }
 0x4b0   : > { %v3380_v7 = vpop.f32.mrf.mxu3 }
 0x4b1   : > { %v3383_v27 = vadd.f32 %v3380_v7, %v3329_v56 }
 0x4c1   : > { %v3434_v59 = vpop.f32.mrf.mxu0 }
 0x4c2   : > { %v3437_v30 = vadd.f32 %v3434_v59, %v3383_v27 }
 0x4cb   : > { %v3488_v51 = vpop.f32.mrf.mxu1  ;;  %v3542_v41 = vpop.f32.mrf.mxu2 }
 0x4cc   : > { %v3491_v19 = vadd.f32 %v3488_v51, %v3437_v30 }
 0x4ce   : > { %v3545_v14 = vadd.f32 %v3542_v41, %v3491_v19 }
 0x4d5   : > { %v3596_v12 = vpop.f32.mrf.mxu3 }
 0x4d6   : > { %v3599_v32 = vadd.f32 %v3596_v12, %v3545_v14 }
 0x4e4   : > { %v3650_v25 = vpop.f32.mrf.mxu0 }
 0x4e5   : > { %v3653_v8 = vadd.f32 %v3650_v25, %v3599_v32 }
 0x4ef   : > { %v3704_v1 = vpop.f32.mrf.mxu1  ;;  %v3758_v39 = vpop.f32.mrf.mxu2 }
 0x4f0   : > { %v3707_v4 = vadd.f32 %v3704_v1, %v3653_v8 }
 0x4f2   : > { %v3761_v53 = vadd.f32 %v3758_v39, %v3707_v4 }
 0x4f8   : > { %v3812_v20 = vpop.f32.mrf.mxu3 }
 0x4f9   : > { %v3815_v43 = vadd.f32 %v3812_v20, %v3761_v53 }
 0x505   : > { %v3866_v16 = vpop.f32.mrf.mxu0 }
 0x506   : > { %v3869_v11 = vadd.f32 %v3866_v16, %v3815_v43 }
 0x508   : > { %v3874_v57 = vadd.f32 %v5105_v18, %v3869_v11 }
 0x50a   : > { %v3875_v22 = vmax.f32 %v3874_v57, 0.0 }
 0x50c   : > { %4930 = vmatmul.msk.f32.vlgmr.msra.gmra.mxu1 %vm3883_vm2, %v3875_v22 }
 0x589   : > { %v3908_v28 = vpop.f32.mrf.mxu1 }
 0x58a   : > { %v3909_v0 = vadd.f32 %v5106_v10, %v3908_v28 }
 0x58c   : > { %v3914_v44 = vsel %vm3913_vm3, %v3909_v0, -inf }
 0x58d   : > { %3915 = vmax.xlane.f32.xlu0 %v3914_v44 }
 0x600   : > { %v3916_v48 = vpop.xlane.xlu0 %3915 }
 0x601   : > { %v3917_v38 = vsub.f32 %v3914_v44, %v3916_v48 }
 0x603   : > { %v3918_v23 = vmul.f32 1.442695, %v3917_v38 }
 0x605   : > { %5107 = vpow2.f32 %v3918_v23 }
 0x60b   : > { %v5108_v58 = vpop.eup %5107 }
 0x60c   : > { %3920 = vadd.xlane.f32.xlu0 %v5108_v58 }
 0x67f   : > { %v3921_v17 = vpop.xlane.xlu0 %3920 }
 0x680   : > { %5109 = vlog2.f32 %v3921_v17 }
 0x686   : > { %v5110_v45 = vpop.eup %5109 }
 0x687   : > { %v3923_v15 = vmul.f32 0.6931472, %v5110_v45 }
 0x689   : > { %v3924_v63 = vadd.f32 %v3923_v15, %v3916_v48 }
 0x68b   : > { %v3925_v49 = vsub.f32 %v3909_v0, %v3924_v63 }
 0x68d   : > { %3926 = vst [vmem:[%s7347_s28] sm:$0xff] %v3925_v49 }
 0x68e   : > { %5138 = shalt.err (!%p5135_p7)
}
 0x68f   : > { %5044 = dma.vmem_to_hbm [thread:$0]  (%p5280_p5), %s3941_s29, 128, %s3943_s21, %s3928_s16  }
 0x690 PF: > { %p5050_p8 = scmp.ge.s32.totalorder %s5181_s12, 2  ;;  %s3954_s23 = sand.u32 1, %s5169_s30  }
 0x691   : > { %s3955_s28 = scalar_lea.sflag [#allocation6], %s3954_s23 }
 0x692   : > { %p5047_p9 = pnand %p5050_p8, %p5284_p6 }
 0x694   : > { %p5048_p10 = pneg %p5047_p9 }
 0x696   : > { %5164 = dma.done.wait (%p5048_p10), %s3955_s28, 128  }
 0x697   : > { %5166 = vsyncadd (%p5048_p10), %s3955_s28, 4294967168  ;;  %p19_p11 = scmp.ge.s32.totalorder %s5268_s15, 4   ;;  %s7349_s30 = smov %s5173_s10 }
 0x698   : > { %s7350_s10 = smov %s5177_s11  ;;  %s7351_s11 = smov %s5278_s18 }
 0x699   : > { %s7352_s12 = smov %s5268_s15  ;;  %21 = sbr.rel (!%p19_p11) target bundleno = 3 (0x3), region = 210 }
 0x69e   :  { %3961 = vsyncpa [#allocation6], 1 }
 0x69f   :  { %3963 = vsyncpa [#allocation6 + $0x1], 1 }

</bundles_post_ra>
